<compile_context>
chip_gen: v5e
topology: v5e:2x2
jax: 0.10.0
libtpu: 0.0.40
codegen_flags: <defaults>
</compile_context>

<pallas_src>
import functools

import jax
import jax.numpy as jnp
from jax import lax
from jax.experimental import pallas as pl
from jax.experimental.pallas import tpu as pltpu

W = 32          # input image height/width implied by the module (16*6*6 flatten)
SEG = 36 * W    # per-image flat lane segment: 4 zero pad rows -> 1152 = 9*128


# ----------------------------------------------------------------------------
# Single fused kernel: conv1+pool, conv2+pool, gather/flatten, fc1..fc3
# ----------------------------------------------------------------------------
def _net_kernel(xf_ref, w1_ref, b1_ref, w2_ref, b2_ref, sel_ref,
                fw1_ref, fb1_ref, fw2_ref, fb2_ref, fw3_ref, fb3_ref,
                o_ref, a1_ref, m2_ref, feats_ref, *, tb):
    seg = SEG
    L1 = tb * seg - 128        # conv1 (pooled-in-place) slab length
    L2 = tb * seg - 384        # conv2 (pooled-in-place) slab length

    # ---- conv1 (1->6, 3x3 valid) + bias + ReLU + fused 2x2 max-pool --------
    # image b pixel (r, c) sits at lane b*seg + 32*r + c; the 9 taps are lane
    # shifts of the whole batch block, stacked on sublanes -> ONE MXU matmul.
    xs1 = jnp.concatenate(
        [xf_ref[:, W * di + dj:W * di + dj + L1]
         for di in range(3) for dj in range(3)], axis=0)                # (9, L1)
    c1 = jnp.dot(w1_ref[...], xs1, preferred_element_type=jnp.float32)  # (6, L1)
    c1 = jnp.maximum(c1 + b1_ref[...], 0.0)
    c1 = jnp.maximum(c1, jnp.roll(c1, -1, axis=1))                      # + right
    c1 = jnp.maximum(c1, jnp.roll(c1, -W, axis=1))                      # + below
    a1_ref[...] = c1.astype(a1_ref.dtype)   # pooled (i, j) stays at 64*i + 2*j

    # ---- conv2 (6->16, 3x3 valid) + bias + ReLU + fused 2x2 max-pool -------
    xs2 = jnp.concatenate(
        [a1_ref[:, 2 * W * di + 2 * dj:2 * W * di + 2 * dj + L2]
         for di in range(3) for dj in range(3)], axis=0)                # (54, L2)
    c2 = jnp.dot(w2_ref[...], xs2, preferred_element_type=jnp.float32)  # (16, L2)
    c2 = jnp.maximum(c2 + b2_ref[...], 0.0)
    c2 = jnp.maximum(c2, jnp.roll(c2, -2, axis=1))
    c2 = jnp.maximum(c2, jnp.roll(c2, -2 * W, axis=1))
    m2_ref[...] = c2.astype(m2_ref.dtype)   # pooled (i, j) stays at 128*i + 4*j

    # ---- flatten: selection matmul gathers the 6x6 grid per image ----------
    sel = sel_ref[...]                                   # (768, 128) 0/1 bf16
    for b in range(tb):                                  # aligned 768-lane slices
        seg_b = m2_ref[:, b * seg:b * seg + 768]         # (16, 768)
        feats_ref[b] = jnp.dot(seg_b, sel,
                               preferred_element_type=jnp.float32
                               ).astype(feats_ref.dtype)  # (16, 128)

    # ---- fc1 (576->120): 16 accumulated per-channel matmuls + ReLU ---------
    h = jnp.zeros((tb, 120), jnp.float32)
    for c in range(16):
        h = h + jnp.dot(feats_ref[:, c, :], fw1_ref[c],
                        preferred_element_type=jnp.float32)
    h = jnp.maximum(h + fb1_ref[...], 0.0).astype(jnp.bfloat16)

    # ---- fc2 + ReLU, fc3 (output zero-padded to 128 lanes, lane-dense) -----
    h = jnp.dot(h, fw2_ref[...], preferred_element_type=jnp.float32) + fb2_ref[...]
    h = jnp.maximum(h, 0.0).astype(jnp.bfloat16)
    h = jnp.dot(h, fw3_ref[...], preferred_element_type=jnp.float32) + fb3_ref[...]
    o_ref[...] = h.astype(o_ref.dtype)


def _choose_tb(n):
    # Tiny batches: one grid step (block == full batch is always a legal block).
    # Otherwise 16 images per step (multiple of 8 sublanes, ~6 MB peak VMEM),
    # giving >=2 "parallel" blocks for megacore / v7x's two TensorCores.
    return n if n <= 16 else 16


def net_forward(prep, x):
    n = x.shape[0]
    assert x.shape[1:] == (1, W, W), "Net.forward needs (N, 1, 32, 32) input"
    tb = _choose_tb(n)
    grid = pl.cdiv(n, tb)
    n_pad = grid * tb

    # Pad 4 zero rows per image (-> 1152 = 9*128 lanes/image) and lay the whole
    # batch side by side on the lane axis; one tiny fused XLA prep op.
    xp = jnp.pad(x, ((0, n_pad - n), (0, 0), (0, 4), (0, 0)))
    xf = xp.reshape(1, n_pad * SEG).astype(jnp.bfloat16)

    # Static consumed-position invariants of the in-place pooled layouts:
    #   conv1 pooling consumes acc positions <= b*SEG+957, taps read <= +66;
    #   conv2 pooling consumes acc positions <= b*SEG+726, taps read <= +132.
    L1 = tb * SEG - 128
    L2 = tb * SEG - 384
    assert L1 >= (tb - 1) * SEG + 960 and L1 + 66 <= tb * SEG
    assert L2 >= (tb - 1) * SEG + 768 and L2 + 132 <= L1

    out = pl.pallas_call(
        functools.partial(_net_kernel, tb=tb),
        out_shape=jax.ShapeDtypeStruct((n_pad, 128), jnp.float32),
        grid=(grid,),
        in_specs=[
            pl.BlockSpec((1, tb * SEG), lambda i: (0, i)),
            pl.BlockSpec(prep["w1"].shape, lambda i: (0, 0)),
            pl.BlockSpec(prep["b1"].shape, lambda i: (0, 0)),
            pl.BlockSpec(prep["w2"].shape, lambda i: (0, 0)),
            pl.BlockSpec(prep["b2"].shape, lambda i: (0, 0)),
            pl.BlockSpec(prep["sel"].shape, lambda i: (0, 0)),
            pl.BlockSpec(prep["fw1"].shape, lambda i: (0, 0, 0)),
            pl.BlockSpec(prep["fb1"].shape, lambda i: (0, 0)),
            pl.BlockSpec(prep["fw2"].shape, lambda i: (0, 0)),
            pl.BlockSpec(prep["fb2"].shape, lambda i: (0, 0)),
            pl.BlockSpec(prep["fw3"].shape, lambda i: (0, 0)),
            pl.BlockSpec(prep["fb3"].shape, lambda i: (0, 0)),
        ],
        out_specs=pl.BlockSpec((tb, 128), lambda i: (i, 0)),
        scratch_shapes=[
            pltpu.VMEM((6, L1), jnp.bfloat16),        # pooled conv1 (in place)
            pltpu.VMEM((16, L2), jnp.bfloat16),       # pooled conv2 (in place)
            pltpu.VMEM((tb, 16, 128), jnp.bfloat16),  # gathered features
        ],
        compiler_params=pltpu.CompilerParams(
            dimension_semantics=("parallel",),
            vmem_limit_bytes=48 * 1024 * 1024,
        ),
    )(xf, prep["w1"], prep["b1"], prep["w2"], prep["b2"], prep["sel"],
      prep["fw1"], prep["fb1"], prep["fw2"], prep["fb2"], prep["fw3"],
      prep["fb3"])
    return out[:n, :10]


# ----------------------------------------------------------------------------
# Parameters (PyTorch shapes) and one-time kernel-layout preparation
# ----------------------------------------------------------------------------
def init_params(key):
    def uniform(key, shape, fan_in):
        bound = 1.0 / jnp.sqrt(float(fan_in))
        return jax.random.uniform(key, shape, jnp.float32, -bound, bound)

    ks = jax.random.split(key, 10)
    return {
        "conv1_w": uniform(ks[0], (6, 1, 3, 3), 9),
        "conv1_b": uniform(ks[1], (6,), 9),
        "conv2_w": uniform(ks[2], (16, 6, 3, 3), 54),
        "conv2_b": uniform(ks[3], (16,), 54),
        "fc1_w": uniform(ks[4], (120, 16 * 6 * 6), 576),   # PyTorch (out, in)
        "fc1_b": uniform(ks[5], (120,), 576),
        "fc2_w": uniform(ks[6], (84, 120), 120),
        "fc2_b": uniform(ks[7], (84,), 120),
        "fc3_w": uniform(ks[8], (10, 84), 84),
        "fc3_b": uniform(ks[9], (10,), 84),
    }


def prepare_params(p):
    """One-time re-layout of PyTorch-shaped params into kernel layouts."""
    # conv weights -> (Cout, 9*Cin); stacked-window row order is tap t = 3*di+dj
    # outermost, input channel innermost.
    w1 = p["conv1_w"].reshape(6, 9).astype(jnp.bfloat16)                  # Cin=1
    w2 = p["conv2_w"].transpose(0, 2, 3, 1).reshape(16, 54).astype(jnp.bfloat16)

    # 0/1 selection matrix: pooled position 128*i+4*j -> feature lane 6*i+j.
    ii, jj = jnp.meshgrid(jnp.arange(6), jnp.arange(6), indexing="ij")
    rows = (128 * ii + 4 * jj).reshape(-1)
    cols = (6 * ii + jj).reshape(-1)
    sel = (jnp.zeros((768, 128), jnp.float32)
           .at[rows, cols].set(1.0).astype(jnp.bfloat16))

    # fc1 weights permuted so fc1 consumes the gathered (channel, 128) layout:
    # fw1[c, 6*i+j, o] = fc1_w[o, c*36 + 6*i + j]; lanes 36..127 are zero.
    fw1 = p["fc1_w"].reshape(120, 16, 36).transpose(1, 2, 0)
    fw1 = jnp.pad(fw1, ((0, 0), (0, 128 - 36), (0, 0))).astype(jnp.bfloat16)

    # fc3 zero-padded to 128 output lanes (lane-dense HBM store).
    fw3 = jnp.pad(p["fc3_w"].T, ((0, 0), (0, 128 - 10))).astype(jnp.bfloat16)
    fb3 = jnp.pad(p["fc3_b"], (0, 128 - 10)).reshape(1, 128)

    return {
        "w1": w1, "b1": p["conv1_b"].reshape(6, 1),
        "w2": w2, "b2": p["conv2_b"].reshape(16, 1),
        "sel": sel,
        "fw1": fw1, "fb1": p["fc1_b"].reshape(1, -1),
        "fw2": p["fc2_w"].T.astype(jnp.bfloat16), "fb2": p["fc2_b"].reshape(1, -1),
        "fw3": fw3, "fb3": fb3,
    }


# ----------------------------------------------------------------------------
# Pure-JAX f32 reference of Net.forward (validation only)
# ----------------------------------------------------------------------------
def net_reference(p, x):
    def conv(h, w, b):
        y = lax.conv_general_dilated(h, w, (1, 1), "VALID",
                                     dimension_numbers=("NCHW", "OIHW", "NCHW"))
        return y + b.reshape(1, -1, 1, 1)

    def pool(h):
        return lax.reduce_window(h, -jnp.inf, lax.max,
                                 (1, 1, 2, 2), (1, 1, 2, 2), "VALID")

    h = pool(jax.nn.relu(conv(x, p["conv1_w"], p["conv1_b"])))
    h = pool(jax.nn.relu(conv(h, p["conv2_w"], p["conv2_b"])))
    h = h.reshape(h.shape[0], -1)
    h = jax.nn.relu(h @ p["fc1_w"].T + p["fc1_b"])
    h = jax.nn.relu(h @ p["fc2_w"].T + p["fc2_b"])
    return h @ p["fc3_w"].T + p["fc3_b"]


if __name__ == "__main__":
    key = jax.random.PRNGKey(0)
    k_params, k_x = jax.random.split(key)
    params = init_params(k_params)
    prep = prepare_params(params)          # one-time weight re-layout

    x = jax.random.normal(k_x, (2, 1, 32, 32), jnp.float32)

    out = jax.jit(net_forward)(prep, x)
    out = jax.block_until_ready(out)
    assert out.shape == (2, 10)
    assert bool(jnp.all(jnp.isfinite(out)))

    ref = net_reference(params, x)
    max_err = float(jnp.max(jnp.abs(out - ref)))
    # bf16 matmul operands with f32 accumulation -> loose tolerance by design.
    assert max_err < 0.1, f"mismatch vs reference: max abs err = {max_err}"
    print("KERNEL_OK")
</pallas_src>

<mosaic_0001>
module attributes {stable_mosaic.version = 11 : i64} {
  func.func @_net_kernel(%arg0: i32, %arg1: memref<1x2304xbf16, #tpu.memory_space<vmem>>, %arg2: memref<6x9xbf16, #tpu.memory_space<vmem>>, %arg3: memref<6x1xf32, #tpu.memory_space<vmem>>, %arg4: memref<16x54xbf16, #tpu.memory_space<vmem>>, %arg5: memref<16x1xf32, #tpu.memory_space<vmem>>, %arg6: memref<768x128xbf16, #tpu.memory_space<vmem>>, %arg7: memref<16x128x120xbf16, #tpu.memory_space<vmem>>, %arg8: memref<1x120xf32, #tpu.memory_space<vmem>>, %arg9: memref<120x84xbf16, #tpu.memory_space<vmem>>, %arg10: memref<1x84xf32, #tpu.memory_space<vmem>>, %arg11: memref<84x128xbf16, #tpu.memory_space<vmem>>, %arg12: memref<1x128xf32, #tpu.memory_space<vmem>>, %arg13: memref<2x128xf32, #tpu.memory_space<vmem>>, %arg14: memref<6x2176xbf16, #tpu.memory_space<vmem>>, %arg15: memref<16x1920xbf16, #tpu.memory_space<vmem>>, %arg16: memref<2x16x128xbf16, #tpu.memory_space<vmem>>) attributes {dimension_semantics = [#tpu.dimension_semantics<parallel>], iteration_bounds = array<i64: 1>, scalar_prefetch = 0 : i64, scratch_operands = 3 : i64, tpu.core_type = #tpu.core_type<tc>, window_params = [{transform_indices = @transform_0, window_bounds = array<i64: 1, 2304>}, {pipeline_mode = #tpu.pipeline_mode<synchronous>, transform_indices = @transform_1, window_bounds = array<i64: 6, 9>}, {pipeline_mode = #tpu.pipeline_mode<synchronous>, transform_indices = @transform_2, window_bounds = array<i64: 6, 1>}, {pipeline_mode = #tpu.pipeline_mode<synchronous>, transform_indices = @transform_3, window_bounds = array<i64: 16, 54>}, {pipeline_mode = #tpu.pipeline_mode<synchronous>, transform_indices = @transform_4, window_bounds = array<i64: 16, 1>}, {pipeline_mode = #tpu.pipeline_mode<synchronous>, transform_indices = @transform_5, window_bounds = array<i64: 768, 128>}, {pipeline_mode = #tpu.pipeline_mode<synchronous>, transform_indices = @transform_6, window_bounds = array<i64: 16, 128, 120>}, {pipeline_mode = #tpu.pipeline_mode<synchronous>, transform_indices = @transform_7, window_bounds = array<i64: 1, 120>}, {pipeline_mode = #tpu.pipeline_mode<synchronous>, transform_indices = @transform_8, window_bounds = array<i64: 120, 84>}, {pipeline_mode = #tpu.pipeline_mode<synchronous>, transform_indices = @transform_9, window_bounds = array<i64: 1, 84>}, {pipeline_mode = #tpu.pipeline_mode<synchronous>, transform_indices = @transform_10, window_bounds = array<i64: 84, 128>}, {pipeline_mode = #tpu.pipeline_mode<synchronous>, transform_indices = @transform_11, window_bounds = array<i64: 1, 128>}, {transform_indices = @transform_12, window_bounds = array<i64: 2, 128>}]} {
    %c0 = arith.constant 0 : index
    %c0_0 = arith.constant 0 : index
    %0 = vector.load %arg1[%c0, %c0_0] : memref<1x2304xbf16, #tpu.memory_space<vmem>>, vector<1x2176xbf16>
    %c0_1 = arith.constant 0 : index
    %c1 = arith.constant 1 : index
    %1 = vector.load %arg1[%c0_1, %c1] : memref<1x2304xbf16, #tpu.memory_space<vmem>>, vector<1x2176xbf16>
    %c0_2 = arith.constant 0 : index
    %c2 = arith.constant 2 : index
    %2 = vector.load %arg1[%c0_2, %c2] : memref<1x2304xbf16, #tpu.memory_space<vmem>>, vector<1x2176xbf16>
    %c0_3 = arith.constant 0 : index
    %c32 = arith.constant 32 : index
    %3 = vector.load %arg1[%c0_3, %c32] : memref<1x2304xbf16, #tpu.memory_space<vmem>>, vector<1x2176xbf16>
    %c0_4 = arith.constant 0 : index
    %c33 = arith.constant 33 : index
    %4 = vector.load %arg1[%c0_4, %c33] : memref<1x2304xbf16, #tpu.memory_space<vmem>>, vector<1x2176xbf16>
    %c0_5 = arith.constant 0 : index
    %c34 = arith.constant 34 : index
    %5 = vector.load %arg1[%c0_5, %c34] : memref<1x2304xbf16, #tpu.memory_space<vmem>>, vector<1x2176xbf16>
    %c0_6 = arith.constant 0 : index
    %c64 = arith.constant 64 : index
    %6 = vector.load %arg1[%c0_6, %c64] : memref<1x2304xbf16, #tpu.memory_space<vmem>>, vector<1x2176xbf16>
    %c0_7 = arith.constant 0 : index
    %c65 = arith.constant 65 : index
    %7 = vector.load %arg1[%c0_7, %c65] : memref<1x2304xbf16, #tpu.memory_space<vmem>>, vector<1x2176xbf16>
    %c0_8 = arith.constant 0 : index
    %c66 = arith.constant 66 : index
    %8 = vector.load %arg1[%c0_8, %c66] : memref<1x2304xbf16, #tpu.memory_space<vmem>>, vector<1x2176xbf16>
    %9 = tpu.concatenate %0, %1, %2, %3, %4, %5, %6, %7, %8 in 0 : vector<1x2176xbf16>, vector<1x2176xbf16>, vector<1x2176xbf16>, vector<1x2176xbf16>, vector<1x2176xbf16>, vector<1x2176xbf16>, vector<1x2176xbf16>, vector<1x2176xbf16>, vector<1x2176xbf16> -> vector<9x2176xbf16>
    %c0_9 = arith.constant 0 : index
    %c0_10 = arith.constant 0 : index
    %10 = vector.load %arg2[%c0_9, %c0_10] : memref<6x9xbf16, #tpu.memory_space<vmem>>, vector<6x9xbf16>
    %cst = arith.constant dense<0.000000e+00> : vector<6x2176xf32>
    %11 = tpu.matmul %10, %9, %cst {dimension_numbers = #tpu.dot_dimension_numbers<[1], [0], [0], [1], [0, 0, 1, 1], [], []>} : vector<6x9xbf16>, vector<9x2176xbf16>, vector<6x2176xf32> -> vector<6x2176xf32>
    %c0_11 = arith.constant 0 : index
    %c0_12 = arith.constant 0 : index
    %12 = vector.load %arg3[%c0_11, %c0_12] : memref<6x1xf32, #tpu.memory_space<vmem>>, vector<6x1xf32>
    %13 = vector.broadcast %12 : vector<6x1xf32> to vector<6x2176xf32>
    %14 = arith.addf %11, %13 : vector<6x2176xf32>
    %cst_13 = arith.constant 0.000000e+00 : f32
    %15 = vector.broadcast %cst_13 : f32 to vector<6x2176xf32>
    %16 = arith.maximumf %14, %15 : vector<6x2176xf32>
    %17 = vector.extract_strided_slice %16 {offsets = [0, 1], sizes = [6, 2175], strides = [1, 1]} : vector<6x2176xf32> to vector<6x2175xf32>
    %18 = vector.extract_strided_slice %16 {offsets = [0, 0], sizes = [6, 1], strides = [1, 1]} : vector<6x2176xf32> to vector<6x1xf32>
    %19 = tpu.concatenate %17, %18 in 1 : vector<6x2175xf32>, vector<6x1xf32> -> vector<6x2176xf32>
    %20 = arith.maximumf %16, %19 : vector<6x2176xf32>
    %21 = vector.extract_strided_slice %20 {offsets = [0, 32], sizes = [6, 2144], strides = [1, 1]} : vector<6x2176xf32> to vector<6x2144xf32>
    %22 = vector.extract_strided_slice %20 {offsets = [0, 0], sizes = [6, 32], strides = [1, 1]} : vector<6x2176xf32> to vector<6x32xf32>
    %23 = tpu.concatenate %21, %22 in 1 : vector<6x2144xf32>, vector<6x32xf32> -> vector<6x2176xf32>
    %24 = arith.maximumf %20, %23 : vector<6x2176xf32>
    %25 = arith.truncf %24 : vector<6x2176xf32> to vector<6x2176xbf16>
    %c0_14 = arith.constant 0 : index
    %c0_15 = arith.constant 0 : index
    %26 = vector.load %arg14[%c0_14, %c0_15] : memref<6x2176xbf16, #tpu.memory_space<vmem>>, vector<6x2176xbf16>
    tpu.vector_store %arg14[%c0_14, %c0_15], %25 {strides = array<i32>} : memref<6x2176xbf16, #tpu.memory_space<vmem>>, vector<6x2176xbf16>,
    %c0_16 = arith.constant 0 : index
    %c0_17 = arith.constant 0 : index
    %27 = vector.load %arg14[%c0_16, %c0_17] : memref<6x2176xbf16, #tpu.memory_space<vmem>>, vector<6x1920xbf16>
    %c0_18 = arith.constant 0 : index
    %c2_19 = arith.constant 2 : index
    %28 = vector.load %arg14[%c0_18, %c2_19] : memref<6x2176xbf16, #tpu.memory_space<vmem>>, vector<6x1920xbf16>
    %c0_20 = arith.constant 0 : index
    %c4 = arith.constant 4 : index
    %29 = vector.load %arg14[%c0_20, %c4] : memref<6x2176xbf16, #tpu.memory_space<vmem>>, vector<6x1920xbf16>
    %c0_21 = arith.constant 0 : index
    %c64_22 = arith.constant 64 : index
    %30 = vector.load %arg14[%c0_21, %c64_22] : memref<6x2176xbf16, #tpu.memory_space<vmem>>, vector<6x1920xbf16>
    %c0_23 = arith.constant 0 : index
    %c66_24 = arith.constant 66 : index
    %31 = vector.load %arg14[%c0_23, %c66_24] : memref<6x2176xbf16, #tpu.memory_space<vmem>>, vector<6x1920xbf16>
    %c0_25 = arith.constant 0 : index
    %c68 = arith.constant 68 : index
    %32 = vector.load %arg14[%c0_25, %c68] : memref<6x2176xbf16, #tpu.memory_space<vmem>>, vector<6x1920xbf16>
    %c0_26 = arith.constant 0 : index
    %c128 = arith.constant 128 : index
    %33 = vector.load %arg14[%c0_26, %c128] : memref<6x2176xbf16, #tpu.memory_space<vmem>>, vector<6x1920xbf16>
    %c0_27 = arith.constant 0 : index
    %c130 = arith.constant 130 : index
    %34 = vector.load %arg14[%c0_27, %c130] : memref<6x2176xbf16, #tpu.memory_space<vmem>>, vector<6x1920xbf16>
    %c0_28 = arith.constant 0 : index
    %c132 = arith.constant 132 : index
    %35 = vector.load %arg14[%c0_28, %c132] : memref<6x2176xbf16, #tpu.memory_space<vmem>>, vector<6x1920xbf16>
    %36 = tpu.concatenate %27, %28, %29, %30, %31, %32, %33, %34, %35 in 0 : vector<6x1920xbf16>, vector<6x1920xbf16>, vector<6x1920xbf16>, vector<6x1920xbf16>, vector<6x1920xbf16>, vector<6x1920xbf16>, vector<6x1920xbf16>, vector<6x1920xbf16>, vector<6x1920xbf16> -> vector<54x1920xbf16>
    %c0_29 = arith.constant 0 : index
    %c0_30 = arith.constant 0 : index
    %37 = vector.load %arg4[%c0_29, %c0_30] : memref<16x54xbf16, #tpu.memory_space<vmem>>, vector<16x54xbf16>
    %cst_31 = arith.constant dense<0.000000e+00> : vector<16x1920xf32>
    %38 = tpu.matmul %37, %36, %cst_31 {dimension_numbers = #tpu.dot_dimension_numbers<[1], [0], [0], [1], [0, 0, 1, 1], [], []>} : vector<16x54xbf16>, vector<54x1920xbf16>, vector<16x1920xf32> -> vector<16x1920xf32>
    %c0_32 = arith.constant 0 : index
    %c0_33 = arith.constant 0 : index
    %39 = vector.load %arg5[%c0_32, %c0_33] : memref<16x1xf32, #tpu.memory_space<vmem>>, vector<16x1xf32>
    %40 = vector.broadcast %39 : vector<16x1xf32> to vector<16x1920xf32>
    %41 = arith.addf %38, %40 : vector<16x1920xf32>
    %cst_34 = arith.constant 0.000000e+00 : f32
    %42 = vector.broadcast %cst_34 : f32 to vector<16x1920xf32>
    %43 = arith.maximumf %41, %42 : vector<16x1920xf32>
    %44 = vector.extract_strided_slice %43 {offsets = [0, 2], sizes = [16, 1918], strides = [1, 1]} : vector<16x1920xf32> to vector<16x1918xf32>
    %45 = vector.extract_strided_slice %43 {offsets = [0, 0], sizes = [16, 2], strides = [1, 1]} : vector<16x1920xf32> to vector<16x2xf32>
    %46 = tpu.concatenate %44, %45 in 1 : vector<16x1918xf32>, vector<16x2xf32> -> vector<16x1920xf32>
    %47 = arith.maximumf %43, %46 : vector<16x1920xf32>
    %48 = vector.extract_strided_slice %47 {offsets = [0, 64], sizes = [16, 1856], strides = [1, 1]} : vector<16x1920xf32> to vector<16x1856xf32>
    %49 = vector.extract_strided_slice %47 {offsets = [0, 0], sizes = [16, 64], strides = [1, 1]} : vector<16x1920xf32> to vector<16x64xf32>
    %50 = tpu.concatenate %48, %49 in 1 : vector<16x1856xf32>, vector<16x64xf32> -> vector<16x1920xf32>
    %51 = arith.maximumf %47, %50 : vector<16x1920xf32>
    %52 = arith.truncf %51 : vector<16x1920xf32> to vector<16x1920xbf16>
    %c0_35 = arith.constant 0 : index
    %c0_36 = arith.constant 0 : index
    %53 = vector.load %arg15[%c0_35, %c0_36] : memref<16x1920xbf16, #tpu.memory_space<vmem>>, vector<16x1920xbf16>
    tpu.vector_store %arg15[%c0_35, %c0_36], %52 {strides = array<i32>} : memref<16x1920xbf16, #tpu.memory_space<vmem>>, vector<16x1920xbf16>,
    %c0_37 = arith.constant 0 : index
    %c0_38 = arith.constant 0 : index
    %54 = vector.load %arg6[%c0_37, %c0_38] : memref<768x128xbf16, #tpu.memory_space<vmem>>, vector<768x128xbf16>
    %c0_39 = arith.constant 0 : index
    %c0_40 = arith.constant 0 : index
    %55 = vector.load %arg15[%c0_39, %c0_40] : memref<16x1920xbf16, #tpu.memory_space<vmem>>, vector<16x768xbf16>
    %cst_41 = arith.constant dense<0.000000e+00> : vector<16x128xf32>
    %56 = tpu.matmul %55, %54, %cst_41 {dimension_numbers = #tpu.dot_dimension_numbers<[1], [0], [0], [1], [0, 0, 1, 1], [], []>} : vector<16x768xbf16>, vector<768x128xbf16>, vector<16x128xf32> -> vector<16x128xf32>
    %57 = arith.truncf %56 : vector<16x128xf32> to vector<16x128xbf16>
    %c0_42 = arith.constant 0 : index
    %c0_43 = arith.constant 0 : index
    %c0_44 = arith.constant 0 : index
    %58 = vector.load %arg16[%c0_42, %c0_43, %c0_44] : memref<2x16x128xbf16, #tpu.memory_space<vmem>>, vector<1x16x128xbf16>
    %59 = vector.shape_cast %58 : vector<1x16x128xbf16> to vector<16x128xbf16>
    %60 = vector.shape_cast %57 : vector<16x128xbf16> to vector<1x16x128xbf16>
    tpu.vector_store %arg16[%c0_42, %c0_43, %c0_44], %60 {strides = array<i32>} : memref<2x16x128xbf16, #tpu.memory_space<vmem>>, vector<1x16x128xbf16>,
    %c0_45 = arith.constant 0 : index
    %c1152 = arith.constant 1152 : index
    %61 = vector.load %arg15[%c0_45, %c1152] : memref<16x1920xbf16, #tpu.memory_space<vmem>>, vector<16x768xbf16>
    %cst_46 = arith.constant dense<0.000000e+00> : vector<16x128xf32>
    %62 = tpu.matmul %61, %54, %cst_46 {dimension_numbers = #tpu.dot_dimension_numbers<[1], [0], [0], [1], [0, 0, 1, 1], [], []>} : vector<16x768xbf16>, vector<768x128xbf16>, vector<16x128xf32> -> vector<16x128xf32>
    %63 = arith.truncf %62 : vector<16x128xf32> to vector<16x128xbf16>
    %c1_47 = arith.constant 1 : index
    %c0_48 = arith.constant 0 : index
    %c0_49 = arith.constant 0 : index
    %64 = vector.load %arg16[%c1_47, %c0_48, %c0_49] : memref<2x16x128xbf16, #tpu.memory_space<vmem>>, vector<1x16x128xbf16>
    %65 = vector.shape_cast %64 : vector<1x16x128xbf16> to vector<16x128xbf16>
    %66 = vector.shape_cast %63 : vector<16x128xbf16> to vector<1x16x128xbf16>
    tpu.vector_store %arg16[%c1_47, %c0_48, %c0_49], %66 {strides = array<i32>} : memref<2x16x128xbf16, #tpu.memory_space<vmem>>, vector<1x16x128xbf16>,
    %cst_50 = arith.constant 0.000000e+00 : f32
    %67 = vector.broadcast %cst_50 : f32 to vector<2x120xf32>
    %c0_51 = arith.constant 0 : index
    %c0_52 = arith.constant 0 : index
    %c0_53 = arith.constant 0 : index
    %68 = vector.load %arg16[%c0_51, %c0_52, %c0_53] : memref<2x16x128xbf16, #tpu.memory_space<vmem>>, vector<2x1x128xbf16>
    %69 = vector.shape_cast %68 : vector<2x1x128xbf16> to vector<2x128xbf16>
    %c0_54 = arith.constant 0 : index
    %c0_55 = arith.constant 0 : index
    %c0_56 = arith.constant 0 : index
    %70 = vector.load %arg7[%c0_54, %c0_55, %c0_56] : memref<16x128x120xbf16, #tpu.memory_space<vmem>>, vector<1x128x120xbf16>
    %71 = vector.shape_cast %70 : vector<1x128x120xbf16> to vector<128x120xbf16>
    %cst_57 = arith.constant dense<0.000000e+00> : vector<2x120xf32>
    %72 = tpu.matmul %69, %71, %cst_57 {dimension_numbers = #tpu.dot_dimension_numbers<[1], [0], [0], [1], [0, 0, 1, 1], [], []>} : vector<2x128xbf16>, vector<128x120xbf16>, vector<2x120xf32> -> vector<2x120xf32>
    %73 = arith.addf %67, %72 : vector<2x120xf32>
    %c0_58 = arith.constant 0 : index
    %c1_59 = arith.constant 1 : index
    %c0_60 = arith.constant 0 : index
    %74 = vector.load %arg16[%c0_58, %c1_59, %c0_60] : memref<2x16x128xbf16, #tpu.memory_space<vmem>>, vector<2x1x128xbf16>
    %75 = vector.shape_cast %74 : vector<2x1x128xbf16> to vector<2x128xbf16>
    %c1_61 = arith.constant 1 : index
    %c0_62 = arith.constant 0 : index
    %c0_63 = arith.constant 0 : index
    %76 = vector.load %arg7[%c1_61, %c0_62, %c0_63] : memref<16x128x120xbf16, #tpu.memory_space<vmem>>, vector<1x128x120xbf16>
    %77 = vector.shape_cast %76 : vector<1x128x120xbf16> to vector<128x120xbf16>
    %cst_64 = arith.constant dense<0.000000e+00> : vector<2x120xf32>
    %78 = tpu.matmul %75, %77, %cst_64 {dimension_numbers = #tpu.dot_dimension_numbers<[1], [0], [0], [1], [0, 0, 1, 1], [], []>} : vector<2x128xbf16>, vector<128x120xbf16>, vector<2x120xf32> -> vector<2x120xf32>
    %79 = arith.addf %73, %78 : vector<2x120xf32>
    %c0_65 = arith.constant 0 : index
    %c2_66 = arith.constant 2 : index
    %c0_67 = arith.constant 0 : index
    %80 = vector.load %arg16[%c0_65, %c2_66, %c0_67] : memref<2x16x128xbf16, #tpu.memory_space<vmem>>, vector<2x1x128xbf16>
    %81 = vector.shape_cast %80 : vector<2x1x128xbf16> to vector<2x128xbf16>
    %c2_68 = arith.constant 2 : index
    %c0_69 = arith.constant 0 : index
    %c0_70 = arith.constant 0 : index
    %82 = vector.load %arg7[%c2_68, %c0_69, %c0_70] : memref<16x128x120xbf16, #tpu.memory_space<vmem>>, vector<1x128x120xbf16>
    %83 = vector.shape_cast %82 : vector<1x128x120xbf16> to vector<128x120xbf16>
    %cst_71 = arith.constant dense<0.000000e+00> : vector<2x120xf32>
    %84 = tpu.matmul %81, %83, %cst_71 {dimension_numbers = #tpu.dot_dimension_numbers<[1], [0], [0], [1], [0, 0, 1, 1], [], []>} : vector<2x128xbf16>, vector<128x120xbf16>, vector<2x120xf32> -> vector<2x120xf32>
    %85 = arith.addf %79, %84 : vector<2x120xf32>
    %c0_72 = arith.constant 0 : index
    %c3 = arith.constant 3 : index
    %c0_73 = arith.constant 0 : index
    %86 = vector.load %arg16[%c0_72, %c3, %c0_73] : memref<2x16x128xbf16, #tpu.memory_space<vmem>>, vector<2x1x128xbf16>
    %87 = vector.shape_cast %86 : vector<2x1x128xbf16> to vector<2x128xbf16>
    %c3_74 = arith.constant 3 : index
    %c0_75 = arith.constant 0 : index
    %c0_76 = arith.constant 0 : index
    %88 = vector.load %arg7[%c3_74, %c0_75, %c0_76] : memref<16x128x120xbf16, #tpu.memory_space<vmem>>, vector<1x128x120xbf16>
    %89 = vector.shape_cast %88 : vector<1x128x120xbf16> to vector<128x120xbf16>
    %cst_77 = arith.constant dense<0.000000e+00> : vector<2x120xf32>
    %90 = tpu.matmul %87, %89, %cst_77 {dimension_numbers = #tpu.dot_dimension_numbers<[1], [0], [0], [1], [0, 0, 1, 1], [], []>} : vector<2x128xbf16>, vector<128x120xbf16>, vector<2x120xf32> -> vector<2x120xf32>
    %91 = arith.addf %85, %90 : vector<2x120xf32>
    %c0_78 = arith.constant 0 : index
    %c4_79 = arith.constant 4 : index
    %c0_80 = arith.constant 0 : index
    %92 = vector.load %arg16[%c0_78, %c4_79, %c0_80] : memref<2x16x128xbf16, #tpu.memory_space<vmem>>, vector<2x1x128xbf16>
    %93 = vector.shape_cast %92 : vector<2x1x128xbf16> to vector<2x128xbf16>
    %c4_81 = arith.constant 4 : index
    %c0_82 = arith.constant 0 : index
    %c0_83 = arith.constant 0 : index
    %94 = vector.load %arg7[%c4_81, %c0_82, %c0_83] : memref<16x128x120xbf16, #tpu.memory_space<vmem>>, vector<1x128x120xbf16>
    %95 = vector.shape_cast %94 : vector<1x128x120xbf16> to vector<128x120xbf16>
    %cst_84 = arith.constant dense<0.000000e+00> : vector<2x120xf32>
    %96 = tpu.matmul %93, %95, %cst_84 {dimension_numbers = #tpu.dot_dimension_numbers<[1], [0], [0], [1], [0, 0, 1, 1], [], []>} : vector<2x128xbf16>, vector<128x120xbf16>, vector<2x120xf32> -> vector<2x120xf32>
    %97 = arith.addf %91, %96 : vector<2x120xf32>
    %c0_85 = arith.constant 0 : index
    %c5 = arith.constant 5 : index
    %c0_86 = arith.constant 0 : index
    %98 = vector.load %arg16[%c0_85, %c5, %c0_86] : memref<2x16x128xbf16, #tpu.memory_space<vmem>>, vector<2x1x128xbf16>
    %99 = vector.shape_cast %98 : vector<2x1x128xbf16> to vector<2x128xbf16>
    %c5_87 = arith.constant 5 : index
    %c0_88 = arith.constant 0 : index
    %c0_89 = arith.constant 0 : index
    %100 = vector.load %arg7[%c5_87, %c0_88, %c0_89] : memref<16x128x120xbf16, #tpu.memory_space<vmem>>, vector<1x128x120xbf16>
    %101 = vector.shape_cast %100 : vector<1x128x120xbf16> to vector<128x120xbf16>
    %cst_90 = arith.constant dense<0.000000e+00> : vector<2x120xf32>
    %102 = tpu.matmul %99, %101, %cst_90 {dimension_numbers = #tpu.dot_dimension_numbers<[1], [0], [0], [1], [0, 0, 1, 1], [], []>} : vector<2x128xbf16>, vector<128x120xbf16>, vector<2x120xf32> -> vector<2x120xf32>
    %103 = arith.addf %97, %102 : vector<2x120xf32>
    %c0_91 = arith.constant 0 : index
    %c6 = arith.constant 6 : index
    %c0_92 = arith.constant 0 : index
    %104 = vector.load %arg16[%c0_91, %c6, %c0_92] : memref<2x16x128xbf16, #tpu.memory_space<vmem>>, vector<2x1x128xbf16>
    %105 = vector.shape_cast %104 : vector<2x1x128xbf16> to vector<2x128xbf16>
    %c6_93 = arith.constant 6 : index
    %c0_94 = arith.constant 0 : index
    %c0_95 = arith.constant 0 : index
    %106 = vector.load %arg7[%c6_93, %c0_94, %c0_95] : memref<16x128x120xbf16, #tpu.memory_space<vmem>>, vector<1x128x120xbf16>
    %107 = vector.shape_cast %106 : vector<1x128x120xbf16> to vector<128x120xbf16>
    %cst_96 = arith.constant dense<0.000000e+00> : vector<2x120xf32>
    %108 = tpu.matmul %105, %107, %cst_96 {dimension_numbers = #tpu.dot_dimension_numbers<[1], [0], [0], [1], [0, 0, 1, 1], [], []>} : vector<2x128xbf16>, vector<128x120xbf16>, vector<2x120xf32> -> vector<2x120xf32>
    %109 = arith.addf %103, %108 : vector<2x120xf32>
    %c0_97 = arith.constant 0 : index
    %c7 = arith.constant 7 : index
    %c0_98 = arith.constant 0 : index
    %110 = vector.load %arg16[%c0_97, %c7, %c0_98] : memref<2x16x128xbf16, #tpu.memory_space<vmem>>, vector<2x1x128xbf16>
    %111 = vector.shape_cast %110 : vector<2x1x128xbf16> to vector<2x128xbf16>
    %c7_99 = arith.constant 7 : index
    %c0_100 = arith.constant 0 : index
    %c0_101 = arith.constant 0 : index
    %112 = vector.load %arg7[%c7_99, %c0_100, %c0_101] : memref<16x128x120xbf16, #tpu.memory_space<vmem>>, vector<1x128x120xbf16>
    %113 = vector.shape_cast %112 : vector<1x128x120xbf16> to vector<128x120xbf16>
    %cst_102 = arith.constant dense<0.000000e+00> : vector<2x120xf32>
    %114 = tpu.matmul %111, %113, %cst_102 {dimension_numbers = #tpu.dot_dimension_numbers<[1], [0], [0], [1], [0, 0, 1, 1], [], []>} : vector<2x128xbf16>, vector<128x120xbf16>, vector<2x120xf32> -> vector<2x120xf32>
    %115 = arith.addf %109, %114 : vector<2x120xf32>
    %c0_103 = arith.constant 0 : index
    %c8 = arith.constant 8 : index
    %c0_104 = arith.constant 0 : index
    %116 = vector.load %arg16[%c0_103, %c8, %c0_104] : memref<2x16x128xbf16, #tpu.memory_space<vmem>>, vector<2x1x128xbf16>
    %117 = vector.shape_cast %116 : vector<2x1x128xbf16> to vector<2x128xbf16>
    %c8_105 = arith.constant 8 : index
    %c0_106 = arith.constant 0 : index
    %c0_107 = arith.constant 0 : index
    %118 = vector.load %arg7[%c8_105, %c0_106, %c0_107] : memref<16x128x120xbf16, #tpu.memory_space<vmem>>, vector<1x128x120xbf16>
    %119 = vector.shape_cast %118 : vector<1x128x120xbf16> to vector<128x120xbf16>
    %cst_108 = arith.constant dense<0.000000e+00> : vector<2x120xf32>
    %120 = tpu.matmul %117, %119, %cst_108 {dimension_numbers = #tpu.dot_dimension_numbers<[1], [0], [0], [1], [0, 0, 1, 1], [], []>} : vector<2x128xbf16>, vector<128x120xbf16>, vector<2x120xf32> -> vector<2x120xf32>
    %121 = arith.addf %115, %120 : vector<2x120xf32>
    %c0_109 = arith.constant 0 : index
    %c9 = arith.constant 9 : index
    %c0_110 = arith.constant 0 : index
    %122 = vector.load %arg16[%c0_109, %c9, %c0_110] : memref<2x16x128xbf16, #tpu.memory_space<vmem>>, vector<2x1x128xbf16>
    %123 = vector.shape_cast %122 : vector<2x1x128xbf16> to vector<2x128xbf16>
    %c9_111 = arith.constant 9 : index
    %c0_112 = arith.constant 0 : index
    %c0_113 = arith.constant 0 : index
    %124 = vector.load %arg7[%c9_111, %c0_112, %c0_113] : memref<16x128x120xbf16, #tpu.memory_space<vmem>>, vector<1x128x120xbf16>
    %125 = vector.shape_cast %124 : vector<1x128x120xbf16> to vector<128x120xbf16>
    %cst_114 = arith.constant dense<0.000000e+00> : vector<2x120xf32>
    %126 = tpu.matmul %123, %125, %cst_114 {dimension_numbers = #tpu.dot_dimension_numbers<[1], [0], [0], [1], [0, 0, 1, 1], [], []>} : vector<2x128xbf16>, vector<128x120xbf16>, vector<2x120xf32> -> vector<2x120xf32>
    %127 = arith.addf %121, %126 : vector<2x120xf32>
    %c0_115 = arith.constant 0 : index
    %c10 = arith.constant 10 : index
    %c0_116 = arith.constant 0 : index
    %128 = vector.load %arg16[%c0_115, %c10, %c0_116] : memref<2x16x128xbf16, #tpu.memory_space<vmem>>, vector<2x1x128xbf16>
    %129 = vector.shape_cast %128 : vector<2x1x128xbf16> to vector<2x128xbf16>
    %c10_117 = arith.constant 10 : index
    %c0_118 = arith.constant 0 : index
    %c0_119 = arith.constant 0 : index
    %130 = vector.load %arg7[%c10_117, %c0_118, %c0_119] : memref<16x128x120xbf16, #tpu.memory_space<vmem>>, vector<1x128x120xbf16>
    %131 = vector.shape_cast %130 : vector<1x128x120xbf16> to vector<128x120xbf16>
    %cst_120 = arith.constant dense<0.000000e+00> : vector<2x120xf32>
    %132 = tpu.matmul %129, %131, %cst_120 {dimension_numbers = #tpu.dot_dimension_numbers<[1], [0], [0], [1], [0, 0, 1, 1], [], []>} : vector<2x128xbf16>, vector<128x120xbf16>, vector<2x120xf32> -> vector<2x120xf32>
    %133 = arith.addf %127, %132 : vector<2x120xf32>
    %c0_121 = arith.constant 0 : index
    %c11 = arith.constant 11 : index
    %c0_122 = arith.constant 0 : index
    %134 = vector.load %arg16[%c0_121, %c11, %c0_122] : memref<2x16x128xbf16, #tpu.memory_space<vmem>>, vector<2x1x128xbf16>
    %135 = vector.shape_cast %134 : vector<2x1x128xbf16> to vector<2x128xbf16>
    %c11_123 = arith.constant 11 : index
    %c0_124 = arith.constant 0 : index
    %c0_125 = arith.constant 0 : index
    %136 = vector.load %arg7[%c11_123, %c0_124, %c0_125] : memref<16x128x120xbf16, #tpu.memory_space<vmem>>, vector<1x128x120xbf16>
    %137 = vector.shape_cast %136 : vector<1x128x120xbf16> to vector<128x120xbf16>
    %cst_126 = arith.constant dense<0.000000e+00> : vector<2x120xf32>
    %138 = tpu.matmul %135, %137, %cst_126 {dimension_numbers = #tpu.dot_dimension_numbers<[1], [0], [0], [1], [0, 0, 1, 1], [], []>} : vector<2x128xbf16>, vector<128x120xbf16>, vector<2x120xf32> -> vector<2x120xf32>
    %139 = arith.addf %133, %138 : vector<2x120xf32>
    %c0_127 = arith.constant 0 : index
    %c12 = arith.constant 12 : index
    %c0_128 = arith.constant 0 : index
    %140 = vector.load %arg16[%c0_127, %c12, %c0_128] : memref<2x16x128xbf16, #tpu.memory_space<vmem>>, vector<2x1x128xbf16>
    %141 = vector.shape_cast %140 : vector<2x1x128xbf16> to vector<2x128xbf16>
    %c12_129 = arith.constant 12 : index
    %c0_130 = arith.constant 0 : index
    %c0_131 = arith.constant 0 : index
    %142 = vector.load %arg7[%c12_129, %c0_130, %c0_131] : memref<16x128x120xbf16, #tpu.memory_space<vmem>>, vector<1x128x120xbf16>
    %143 = vector.shape_cast %142 : vector<1x128x120xbf16> to vector<128x120xbf16>
    %cst_132 = arith.constant dense<0.000000e+00> : vector<2x120xf32>
    %144 = tpu.matmul %141, %143, %cst_132 {dimension_numbers = #tpu.dot_dimension_numbers<[1], [0], [0], [1], [0, 0, 1, 1], [], []>} : vector<2x128xbf16>, vector<128x120xbf16>, vector<2x120xf32> -> vector<2x120xf32>
    %145 = arith.addf %139, %144 : vector<2x120xf32>
    %c0_133 = arith.constant 0 : index
    %c13 = arith.constant 13 : index
    %c0_134 = arith.constant 0 : index
    %146 = vector.load %arg16[%c0_133, %c13, %c0_134] : memref<2x16x128xbf16, #tpu.memory_space<vmem>>, vector<2x1x128xbf16>
    %147 = vector.shape_cast %146 : vector<2x1x128xbf16> to vector<2x128xbf16>
    %c13_135 = arith.constant 13 : index
    %c0_136 = arith.constant 0 : index
    %c0_137 = arith.constant 0 : index
    %148 = vector.load %arg7[%c13_135, %c0_136, %c0_137] : memref<16x128x120xbf16, #tpu.memory_space<vmem>>, vector<1x128x120xbf16>
    %149 = vector.shape_cast %148 : vector<1x128x120xbf16> to vector<128x120xbf16>
    %cst_138 = arith.constant dense<0.000000e+00> : vector<2x120xf32>
    %150 = tpu.matmul %147, %149, %cst_138 {dimension_numbers = #tpu.dot_dimension_numbers<[1], [0], [0], [1], [0, 0, 1, 1], [], []>} : vector<2x128xbf16>, vector<128x120xbf16>, vector<2x120xf32> -> vector<2x120xf32>
    %151 = arith.addf %145, %150 : vector<2x120xf32>
    %c0_139 = arith.constant 0 : index
    %c14 = arith.constant 14 : index
    %c0_140 = arith.constant 0 : index
    %152 = vector.load %arg16[%c0_139, %c14, %c0_140] : memref<2x16x128xbf16, #tpu.memory_space<vmem>>, vector<2x1x128xbf16>
    %153 = vector.shape_cast %152 : vector<2x1x128xbf16> to vector<2x128xbf16>
    %c14_141 = arith.constant 14 : index
    %c0_142 = arith.constant 0 : index
    %c0_143 = arith.constant 0 : index
    %154 = vector.load %arg7[%c14_141, %c0_142, %c0_143] : memref<16x128x120xbf16, #tpu.memory_space<vmem>>, vector<1x128x120xbf16>
    %155 = vector.shape_cast %154 : vector<1x128x120xbf16> to vector<128x120xbf16>
    %cst_144 = arith.constant dense<0.000000e+00> : vector<2x120xf32>
    %156 = tpu.matmul %153, %155, %cst_144 {dimension_numbers = #tpu.dot_dimension_numbers<[1], [0], [0], [1], [0, 0, 1, 1], [], []>} : vector<2x128xbf16>, vector<128x120xbf16>, vector<2x120xf32> -> vector<2x120xf32>
    %157 = arith.addf %151, %156 : vector<2x120xf32>
    %c0_145 = arith.constant 0 : index
    %c15 = arith.constant 15 : index
    %c0_146 = arith.constant 0 : index
    %158 = vector.load %arg16[%c0_145, %c15, %c0_146] : memref<2x16x128xbf16, #tpu.memory_space<vmem>>, vector<2x1x128xbf16>
    %159 = vector.shape_cast %158 : vector<2x1x128xbf16> to vector<2x128xbf16>
    %c15_147 = arith.constant 15 : index
    %c0_148 = arith.constant 0 : index
    %c0_149 = arith.constant 0 : index
    %160 = vector.load %arg7[%c15_147, %c0_148, %c0_149] : memref<16x128x120xbf16, #tpu.memory_space<vmem>>, vector<1x128x120xbf16>
    %161 = vector.shape_cast %160 : vector<1x128x120xbf16> to vector<128x120xbf16>
    %cst_150 = arith.constant dense<0.000000e+00> : vector<2x120xf32>
    %162 = tpu.matmul %159, %161, %cst_150 {dimension_numbers = #tpu.dot_dimension_numbers<[1], [0], [0], [1], [0, 0, 1, 1], [], []>} : vector<2x128xbf16>, vector<128x120xbf16>, vector<2x120xf32> -> vector<2x120xf32>
    %163 = arith.addf %157, %162 : vector<2x120xf32>
    %c0_151 = arith.constant 0 : index
    %c0_152 = arith.constant 0 : index
    %164 = vector.load %arg8[%c0_151, %c0_152] : memref<1x120xf32, #tpu.memory_space<vmem>>, vector<1x120xf32>
    %165 = vector.broadcast %164 : vector<1x120xf32> to vector<2x120xf32>
    %166 = arith.addf %163, %165 : vector<2x120xf32>
    %cst_153 = arith.constant 0.000000e+00 : f32
    %167 = vector.broadcast %cst_153 : f32 to vector<2x120xf32>
    %168 = arith.maximumf %166, %167 : vector<2x120xf32>
    %169 = arith.truncf %168 : vector<2x120xf32> to vector<2x120xbf16>
    %c0_154 = arith.constant 0 : index
    %c0_155 = arith.constant 0 : index
    %170 = vector.load %arg9[%c0_154, %c0_155] : memref<120x84xbf16, #tpu.memory_space<vmem>>, vector<120x84xbf16>
    %cst_156 = arith.constant dense<0.000000e+00> : vector<2x84xf32>
    %171 = tpu.matmul %169, %170, %cst_156 {dimension_numbers = #tpu.dot_dimension_numbers<[1], [0], [0], [1], [0, 0, 1, 1], [], []>} : vector<2x120xbf16>, vector<120x84xbf16>, vector<2x84xf32> -> vector<2x84xf32>
    %c0_157 = arith.constant 0 : index
    %c0_158 = arith.constant 0 : index
    %172 = vector.load %arg10[%c0_157, %c0_158] : memref<1x84xf32, #tpu.memory_space<vmem>>, vector<1x84xf32>
    %173 = vector.broadcast %172 : vector<1x84xf32> to vector<2x84xf32>
    %174 = arith.addf %171, %173 : vector<2x84xf32>
    %cst_159 = arith.constant 0.000000e+00 : f32
    %175 = vector.broadcast %cst_159 : f32 to vector<2x84xf32>
    %176 = arith.maximumf %174, %175 : vector<2x84xf32>
    %177 = arith.truncf %176 : vector<2x84xf32> to vector<2x84xbf16>
    %c0_160 = arith.constant 0 : index
    %c0_161 = arith.constant 0 : index
    %178 = vector.load %arg11[%c0_160, %c0_161] : memref<84x128xbf16, #tpu.memory_space<vmem>>, vector<84x128xbf16>
    %cst_162 = arith.constant dense<0.000000e+00> : vector<2x128xf32>
    %179 = tpu.matmul %177, %178, %cst_162 {dimension_numbers = #tpu.dot_dimension_numbers<[1], [0], [0], [1], [0, 0, 1, 1], [], []>} : vector<2x84xbf16>, vector<84x128xbf16>, vector<2x128xf32> -> vector<2x128xf32>
    %c0_163 = arith.constant 0 : index
    %c0_164 = arith.constant 0 : index
    %180 = vector.load %arg12[%c0_163, %c0_164] : memref<1x128xf32, #tpu.memory_space<vmem>>, vector<1x128xf32>
    %181 = vector.broadcast %180 : vector<1x128xf32> to vector<2x128xf32>
    %182 = arith.addf %179, %181 : vector<2x128xf32>
    %c0_165 = arith.constant 0 : index
    %c0_166 = arith.constant 0 : index
    %183 = vector.load %arg13[%c0_165, %c0_166] : memref<2x128xf32, #tpu.memory_space<vmem>>, vector<2x128xf32>
    tpu.vector_store %arg13[%c0_165, %c0_166], %182 {strides = array<i32>} : memref<2x128xf32, #tpu.memory_space<vmem>>, vector<2x128xf32>,
    return
  }
  func.func @transform_0(%arg0: i32) -> (i32, i32) {
    %c0_i32 = arith.constant 0 : i32
    %c0_i32_0 = arith.constant 0 : i32
    return %c0_i32, %arg0 : i32, i32
  }
  func.func @transform_1(%arg0: i32) -> (i32, i32) {
    %c0_i32 = arith.constant 0 : i32
    %c0_i32_0 = arith.constant 0 : i32
    %c0_i32_1 = arith.constant 0 : i32
    return %c0_i32, %c0_i32_0 : i32, i32
  }
  func.func @transform_2(%arg0: i32) -> (i32, i32) {
    %c0_i32 = arith.constant 0 : i32
    %c0_i32_0 = arith.constant 0 : i32
    %c0_i32_1 = arith.constant 0 : i32
    return %c0_i32, %c0_i32_0 : i32, i32
  }
  func.func @transform_3(%arg0: i32) -> (i32, i32) {
    %c0_i32 = arith.constant 0 : i32
    %c0_i32_0 = arith.constant 0 : i32
    %c0_i32_1 = arith.constant 0 : i32
    return %c0_i32, %c0_i32_0 : i32, i32
  }
  func.func @transform_4(%arg0: i32) -> (i32, i32) {
    %c0_i32 = arith.constant 0 : i32
    %c0_i32_0 = arith.constant 0 : i32
    %c0_i32_1 = arith.constant 0 : i32
    return %c0_i32, %c0_i32_0 : i32, i32
  }
  func.func @transform_5(%arg0: i32) -> (i32, i32) {
    %c0_i32 = arith.constant 0 : i32
    %c0_i32_0 = arith.constant 0 : i32
    %c0_i32_1 = arith.constant 0 : i32
    return %c0_i32, %c0_i32_0 : i32, i32
  }
  func.func @transform_6(%arg0: i32) -> (i32, i32, i32) {
    %c0_i32 = arith.constant 0 : i32
    %c0_i32_0 = arith.constant 0 : i32
    %c0_i32_1 = arith.constant 0 : i32
    %c0_i32_2 = arith.constant 0 : i32
    return %c0_i32, %c0_i32_0, %c0_i32_1 : i32, i32, i32
  }
  func.func @transform_7(%arg0: i32) -> (i32, i32) {
    %c0_i32 = arith.constant 0 : i32
    %c0_i32_0 = arith.constant 0 : i32
    %c0_i32_1 = arith.constant 0 : i32
    return %c0_i32, %c0_i32_0 : i32, i32
  }
  func.func @transform_8(%arg0: i32) -> (i32, i32) {
    %c0_i32 = arith.constant 0 : i32
    %c0_i32_0 = arith.constant 0 : i32
    %c0_i32_1 = arith.constant 0 : i32
    return %c0_i32, %c0_i32_0 : i32, i32
  }
  func.func @transform_9(%arg0: i32) -> (i32, i32) {
    %c0_i32 = arith.constant 0 : i32
    %c0_i32_0 = arith.constant 0 : i32
    %c0_i32_1 = arith.constant 0 : i32
    return %c0_i32, %c0_i32_0 : i32, i32
  }
  func.func @transform_10(%arg0: i32) -> (i32, i32) {
    %c0_i32 = arith.constant 0 : i32
    %c0_i32_0 = arith.constant 0 : i32
    %c0_i32_1 = arith.constant 0 : i32
    return %c0_i32, %c0_i32_0 : i32, i32
  }
  func.func @transform_11(%arg0: i32) -> (i32, i32) {
    %c0_i32 = arith.constant 0 : i32
    %c0_i32_0 = arith.constant 0 : i32
    %c0_i32_1 = arith.constant 0 : i32
    return %c0_i32, %c0_i32_0 : i32, i32
  }
  func.func @transform_12(%arg0: i32) -> (i32, i32) {
    %c0_i32 = arith.constant 0 : i32
    %c0_i32_0 = arith.constant 0 : i32
    return %arg0, %c0_i32 : i32, i32
  }
}

</mosaic_0001>

<bundles_post_ra>
// kernel: net_forward.1
= control target key start
LH: loop header
LB: loop body
LE: loop exit
PB: predicated region body
PF: predicated region fallthrough
CT: control target
= control target key end

     0   :  { %s11140_s0 = inlined_call_operand.vmem [shape: bf16[1,2304], index: 0, kind: input, shape index: {}]   ;;  %s11141_s1 = inlined_call_operand.vmem [shape: bf16[6,9], index: 1, kind: input, shape index: {}]   ;;  %s11142_s2 = inlined_call_operand.vmem [shape: f32[6,1], index: 2, kind: input, shape index: {}]   ;;  %s11143_s3 = inlined_call_operand.vmem [shape: bf16[16,54], index: 3, kind: input, shape index: {}]   ;;  %s11144_s4 = inlined_call_operand.vmem [shape: f32[16,1], index: 4, kind: input, shape index: {}]   ;;  %s11145_s5 = inlined_call_operand.vmem [shape: bf16[768,128], index: 5, kind: input, shape index: {}]   ;;  %s11146_s6 = inlined_call_operand.vmem [shape: bf16[16,128,120], index: 6, kind: input, shape index: {}]   ;;  %s11147_s7 = inlined_call_operand.vmem [shape: f32[1,120], index: 7, kind: input, shape index: {}]   ;;  %s11148_s8 = inlined_call_operand.vmem [shape: bf16[120,84], index: 8, kind: input, shape index: {}]   ;;  %s11149_s9 = inlined_call_operand.vmem [shape: f32[1,84], index: 9, kind: input, shape index: {}]   ;;  %s11150_s10 = inlined_call_operand.vmem [shape: bf16[84,128], index: 10, kind: input, shape index: {}]   ;;  %s11151_s11 = inlined_call_operand.vmem [shape: f32[1,128], index: 11, kind: input, shape index: {}]   ;;  %s11152_s12 = inlined_call_operand.hbm [shape: f32[2,128], index: 12, kind: output, shape index: {}]  }
   0x1   :  { %v7458_v0 = vld [vmem:[%s11140_s0] sm:$0xff] }
   0x2   :  { %48 = vst [vmem:[#allocation1] ss:$9 sm:$0xff] %v7458_v0 }
   0x3   :  { %17 = vsyncpa [#allocation6], 0  ;;  %v7464_v1 = vld [vmem:[%s11140_s0 + $0x8] sm:$0xff]  ;;  %v45_v10 = vld [vmem:[%s11140_s0 + $0x10] sm:$0x1]  ;;  %s7377_s27 = smov 127  }
   0x4   :  { %v7511_v37 = vld [vmem:[%s11140_s0 + $0x10] sm:$0x3]  ;;  %s7378_s0 = smov 126   ;;  %s7379_s30 = smov 96   ;;  %vm181_vm0 = vcmask 1039360   ;;  %vm11186_vm1 = vcmask 1040384  }
   0x5   :  { %s7380_s13 = smov 95   ;;  %s7381_s14 = smov 94   ;;  %vm1031_vm2 = vsmask.f32 256  ;;  %vm11195_vm4 = vcmask 1031168   ;;  %vm421_vm5 = vcmask 785408  }
   0x6   :  { %s7382_s15 = smov 64   ;;  %s7383_s16 = smov 63   ;;  %vm7876_vm3 = vmand %vm11186_vm1, %vm1031_vm2  ;;  %vm1119_vm6 = vcmask 1041408   ;;  %vm1120_vm7 = vsmask.f32 1280  ;;  %vm532_vm9 = vcmask 777216  }
   0x7   :  { %s7384_s17 = smov 62   ;;  %vm7977_vm8 = vmand %vm1119_vm6, %vm1120_vm7  ;;  %vm661_vm10 = vcmask 769024   ;;  %vm1208_vm11 = vcmask 1042432   ;;  %vm1209_vm12 = vsmask.f32 2304  ;;  %vm772_vm13 = vcmask 523264  }
   0x8   :  { %vm11197_vm14 = vcmask 515072   ;;  %vm11196_vm15 = vcmask 1043456   ;;  %vm1298_vm2 = vsmask.f32 3328  ;;  %vm8195_vm7 = vmand %vm1208_vm11, %vm1209_vm12  ;;  %s7388_s21 = smov 124  }
   0x9   :  { %v7466_v2 = vld [vmem:[#allocation1] sm:$0xff]  ;;  %v7468_v3 = vld [vmem:[#allocation1 + $0x9] sm:$0xff]  ;;  %v7470_v4 = vld [vmem:[#allocation1 + $0x12] sm:$0xff] }
   0xa   :  { %v7472_v5 = vld [vmem:[#allocation1 + $0x1b] sm:$0xff]  ;;  %v7474_v6 = vld [vmem:[#allocation1 + $0x24] sm:$0xff]  ;;  %v7476_v7 = vld [vmem:[#allocation1 + $0x2d] sm:$0xff] }
   0xb   :  { %11233 = vst [vmem:[#allocation8_spill] sm:$0xff] %v7472_v5  ;;  %v7478_v8 = vld [vmem:[#allocation1 + $0x36] sm:$0xff]  ;;  %v7480_v9 = vld [vmem:[#allocation1 + $0x3f] sm:$0xff]  ;;  %vm8228_vm12 = vmand %vm11196_vm15, %vm1298_vm2  ;;  %vm1012_vm2 = vcmask 506880  }
   0xc   :  { %11234 = vst [vmem:[#allocation9_spill] sm:$0xff] %v7474_v6 }
   0xd   :  { %11235 = vst [vmem:[#allocation10_spill] sm:$0xff] %v7476_v7 }
   0xe   :  { %11236 = vst [vmem:[#allocation11_spill] sm:$0xff] %v7478_v8 }
   0xf   :  { %11237 = vst [vmem:[#allocation12_spill] sm:$0xff] %v7480_v9 }
  0x10   :  { %58 = vst [vmem:[#allocation1] ss:$9 sm:$0xff] %v7464_v1 }
  0x17   :  { %v7486_v11 = vld [vmem:[#allocation1] sm:$0xff]  ;;  %v7488_v12 = vld [vmem:[#allocation1 + $0x9] sm:$0xff]  ;;  %v7490_v13 = vld [vmem:[#allocation1 + $0x12] sm:$0xff] }
  0x18   :  { %11238 = vst [vmem:[#allocation13_spill] sm:$0xff] %v7486_v11  ;;  %v7492_v14 = vld [vmem:[#allocation1 + $0x1b] sm:$0xff]  ;;  %v7494_v15 = vld [vmem:[#allocation1 + $0x24] sm:$0xff]  ;;  %v7496_v16 = vld [vmem:[#allocation1 + $0x2d] sm:$0xff] }
  0x19   :  { %11239 = vst [vmem:[#allocation14_spill] sm:$0xff] %v7488_v12  ;;  %v7498_v17 = vld [vmem:[#allocation1 + $0x36] sm:$0xff]  ;;  %v7500_v18 = vld [vmem:[#allocation1 + $0x3f] sm:$0xff] }
  0x1a   :  { %11240 = vst [vmem:[#allocation15_spill] sm:$0xff] %v7490_v13 }
  0x1b   :  { %11241 = vst [vmem:[#allocation16_spill] sm:$0xff] %v7492_v14 }
  0x1c   :  { %11242 = vst [vmem:[#allocation17_spill] sm:$0xff] %v7494_v15 }
  0x1d   :  { %11243 = vst [vmem:[#allocation18_spill] sm:$0xff] %v7496_v16 }
  0x1e   :  { %11244 = vst [vmem:[#allocation19_spill] sm:$0xff] %v7498_v17 }
  0x1f   :  { %11245 = vst [vmem:[#allocation20_spill] sm:$0xff] %v7500_v18 }
  0x20   :  { %68 = vst [vmem:[#allocation1] ss:$9 sm:$0xff] %v45_v10 }
  0x27   :  { %v7502_v19 = vld [vmem:[#allocation1] sm:$0xff] }
  0x28   :  { %11246 = vst [vmem:[#allocation21_spill] sm:$0xff] %v7502_v19 }
  0x29   :  { %87 = vst [vmem:[#allocation1] ss:$9 sm:$0xff] %v7458_v0 }
  0x30   :  { %v92_v20 = vld [vmem:[#allocation1 + $0x24] sm:$0xff]  ;;  %v93_v21 = vld [vmem:[#allocation1 + $0x2d] sm:$0xff]  ;;  %v94_v22 = vld [vmem:[#allocation1 + $0x36] sm:$0xff] }
  0x31   :  { %v117_v23 = vshll.u32 %v92_v20, 16  ;;  %v121_v24 = vshll.u32 %v94_v22, 16  ;;  %v88_v25 = vld [vmem:[#allocation1] sm:$0xff]  ;;  %v89_v26 = vld [vmem:[#allocation1 + $0x9] sm:$0xff]  ;;  %v90_v27 = vld [vmem:[#allocation1 + $0x12] sm:$0xff]  ;;  %v119_v49 = vshll.u32 %v93_v21, 16 }
  0x32   :  { %v91_v28 = vld [vmem:[#allocation1 + $0x1b] sm:$0xff]  ;;  %v109_v30 = vshll.u32 %v88_v25, 16  ;;  %v111_v31 = vshll.u32 %v89_v26, 16  ;;  %v113_v34 = vshll.u32 %v90_v27, 16 }
  0x33   :  { %v95_v29 = vld [vmem:[#allocation1 + $0x3f] sm:$0xff]  ;;  %v6946_v32 = vpack.i.bf16 %v121_v24, %v117_v23  ;;  %v115_v35 = vshll.u32 %v91_v28, 16 }
  0x34   :  { %96 = vst [vmem:[#allocation1] ss:$9 sm:$0xff] %v7464_v1  ;;  %v6936_v33 = vpack.i.bf16 %v111_v31, %v109_v30  ;;  %v123_v36 = vshll.u32 %v95_v29, 16 }
  0x35   :  { %6947 = vrot.lane.b32.xlu2 %v6946_v32, %s7377_s27  ;;  %v6941_v41 = vpack.i.bf16 %v115_v35, %v113_v34 }
  0x36   :  { %6937 = vrot.lane.b32.xlu0 %v6936_v33, %s7377_s27 }
  0x3b   :  { %v97_v38 = vld [vmem:[#allocation1] sm:$0xff]  ;;  %v98_v39 = vld [vmem:[#allocation1 + $0x9] sm:$0xff]  ;;  %v103_v44 = vld [vmem:[#allocation1 + $0x36] sm:$0xff] }
  0x3c   :  { %v100_v40 = vld [vmem:[#allocation1 + $0x1b] sm:$0xff]  ;;  %v101_v42 = vld [vmem:[#allocation1 + $0x24] sm:$0xff]  ;;  %v7513_v43 = vld [vmem:[#allocation1 + $0x2d] sm:$0xff]  ;;  %v125_v45 = vshll.u32 %v97_v38, 16  ;;  %v127_v20 = vshll.u32 %v98_v39, 16  ;;  %v137_v21 = vshll.u32 %v103_v44, 16 }
  0x3d   :  { %v7515_v46 = vld [vmem:[#allocation1 + $0x3f] sm:$0xff]  ;;  %v99_v47 = vld [vmem:[#allocation1 + $0x12] sm:$0xff]  ;;  %v131_v54 = vshll.u32 %v100_v40, 16  ;;  %v133_v55 = vshll.u32 %v101_v42, 16 }
  0x3e   :  { %v6951_v48 = vpack.i.bf16 %v125_v45, %v123_v36  ;;  %106 = vst [vmem:[#allocation1] ss:$9 sm:$0xff] %v7511_v37  ;;  %6942 = vrot.lane.b32.xlu0 %v6941_v41, %s7377_s27  ;;  %v129_v50 = vshll.u32 %v99_v47, 16  ;;  %v6966_v22 = vpack.i.bf16 %v137_v21, %v127_v20 }
  0x3f   :  { %v6961_v56 = vpack.i.bf16 %v133_v55, %v131_v54 }
  0x40   :  { %6952 = vrot.lane.b32.xlu2 %v6951_v48, %s7377_s27  ;;  %v6956_v51 = vpack.i.bf16 %v129_v50, %v119_v49 }
  0x45   :  { %v7520_v52 = vld [vmem:[#allocation1] sm:$0xff]  ;;  %v7522_v53 = vld [vmem:[#allocation1 + $0x9] sm:$0xff] }
  0x46   :  { %217 = vst [vmem:[#allocation1 + $0x1] ss:$9 sm:$0xff] %v7458_v0 }
  0x48   :  { %6957 = vrot.lane.b32.xlu2 %v6956_v51, %s7377_s27 }
  0x4d   :  { %v218_v57 = vld [vmem:[#allocation1] sm:$0xff]  ;;  %v220_v58 = vld [vmem:[#allocation1 + $0x9] sm:$0xff]  ;;  %v222_v59 = vld [vmem:[#allocation1 + $0x12] sm:$0xff] }
  0x4e   :  { %v224_v60 = vld [vmem:[#allocation1 + $0x1b] sm:$0xff]  ;;  %v226_v61 = vld [vmem:[#allocation1 + $0x24] sm:$0xff]  ;;  %v228_v62 = vld [vmem:[#allocation1 + $0x2d] sm:$0xff]  ;;  %256 = vrot.lane.b32.xlu1 %v218_v57, %s7378_s0 }
  0x4f   :  { %v230_v63 = vld [vmem:[#allocation1 + $0x36] sm:$0xff]  ;;  %v232_v10 = vld [vmem:[#allocation1 + $0x3f] sm:$0xff]  ;;  %262 = vrot.lane.b32.xlu0 %v224_v60, %s7378_s0 }
  0x50   :  { %234 = vst [vmem:[#allocation1 + $0x1] ss:$9 sm:$0xff] %v7464_v1  ;;  %6962 = vrot.lane.b32.xlu2 %v6961_v56, %s7377_s27 }
  0x56   :  { %258 = vrot.lane.b32.xlu1 %v220_v58, %s7378_s0 }
  0x57   :  { %v235_v23 = vld [vmem:[#allocation1] sm:$0xff]  ;;  %v7531_v24 = vld [vmem:[#allocation1 + $0x9] sm:$0xff]  ;;  %v239_v25 = vld [vmem:[#allocation1 + $0x12] sm:$0xff]  ;;  %268 = vrot.lane.b32.xlu0 %v230_v63, %s7378_s0 }
  0x58   :  { %v241_v26 = vld [vmem:[#allocation1 + $0x1b] sm:$0xff]  ;;  %v243_v27 = vld [vmem:[#allocation1 + $0x24] sm:$0xff]  ;;  %v7534_v28 = vld [vmem:[#allocation1 + $0x2d] sm:$0xff]  ;;  %6967 = vrot.lane.b32.xlu2 %v6966_v22, %s7377_s27 }
  0x59   :  { %v7537_v29 = vld [vmem:[#allocation1 + $0x36] sm:$0xff]  ;;  %v7539_v30 = vld [vmem:[#allocation1 + $0x3f] sm:$0xff] }
  0x5a   :  { %251 = vst [vmem:[#allocation1 + $0x1] ss:$9 sm:$0xff] %v7511_v37 }
  0x5e   :  { %264 = vrot.lane.b32.xlu1 %v226_v61, %s7378_s0 }
  0x5f   :  { %276 = vrot.lane.b32.xlu0 %v239_v25, %s7378_s0 }
  0x60   :  { %260 = vrot.lane.b32.xlu2 %v222_v59, %s7378_s0 }
  0x61   :  { %v7545_v31 = vld [vmem:[#allocation1] sm:$0xff]  ;;  %v7547_v32 = vld [vmem:[#allocation1 + $0x9] sm:$0xff] }
  0x62   :  { %310 = vst [vmem:[#allocation1] ss:$9 sm:$0xff] %v7458_v0 }
  0x66   :  { %270 = vrot.lane.b32.xlu1 %v232_v10, %s7378_s0 }
  0x68   :  { %272 = vrot.lane.b32.xlu2 %v235_v23, %s7378_s0 }
  0x69   :  { %v311_v33 = vld [vmem:[#allocation1] sm:$0xff]  ;;  %v312_v34 = vld [vmem:[#allocation1 + $0x9] sm:$0xff]  ;;  %v317_v38 = vld [vmem:[#allocation1 + $0x36] sm:$0xff] }
  0x6a   :  { %v315_v35 = vld [vmem:[#allocation1 + $0x24] sm:$0xff]  ;;  %v316_v36 = vld [vmem:[#allocation1 + $0x2d] sm:$0xff]  ;;  %v314_v40 = vld [vmem:[#allocation1 + $0x1b] sm:$0xff]  ;;  %v331_v45 = vshll.u32 %v311_v33, 16  ;;  %v334_v47 = vshll.u32 %v312_v34, 16  ;;  %v349_v21 = vshll.u32 %v317_v38, 16 }
  0x6b   :  { %v313_v39 = vld [vmem:[#allocation1 + $0x12] sm:$0xff]  ;;  %v318_v42 = vld [vmem:[#allocation1 + $0x3f] sm:$0xff]  ;;  %v340_v44 = vshll.u32 %v314_v40, 16  ;;  %v343_v59 = vshll.u32 %v315_v35, 16  ;;  %v346_v38 = vshll.u32 %v316_v36, 16 }
  0x6c   :  { %v337_v41 = vshll.u32 %v313_v39, 16  ;;  %319 = vst [vmem:[#allocation1] ss:$9 sm:$0xff] %v7464_v1  ;;  %v352_v51 = vshll.u32 %v318_v42, 16  ;;  %v333_v54 = vrot.slane %v331_v45, 7  ;;  %v336_v55 = vrot.slane %v334_v47, 7 }
  0x6d   :  { %v342_v49 = vrot.slane %v340_v44, 7  ;;  %v345_v35 = vrot.slane %v343_v59, 7  ;;  %v351_v39 = vrot.slane %v349_v21, 7 }
  0x6e   :  { %v339_v48 = vrot.slane %v337_v41, 7  ;;  %266 = vrot.lane.b32.xlu1 %v228_v62, %s7378_s0  ;;  %v354_v10 = vrot.slane %v352_v51, 7  ;;  %v6971_v20 = vpack.i.bf16 %v336_v55, %v333_v54 }
  0x6f   :  { %v6981_v42 = vpack.i.bf16 %v351_v39, %v345_v35 }
  0x70   :  { %v6976_v50 = vpack.i.bf16 %v342_v49, %v339_v48  ;;  %280 = vrot.lane.b32.xlu2 %v243_v27, %s7378_s0  ;;  %v348_v48 = vrot.slane %v346_v38, 7 }
  0x72   :  { %6977 = vrot.lane.b32.xlu0 %v6976_v50, %s7379_s30 }
  0x73   :  { %v320_v56 = vld [vmem:[#allocation1] sm:$0xff]  ;;  %v321_v57 = vld [vmem:[#allocation1 + $0x9] sm:$0xff]  ;;  %v322_v58 = vld [vmem:[#allocation1 + $0x12] sm:$0xff] }
  0x74   :  { %v7556_v60 = vld [vmem:[#allocation1 + $0x2d] sm:$0xff]  ;;  %v326_v61 = vld [vmem:[#allocation1 + $0x36] sm:$0xff]  ;;  %v7558_v63 = vld [vmem:[#allocation1 + $0x3f] sm:$0xff]  ;;  %v355_v62 = vshll.u32 %v320_v56, 16  ;;  %v361_v44 = vshll.u32 %v322_v58, 16  ;;  %v358_v51 = vshll.u32 %v321_v57, 16 }
  0x75   :  { %v323_v22 = vld [vmem:[#allocation1 + $0x1b] sm:$0xff]  ;;  %v324_v23 = vld [vmem:[#allocation1 + $0x24] sm:$0xff]  ;;  %v373_v36 = vshll.u32 %v326_v61, 16 }
  0x76   :  { %v357_v25 = vrot.slane %v355_v62, 7  ;;  %278 = vrot.lane.b32.xlu1 %v241_v26, %s7378_s0  ;;  %v364_v27 = vshll.u32 %v323_v22, 16  ;;  %v367_v33 = vshll.u32 %v324_v23, 16  ;;  %328 = vst [vmem:[#allocation1] ss:$9 sm:$0xff] %v7511_v37  ;;  %v363_v49 = vrot.slane %v361_v44, 7 }
  0x77   :  { %v375_v21 = vrot.slane %v373_v36, 7 }
  0x78   :  { %v6986_v34 = vpack.i.bf16 %v357_v25, %v354_v10  ;;  %6972 = vrot.lane.b32.xlu2 %v6971_v20, %s7379_s30  ;;  %v366_v40 = vrot.slane %v364_v27, 7  ;;  %v369_v41 = vrot.slane %v367_v33, 7  ;;  %v6991_v50 = vpack.i.bf16 %v363_v49, %v348_v48 }
  0x79   :  { %v360_v20 = vrot.slane %v358_v51, 7 }
  0x7a   :  { %6987 = vrot.lane.b32.xlu0 %v6986_v34, %s7379_s30  ;;  %v6996_v26 = vpack.i.bf16 %v369_v41, %v366_v40 }
  0x7b   :  { %v7001_v57 = vpack.i.bf16 %v375_v21, %v360_v20 }
  0x7d   :  { %v7564_v45 = vld [vmem:[#allocation1] sm:$0xff]  ;;  %v7566_v47 = vld [vmem:[#allocation1 + $0x9] sm:$0xff] }
  0x7e   :  { %457 = vst [vmem:[#allocation1 + $0x2] ss:$9 sm:$0xff] %v7458_v0  ;;  %274 = vrot.lane.b32.xlu1 %v7531_v24, %s7378_s0 }
  0x80   :  { %6982 = vrot.lane.b32.xlu2 %v6981_v42, %s7379_s30 }
  0x82   :  { %6997 = vrot.lane.b32.xlu0 %v6996_v26, %s7379_s30 }
  0x85   :  { %v458_v54 = vld [vmem:[#allocation1] sm:$0xff]  ;;  %v460_v55 = vld [vmem:[#allocation1 + $0x9] sm:$0xff]  ;;  %v462_v56 = vld [vmem:[#allocation1 + $0x12] sm:$0xff] }
  0x86   :  { %v464_v58 = vld [vmem:[#allocation1 + $0x1b] sm:$0xff]  ;;  %v466_v59 = vld [vmem:[#allocation1 + $0x24] sm:$0xff]  ;;  %v468_v10 = vld [vmem:[#allocation1 + $0x2d] sm:$0xff]  ;;  %496 = vrot.lane.b32.xlu1 %v458_v54, %s7380_s13 }
  0x87   :  { %v470_v62 = vld [vmem:[#allocation1 + $0x36] sm:$0xff]  ;;  %v472_v24 = vld [vmem:[#allocation1 + $0x3f] sm:$0xff] }
  0x88   :  { %474 = vst [vmem:[#allocation1 + $0x2] ss:$9 sm:$0xff] %v7464_v1  ;;  %6992 = vrot.lane.b32.xlu2 %v6991_v50, %s7379_s30 }
  0x8a   :  { %500 = vrot.lane.b32.xlu0 %v462_v56, %s7380_s13 }
  0x8e   :  { %504 = vrot.lane.b32.xlu1 %v466_v59, %s7380_s13 }
  0x8f   :  { %v475_v61 = vld [vmem:[#allocation1] sm:$0xff]  ;;  %v7578_v22 = vld [vmem:[#allocation1 + $0x9] sm:$0xff]  ;;  %v479_v23 = vld [vmem:[#allocation1 + $0x12] sm:$0xff]  ;;  %v7583_v34 = vpop.permute.xlu2 %6947 }
  0x90   :  { %v481_v25 = vld [vmem:[#allocation1 + $0x1b] sm:$0xff]  ;;  %v483_v27 = vld [vmem:[#allocation1 + $0x24] sm:$0xff]  ;;  %v7580_v33 = vld [vmem:[#allocation1 + $0x2d] sm:$0xff]  ;;  %7002 = vrot.lane.b32.xlu2 %v7001_v57, %s7379_s30 }
  0x91   :  { %11247 = vst [vmem:[#allocation22_spill] sm:$0xff] %v7580_v33  ;;  %v7585_v35 = vld [vmem:[#allocation1 + $0x36] sm:$0xff]  ;;  %v7587_v39 = vld [vmem:[#allocation1 + $0x3f] sm:$0xff] }
  0x92   :  { %491 = vst [vmem:[#allocation1 + $0x2] ss:$9 sm:$0xff] %v7511_v37  ;;  %502 = vrot.lane.b32.xlu0 %v464_v58, %s7380_s13 }
  0x96   :  { %508 = vrot.lane.b32.xlu1 %v470_v62, %s7380_s13 }
  0x98   :  { %498 = vrot.lane.b32.xlu2 %v460_v55, %s7380_s13 }
  0x99   :  { %v7593_v40 = vld [vmem:[#allocation1] sm:$0xff]  ;;  %v7595_v41 = vld [vmem:[#allocation1 + $0x9] sm:$0xff] }
  0x9a   :  { %11248 = vst [vmem:[#allocation23_spill] sm:$0xff] %v7595_v41  ;;  %506 = vrot.lane.b32.xlu0 %v468_v10, %s7380_s13  ;;  %v7599_v42 = vpop.permute.xlu2 %6952 }
  0x9b   :  { %550 = vst [vmem:[#allocation1] ss:$9 sm:$0xff] %v7458_v0 }
  0x9e   :  { %516 = vrot.lane.b32.xlu1 %v479_v23, %s7380_s13 }
  0xa0   :  { %510 = vrot.lane.b32.xlu2 %v472_v24, %s7380_s13 }
  0xa2   :  { %v551_v38 = vld [vmem:[#allocation1] sm:$0xff]  ;;  %v552_v44 = vld [vmem:[#allocation1 + $0x9] sm:$0xff]  ;;  %v553_v26 = vld [vmem:[#allocation1 + $0x12] sm:$0xff]  ;;  %512 = vrot.lane.b32.xlu0 %v475_v61, %s7380_s13  ;;  %v7604_v48 = vpop.permute.xlu2 %6957 }
  0xa3   :  { %v554_v49 = vld [vmem:[#allocation1 + $0x1b] sm:$0xff]  ;;  %v555_v50 = vld [vmem:[#allocation1 + $0x24] sm:$0xff]  ;;  %v556_v51 = vld [vmem:[#allocation1 + $0x2d] sm:$0xff]  ;;  %v571_v36 = vshll.u32 %v551_v38, 16  ;;  %v574_v54 = vshll.u32 %v552_v44, 16  ;;  %v577_v10 = vshll.u32 %v553_v26, 16 }
  0xa4   :  { %v557_v55 = vld [vmem:[#allocation1 + $0x36] sm:$0xff]  ;;  %v558_v56 = vld [vmem:[#allocation1 + $0x3f] sm:$0xff]  ;;  %v580_v62 = vshll.u32 %v554_v49, 16 }
  0xa5   :  { %v573_v58 = vrot.slane %v571_v36, 6  ;;  %v576_v59 = vrot.slane %v574_v54, 6  ;;  %559 = vst [vmem:[#allocation1] ss:$9 sm:$0xff] %v7464_v1  ;;  %v592_v20 = vshll.u32 %v558_v56, 16  ;;  %v579_v21 = vrot.slane %v577_v10, 6 }
  0xa6   :  { %v582_v57 = vrot.slane %v580_v62, 6 }
  0xa7   :  { %v7006_v24 = vpack.i.bf16 %v576_v59, %v573_v58  ;;  %v594_v36 = vrot.slane %v592_v20, 6  ;;  %v583_v59 = vshll.u32 %v555_v50, 16 }
  0xa8   :  { %518 = vrot.lane.b32.xlu2 %v481_v25, %s7380_s13  ;;  %v7011_v58 = vpack.i.bf16 %v582_v57, %v579_v21 }
  0xa9   :  { %7007 = vrot.lane.b32.xlu1 %v7006_v24, %s7381_s14  ;;  %v589_v24 = vshll.u32 %v557_v55, 16  ;;  %v585_v20 = vrot.slane %v583_v59, 6  ;;  %v7623_v55 = vpop.permute.xlu0 %6937 }
  0xaa   :  { %520 = vrot.lane.b32.xlu0 %v483_v27, %s7380_s13  ;;  %v7610_v61 = vpop.permute.xlu2 %6962  ;;  %v586_v27 = vshll.u32 %v556_v51, 16 }
  0xab   :  { %11249 = vst [vmem:[#allocation24_spill] sm:$0xff] %v7610_v61  ;;  %v591_v15 = vrot.slane %v589_v24, 6 }
  0xac   :  { %v560_v23 = vld [vmem:[#allocation1] sm:$0xff]  ;;  %v561_v38 = vld [vmem:[#allocation1 + $0x9] sm:$0xff]  ;;  %v562_v44 = vld [vmem:[#allocation1 + $0x12] sm:$0xff]  ;;  %v588_v21 = vrot.slane %v586_v27, 6 }
  0xad   :  { %v563_v54 = vld [vmem:[#allocation1 + $0x1b] sm:$0xff]  ;;  %v564_v26 = vld [vmem:[#allocation1 + $0x24] sm:$0xff]  ;;  %v7612_v49 = vld [vmem:[#allocation1 + $0x2d] sm:$0xff]  ;;  %v595_v56 = vshll.u32 %v560_v23, 16  ;;  %v601_v62 = vshll.u32 %v562_v44, 16  ;;  %v7016_v23 = vpack.i.bf16 %v591_v15, %v585_v20 }
  0xae   :  { %v566_v19 = vld [vmem:[#allocation1 + $0x36] sm:$0xff]  ;;  %v7614_v25 = vld [vmem:[#allocation1 + $0x3f] sm:$0xff] }
  0xaf   :  { %v597_v10 = vrot.slane %v595_v56, 6  ;;  %568 = vst [vmem:[#allocation1] ss:$9 sm:$0xff] %v7511_v37  ;;  %v603_v57 = vrot.slane %v601_v62, 6 }
  0xb0   :  { %7012 = vrot.lane.b32.xlu2 %v7011_v58, %s7381_s14  ;;  %v607_v58 = vshll.u32 %v564_v26, 16  ;;  %v598_v26 = vshll.u32 %v561_v38, 16 }
  0xb1   :  { %v7021_v16 = vpack.i.bf16 %v597_v10, %v594_v36  ;;  %v7026_v44 = vpack.i.bf16 %v603_v57, %v588_v21  ;;  %v604_v36 = vshll.u32 %v563_v54, 16  ;;  %v7634_v24 = vpop.permute.xlu0 %6942  ;;  %v613_v21 = vshll.u32 %v566_v19, 16 }
  0xb2   :  { %514 = vrot.lane.b32.xlu0 %v7578_v22, %s7380_s13  ;;  %v7621_v50 = vpop.permute.xlu2 %6967  ;;  %v609_v59 = vrot.slane %v607_v58, 6  ;;  %v600_v58 = vrot.slane %v598_v26, 6 }
  0xb3   :  { %7022 = vrot.lane.b32.xlu1 %v7021_v16, %s7381_s14  ;;  %11250 = vst [vmem:[#allocation25_spill] sm:$0xff] %v7621_v50  ;;  %v606_v22 = vrot.slane %v604_v36, 6  ;;  %v615_v17 = vrot.slane %v613_v21, 6 }
  0xb5   :  { %v7031_v54 = vpack.i.bf16 %v609_v59, %v606_v22  ;;  %v7036_v38 = vpack.i.bf16 %v615_v17, %v600_v58 }
  0xb6   :  { %v7625_v56 = vld [vmem:[#allocation1] sm:$0xff]  ;;  %v7627_v51 = vld [vmem:[#allocation1 + $0x9] sm:$0xff] }
  0xb7   :  { %697 = vst [vmem:[#allocation1 + $0x3] ss:$9 sm:$0xff] %v7458_v0 }
  0xb8   :  { %7017 = vrot.lane.b32.xlu2 %v7016_v23, %s7381_s14 }
  0xba   :  { %v7632_v16 = vpop.permute.xlu2 %260 }
  0xbb   :  { %7027 = vrot.lane.b32.xlu1 %v7026_v44, %s7381_s14  ;;  %11251 = vst [vmem:[#allocation26_spill] sm:$0xff] %v7632_v16 }
  0xbe   :  { %v698_v15 = vld [vmem:[#allocation1] sm:$0xff]  ;;  %v700_v10 = vld [vmem:[#allocation1 + $0x9] sm:$0xff]  ;;  %v702_v27 = vld [vmem:[#allocation1 + $0x12] sm:$0xff] }
  0xbf   :  { %v704_v62 = vld [vmem:[#allocation1 + $0x1b] sm:$0xff]  ;;  %v706_v20 = vld [vmem:[#allocation1 + $0x24] sm:$0xff]  ;;  %v708_v18 = vld [vmem:[#allocation1 + $0x2d] sm:$0xff]  ;;  %736 = vrot.lane.b32.xlu0 %v698_v15, %s7382_s15 }
  0xc0   :  { %v710_v57 = vld [vmem:[#allocation1 + $0x36] sm:$0xff]  ;;  %v712_v23 = vld [vmem:[#allocation1 + $0x3f] sm:$0xff]  ;;  %v7638_v44 = vpop.permute.xlu1 %256  ;;  %740 = vrot.lane.b32.xlu2 %v702_v27, %s7382_s15 }
  0xc1   :  { %714 = vst [vmem:[#allocation1 + $0x3] ss:$9 sm:$0xff] %v7464_v1  ;;  %v7645_v15 = vpop.permute.xlu0 %262 }
  0xc2   :  { %11252 = vst [vmem:[#allocation27_spill] sm:$0xff] %v7638_v44  ;;  %v7642_v36 = vpop.permute.xlu2 %272 }
  0xc3   :  { %7032 = vrot.lane.b32.xlu1 %v7031_v54, %s7381_s14  ;;  %11253 = vst [vmem:[#allocation28_spill] sm:$0xff] %v7642_v36 }
  0xc4   :  { %11254 = vst [vmem:[#allocation29_spill] sm:$0xff] %v7645_v15 }
  0xc7   :  { %742 = vrot.lane.b32.xlu0 %v704_v62, %s7382_s15 }
  0xc8   :  { %v715_v19 = vld [vmem:[#allocation1] sm:$0xff]  ;;  %v717_v22 = vld [vmem:[#allocation1 + $0x9] sm:$0xff]  ;;  %v719_v59 = vld [vmem:[#allocation1 + $0x12] sm:$0xff]  ;;  %v7651_v27 = vpop.permute.xlu1 %258  ;;  %748 = vrot.lane.b32.xlu2 %v710_v57, %s7382_s15 }
  0xc9   :  { %v721_v41 = vld [vmem:[#allocation1 + $0x1b] sm:$0xff]  ;;  %v7647_v14 = vld [vmem:[#allocation1 + $0x24] sm:$0xff]  ;;  %v7649_v12 = vld [vmem:[#allocation1 + $0x2d] sm:$0xff]  ;;  %11255 = vst [vmem:[#allocation30_spill] sm:$0xff] %v7651_v27  ;;  %v7663_v62 = vpop.permute.xlu0 %268 }
  0xca   :  { %v7654_v54 = vld [vmem:[#allocation1 + $0x36] sm:$0xff]  ;;  %v7656_v26 = vld [vmem:[#allocation1 + $0x3f] sm:$0xff]  ;;  %v7660_v17 = vpop.permute.xlu2 %280  ;;  %11257 = vst [vmem:[#allocation32_spill] sm:$0xff] %v7663_v62 }
  0xcb   :  { %731 = vst [vmem:[#allocation1 + $0x3] ss:$9 sm:$0xff] %v7511_v37  ;;  %7037 = vrot.lane.b32.xlu1 %v7036_v38, %s7381_s14 }
  0xcc   :  { %11256 = vst [vmem:[#allocation31_spill] sm:$0xff] %v7660_v17 }
  0xcf   :  { %750 = vrot.lane.b32.xlu0 %v712_v23, %s7382_s15 }
  0xd0   :  { %v7665_v21 = vpop.permute.xlu1 %264  ;;  %746 = vrot.lane.b32.xlu2 %v708_v18, %s7382_s15 }
  0xd1   :  { %11258 = vst [vmem:[#allocation33_spill] sm:$0xff] %v7665_v21  ;;  %v7680_v13 = vpop.permute.xlu0 %276 }
  0xd2   :  { %v7668_v58 = vld [vmem:[#allocation1] sm:$0xff]  ;;  %v7670_v57 = vld [vmem:[#allocation1 + $0x9] sm:$0xff]  ;;  %v7674_v36 = vpop.permute.xlu2 %6972  ;;  %11262 = vst [vmem:[#allocation37_spill] sm:$0xff] %v7680_v13 }
  0xd3   :  { %11259 = vst [vmem:[#allocation34_spill] sm:$0xff] %v7670_v57  ;;  %738 = vrot.lane.b32.xlu1 %v700_v10, %s7382_s15 }
  0xd4   :  { %790 = vst [vmem:[#allocation1] ss:$9 sm:$0xff] %v7458_v0 }
  0xd5   :  { %11260 = vst [vmem:[#allocation35_spill] sm:$0xff] %v7674_v36 }
  0xd7   :  { %758 = vrot.lane.b32.xlu0 %v721_v41, %s7382_s15 }
  0xd8   :  { %v7677_v38 = vpop.permute.xlu1 %270  ;;  %756 = vrot.lane.b32.xlu2 %v719_v59, %s7382_s15 }
  0xd9   :  { %11261 = vst [vmem:[#allocation36_spill] sm:$0xff] %v7677_v38 }
  0xda   :  { %v7683_v57 = vpop.permute.xlu2 %6982 }
  0xdb   :  { %v793_v23 = vld [vmem:[#allocation1 + $0x12] sm:$0xff]  ;;  %v794_v17 = vld [vmem:[#allocation1 + $0x1b] sm:$0xff]  ;;  %v795_v62 = vld [vmem:[#allocation1 + $0x24] sm:$0xff]  ;;  %744 = vrot.lane.b32.xlu1 %v706_v20, %s7382_s15  ;;  %11263 = vst [vmem:[#allocation38_spill] sm:$0xff] %v7683_v57 }
  0xdc   :  { %v796_v18 = vld [vmem:[#allocation1 + $0x2d] sm:$0xff]  ;;  %v797_v21 = vld [vmem:[#allocation1 + $0x36] sm:$0xff]  ;;  %v791_v11 = vld [vmem:[#allocation1] sm:$0xff]  ;;  %v823_v38 = vshll.u32 %v795_v62, 16  ;;  %v820_v15 = vshll.u32 %v794_v17, 16 }
  0xdd   :  { %v792_v10 = vld [vmem:[#allocation1 + $0x9] sm:$0xff]  ;;  %v811_v9 = vshll.u32 %v791_v11, 16  ;;  %v798_v7 = vld [vmem:[#allocation1 + $0x3f] sm:$0xff]  ;;  %v829_v59 = vshll.u32 %v797_v21, 16 }
  0xde   :  { %v814_v41 = vshll.u32 %v792_v10, 16  ;;  %799 = vst [vmem:[#allocation1] ss:$9 sm:$0xff] %v7464_v1  ;;  %v832_v33 = vshll.u32 %v798_v7, 16  ;;  %v825_v13 = vrot.slane %v823_v38, 5  ;;  %v822_v17 = vrot.slane %v820_v15, 5 }
  0xdf   :  { %v813_v36 = vrot.slane %v811_v9, 5  ;;  %v831_v20 = vrot.slane %v829_v59, 5  ;;  %v817_v59 = vshll.u32 %v793_v23, 16 }
  0xe0   :  { %v816_v44 = vrot.slane %v814_v41, 5  ;;  %v7686_v6 = vpop.permute.xlu1 %266  ;;  %754 = vrot.lane.b32.xlu2 %v717_v22, %s7382_s15 }
  0xe1   :  { %11264 = vst [vmem:[#allocation39_spill] sm:$0xff] %v7686_v6  ;;  %v7051_v22 = vpack.i.bf16 %v831_v20, %v825_v13  ;;  %v141_v13 = vshll.u32 %v7520_v52, 16 }
  0xe2   :  { %v7041_v27 = vpack.i.bf16 %v816_v44, %v813_v36  ;;  %v7695_v9 = vpop.permute.xlu2 %6992  ;;  %v834_v44 = vrot.slane %v832_v33, 5  ;;  %v139_v33 = vshll.u32 %v7515_v46, 16 }
  0xe3   :  { %752 = vrot.lane.b32.xlu1 %v715_v19, %s7382_s15  ;;  %v826_v19 = vshll.u32 %v796_v18, 16  ;;  %v819_v18 = vrot.slane %v817_v59, 5 }
  0xe4   :  { %7042 = vrot.lane.b32.xlu0 %v7041_v27, %s7383_s16  ;;  %v7697_v36 = vpop.permute.xlu0 %6977 }
  0xe5   :  { %v800_v11 = vld [vmem:[#allocation1] sm:$0xff]  ;;  %v7691_v10 = vld [vmem:[#allocation1 + $0x2d] sm:$0xff]  ;;  %v806_v27 = vld [vmem:[#allocation1 + $0x36] sm:$0xff]  ;;  %v828_v23 = vrot.slane %v826_v19, 5 }
  0xe6   :  { %v7693_v62 = vld [vmem:[#allocation1 + $0x3f] sm:$0xff]  ;;  %v835_v7 = vshll.u32 %v800_v11, 16  ;;  %v802_v21 = vld [vmem:[#allocation1 + $0x12] sm:$0xff]  ;;  %v801_v57 = vld [vmem:[#allocation1 + $0x9] sm:$0xff] }
  0xe7   :  { %v803_v38 = vld [vmem:[#allocation1 + $0x1b] sm:$0xff]  ;;  %v804_v41 = vld [vmem:[#allocation1 + $0x24] sm:$0xff]  ;;  %v841_v16 = vshll.u32 %v802_v21, 16 }
  0xe8   :  { %v837_v6 = vrot.slane %v835_v7, 5  ;;  %808 = vst [vmem:[#allocation1] ss:$9 sm:$0xff] %v7511_v37  ;;  %v7700_v5 = vpop.permute.xlu1 %278  ;;  %7052 = vrot.lane.b32.xlu2 %v7051_v22, %s7383_s16  ;;  %v844_v52 = vshll.u32 %v803_v38, 16  ;;  %v847_v22 = vshll.u32 %v804_v41, 16  ;;  %v838_v38 = vshll.u32 %v801_v57, 16 }
  0xe9   :  { %v843_v20 = vrot.slane %v841_v16, 5  ;;  %v853_v41 = vshll.u32 %v806_v27, 16 }
  0xea   :  { %v7061_v8 = vpack.i.bf16 %v837_v6, %v834_v44  ;;  %v7056_v6 = vpack.i.bf16 %v141_v13, %v139_v33  ;;  %v7710_v44 = vpop.permute.xlu2 %7002  ;;  %v849_v15 = vrot.slane %v847_v22, 5 }
  0xeb   :  { %760 = vrot.lane.b32.xlu1 %v7647_v14, %s7382_s15  ;;  %11265 = vst [vmem:[#allocation40_spill] sm:$0xff] %v7710_v44  ;;  %v7066_v46 = vpack.i.bf16 %v843_v20, %v828_v23  ;;  %v846_v14 = vrot.slane %v844_v52, 5  ;;  %v840_v52 = vrot.slane %v838_v38, 5  ;;  %v855_v57 = vrot.slane %v853_v41, 5 }
  0xec   :  { %7062 = vrot.lane.b32.xlu0 %v7061_v8, %s7383_s16  ;;  %v7708_v11 = vpop.permute.xlu0 %6987  ;;  %v7046_v8 = vpack.i.bf16 %v822_v17, %v819_v18 }
  0xed   :  { %v7071_v13 = vpack.i.bf16 %v849_v15, %v846_v14  ;;  %v7076_v22 = vpack.i.bf16 %v855_v57, %v840_v52 }
  0xef   :  { %v7712_v7 = vld [vmem:[#allocation1] sm:$0xff]  ;;  %v7714_v21 = vld [vmem:[#allocation1 + $0x9] sm:$0xff] }
  0xf0   :  { %937 = vst [vmem:[#allocation1 + $0x4] ss:$9 sm:$0xff] %v7458_v0  ;;  %v7717_v16 = vpop.permute.xlu1 %274  ;;  %7057 = vrot.lane.b32.xlu2 %v7056_v6, %s7377_s27 }
  0xf1   :  { %11266 = vst [vmem:[#allocation41_spill] sm:$0xff] %v7717_v16 }
  0xf2   :  { %v7724_v18 = vpop.permute.xlu2 %498 }
  0xf3   :  { %7047 = vrot.lane.b32.xlu1 %v7046_v8, %s7383_s16 }
  0xf4   :  { %7067 = vrot.lane.b32.xlu0 %v7066_v46, %s7383_s16  ;;  %v7722_v59 = vpop.permute.xlu0 %6997 }
  0xf5   :  { %11267 = vst [vmem:[#allocation42_spill] sm:$0xff] %v7722_v59 }
  0xf7   :  { %v952_v19 = vld [vmem:[#allocation1 + $0x3f] sm:$0xff]  ;;  %v942_v23 = vld [vmem:[#allocation1 + $0x12] sm:$0xff]  ;;  %v940_v20 = vld [vmem:[#allocation1 + $0x9] sm:$0xff] }
  0xf8   :  { %v938_v33 = vld [vmem:[#allocation1] sm:$0xff]  ;;  %v950_v0 = vld [vmem:[#allocation1 + $0x36] sm:$0xff]  ;;  %v948_v16 = vld [vmem:[#allocation1 + $0x2d] sm:$0xff]  ;;  %v7726_v46 = vpop.permute.xlu1 %496 }
  0xf9   :  { %v946_v17 = vld [vmem:[#allocation1 + $0x24] sm:$0xff]  ;;  %v944_v6 = vld [vmem:[#allocation1 + $0x1b] sm:$0xff]  ;;  %976 = vrot.lane.b32.xlu2 %v938_v33, %s7384_s17 }
  0xfa   :  { %954 = vst [vmem:[#allocation1 + $0x4] ss:$9 sm:$0xff] %v7464_v1  ;;  %v7737_v14 = vpop.permute.xlu2 %510 }
  0xfb   :  { %980 = vrot.lane.b32.xlu1 %v942_v23, %s7384_s17 }
  0xfc   :  { %7072 = vrot.lane.b32.xlu0 %v7071_v13, %s7383_s16  ;;  %v7732_v27 = vpop.permute.xlu0 %500 }
 0x100   :  { %v7734_v8 = vpop.permute.xlu1 %504 }
 0x101   :  { %988 = vrot.lane.b32.xlu2 %v950_v0, %s7384_s17  ;;  %v959_v15 = vld [vmem:[#allocation1 + $0x12] sm:$0xff]  ;;  %v955_v41 = vld [vmem:[#allocation1] sm:$0xff]  ;;  %v957_v57 = vld [vmem:[#allocation1 + $0x9] sm:$0xff] }
 0x102   :  { %v7748_v13 = vpop.permute.xlu2 %518 }
 0x103   :  { %984 = vrot.lane.b32.xlu1 %v946_v17, %s7384_s17  ;;  %11268 = vst [vmem:[#allocation43_spill] sm:$0xff] %v7748_v13 }
 0x104   :  { %7077 = vrot.lane.b32.xlu0 %v7076_v22, %s7383_s16  ;;  %v7741_v1 = vpop.permute.xlu0 %502  ;;  %v135_v22 = vshll.u32 %v7513_v43, 16 }
 0x108   :  { %v7743_v33 = vpop.permute.xlu1 %508 }
 0x109   :  { %996 = vrot.lane.b32.xlu2 %v959_v15, %s7384_s17  ;;  %v143_v15 = vshll.u32 %v7522_v53, 16 }
 0x10a   :  { %v7760_v17 = vpop.permute.xlu2 %7012 }
 0x10b   :  { %986 = vrot.lane.b32.xlu1 %v948_v16, %s7384_s17 }
 0x10c   :  { %978 = vrot.lane.b32.xlu0 %v940_v20, %s7384_s17  ;;  %v7750_v38 = vpop.permute.xlu0 %506  ;;  %v963_v20 = vld [vmem:[#allocation1 + $0x24] sm:$0xff] }
 0x110   :  { %v7752_v23 = vpop.permute.xlu1 %516 }
 0x111   :  { %11269 = vst [vmem:[#allocation44_spill] sm:$0xff] %v7752_v23  ;;  %288 = vrot.lane.b32.xlu2 %v7545_v31, %s7378_s0  ;;  %v7784_v23 = vld [vmem:[#allocation1 + $0x2d] sm:$0xff] }
 0x112   :  { %v7770_v31 = vpop.permute.xlu2 %7017 }
 0x113   :  { %992 = vrot.lane.b32.xlu1 %v955_v41, %s7384_s17 }
 0x114   :  { %982 = vrot.lane.b32.xlu0 %v944_v6, %s7384_s17  ;;  %v7758_v0 = vpop.permute.xlu0 %512  ;;  %v961_v6 = vld [vmem:[#allocation1 + $0x1b] sm:$0xff] }
 0x119   :  { %526 = vrot.lane.b32.xlu2 %v7587_v39, %s7380_s13 }
 0x11a   :  { %v7787_v43 = vpop.permute.xlu2 %740 }
 0x11b   :  { %1000 = vrot.lane.b32.xlu1 %v963_v20, %s7384_s17  ;;  %v7766_v16 = vpop.permute.xlu1 %7007  ;;  %v376_v20 = vshll.u32 %v7558_v63, 16 }
 0x11c   :  { %990 = vrot.lane.b32.xlu0 %v952_v19, %s7384_s17  ;;  %v7768_v52 = vpop.permute.xlu0 %520  ;;  %v7091_v19 = vpack.i.bf16 %v143_v15, %v135_v22  ;;  %v382_v22 = vshll.u32 %v7566_v47, 16 }
 0x11d   :  { %11270 = vst [vmem:[#allocation45_spill] sm:$0xff] %v7768_v52  ;;  %v379_v52 = vshll.u32 %v7564_v45, 16  ;;  %v378_v53 = vrot.slane %v376_v20, 7  ;;  %v370_v45 = vshll.u32 %v7556_v60, 16 }
 0x121   :  { %764 = vrot.lane.b32.xlu2 %v7654_v54, %s7382_s15  ;;  %v381_v54 = vrot.slane %v379_v52, 7  ;;  %v384_v52 = vrot.slane %v382_v22, 7 }
 0x123   :  { %994 = vrot.lane.b32.xlu1 %v957_v57, %s7384_s17  ;;  %v969_v57 = vld [vmem:[#allocation1 + $0x3f] sm:$0xff]  ;;  %v7081_v15 = vpack.i.bf16 %v381_v54, %v378_v53 }
 0x124   :  { %998 = vrot.lane.b32.xlu0 %v961_v6, %s7384_s17  ;;  %v7780_v41 = vpop.permute.xlu0 %514  ;;  %v967_v6 = vld [vmem:[#allocation1 + $0x36] sm:$0xff] }
 0x125   :  { %v7778_v39 = vpop.permute.xlu1 %7022  ;;  %11271 = vst [vmem:[#allocation46_spill] sm:$0xff] %v7780_v41  ;;  %v7806_v41 = vpop.permute.xlu2 %748 }
 0x126   :  { %971 = vst [vmem:[#allocation1 + $0x4] ss:$9 sm:$0xff] %v7511_v37 }
 0x129   :  { %7092 = vrot.lane.b32.xlu2 %v7091_v19, %s7377_s27  ;;  %v616_v19 = vshll.u32 %v7614_v25, 16 }
 0x12b   :  { %286 = vrot.lane.b32.xlu1 %v7539_v30, %s7378_s0  ;;  %v372_v30 = vrot.slane %v370_v45, 7  ;;  %v618_v37 = vrot.slane %v616_v19, 6  ;;  %v859_v45 = vshll.u32 %v7712_v7, 16 }
 0x12c   :  { %284 = vrot.lane.b32.xlu0 %v7537_v29, %s7378_s0  ;;  %v619_v29 = vshll.u32 %v7625_v56, 16 }
 0x12d   :  { %v7794_v63 = vpop.permute.xlu1 %7027  ;;  %v7101_v25 = vpack.i.bf16 %v384_v52, %v372_v30  ;;  %v972_v7 = vld [vmem:[#allocation1] sm:$0xff]  ;;  %v6950_v52 = vunpack.i.h.bf16 %v7583_v34 }
 0x12e   :  { %v621_v60 = vrot.slane %v619_v29, 6 }
 0x130   :  { %v7086_v53 = vpack.i.bf16 %v621_v60, %v618_v37  ;;  %v6949_v37 = vunpack.i.l.bf16 %v7583_v34  ;;  %v6954_v60 = vunpack.i.l.bf16 %v7599_v42 }
 0x131   :  { %v7800_v20 = vpop.permute.xlu0 %736  ;;  %1004 = vrot.lane.b32.xlu2 %v967_v6, %s7384_s17  ;;  %v856_v6 = vshll.u32 %v7693_v62, 16 }
 0x133   :  { %524 = vrot.lane.b32.xlu1 %v7585_v35, %s7380_s13  ;;  %v7818_v35 = vpop.permute.xlu2 %746 }
 0x134   :  { %7082 = vrot.lane.b32.xlu0 %v7081_v15, %s7379_s30  ;;  %v858_v15 = vrot.slane %v856_v6, 5 }
 0x135   :  { %v7808_v47 = vpop.permute.xlu1 %7032 }
 0x136   :  { %11272 = vst [vmem:[#allocation47_spill] sm:$0xff] %v7808_v47 }
 0x139   :  { %v7810_v56 = vpop.permute.xlu0 %742  ;;  %7102 = vrot.lane.b32.xlu2 %v7101_v25, %s7379_s30  ;;  %v6940_v25 = vunpack.i.h.bf16 %v7623_v55 }
 0x13a   :  { %11273 = vst [vmem:[#allocation48_spill] sm:$0xff] %v7810_v56 }
 0x13b   :  { %7087 = vrot.lane.b32.xlu1 %v7086_v53, %s7381_s14  ;;  %v7832_v30 = vpop.permute.xlu2 %756  ;;  %v6945_v53 = vunpack.i.h.bf16 %v7634_v24 }
 0x13c   :  { %528 = vrot.lane.b32.xlu0 %v7593_v40, %s7380_s13  ;;  %v861_v40 = vrot.slane %v859_v45, 5  ;;  %11276 = vst [vmem:[#allocation51_spill] sm:$0xff] %v7832_v30  ;;  %v6959_v45 = vunpack.i.l.bf16 %v7604_v48 }
 0x13d   :  { %v7816_v54 = vpop.permute.xlu1 %7037 }
 0x13e   :  { %11274 = vst [vmem:[#allocation49_spill] sm:$0xff] %v7816_v54  ;;  %v7096_v29 = vpack.i.bf16 %v861_v40, %v858_v15  ;;  %v974_v15 = vld [vmem:[#allocation1 + $0x9] sm:$0xff]  ;;  %v7861_v40 = vsel %vm181_vm0, %v6950_v52, %v6954_v60 }
 0x141   :  { %v7822_v22 = vpop.permute.xlu0 %750  ;;  %762 = vrot.lane.b32.xlu2 %v7649_v12, %s7382_s15 }
 0x142   :  { %11275 = vst [vmem:[#allocation50_spill] sm:$0xff] %v7822_v22  ;;  %v11302_v22 = vld [vmem:[#allocation32_spill] sm:$0xff] }
 0x143   :  { %768 = vrot.lane.b32.xlu1 %v7668_v58, %s7382_s15  ;;  %v622_v58 = vshll.u32 %v7627_v51, 16  ;;  %v7853_v6 = vpop.permute.xlu2 %754 }
 0x144   :  { %766 = vrot.lane.b32.xlu0 %v7656_v26, %s7382_s15  ;;  %v610_v26 = vshll.u32 %v7612_v49, 16  ;;  %v6944_v49 = vunpack.i.l.bf16 %v7634_v24  ;;  %11278 = vst [vmem:[#allocation53_spill] sm:$0xff] %v7853_v6  ;;  %v11280_v24 = vmov 0  ;;  %v850_v6 = vshll.u32 %v7691_v10, 16 }
 0x145   :  { %v7830_v19 = vpop.permute.xlu1 %738  ;;  %v624_v51 = vrot.slane %v622_v58, 6  ;;  %v185_v58 = vsel %vm181_vm0, %v6945_v53, %v6949_v37  ;;  %v11281_v24 = vsel %vm7876_vm3, 4294967295, %v11280_v24 }
 0x146   :  { %v612_v34 = vrot.slane %v610_v26, 6  ;;  %11282 = vst [vmem:[#allocation55_spill] sm:$0xff] %v11281_v24 }
 0x148   :  { %v7106_v30 = vpack.i.bf16 %v624_v51, %v612_v34  ;;  %v11285_v34 = vld [vmem:[#allocation11_spill] sm:$0xff] }
 0x149   :  { %290 = vrot.lane.b32.xlu2 %v7547_v32, %s7378_s0  ;;  %v7837_v62 = vpop.permute.xlu0 %758  ;;  %v6955_v32 = vunpack.i.h.bf16 %v7599_v42  ;;  %v6960_v42 = vunpack.i.h.bf16 %v7604_v48  ;;  %v1039_v51 = vsel %vm7876_vm3, %v11285_v34, %v7861_v40  ;;  %v11292_v40 = vld [vmem:[#allocation35_spill] sm:$0xff]  ;;  %v11293_v34 = vld [vmem:[#allocation10_spill] sm:$0xff] }
 0x14a   :  { %11277 = vst [vmem:[#allocation52_spill] sm:$0xff] %v7837_v62 }
 0x14b   :  { %282 = vrot.lane.b32.xlu1 %v7534_v28, %s7378_s0  ;;  %v6939_v28 = vunpack.i.l.bf16 %v7623_v55  ;;  %v6964_v55 = vunpack.i.l.bf16 %v7610_v61  ;;  %v189_v26 = vsel %vm181_vm0, %v6954_v60, %v6955_v32  ;;  %v186_v60 = vsel %vm181_vm0, %v6949_v37, %v6959_v45 }
 0x14c   :  { %7097 = vrot.lane.b32.xlu0 %v7096_v29, %s7383_s16  ;;  %v6969_v29 = vunpack.i.l.bf16 %v7621_v50  ;;  %v184_v50 = vsel %vm181_vm0, %v6944_v49, %v6945_v53 }
 0x14d   :  { %v7841_v12 = vpop.permute.xlu1 %744  ;;  %v182_v48 = vsel %vm181_vm0, %v6939_v28, %v6940_v25  ;;  %v187_v28 = vsel %vm181_vm0, %v6959_v45, %v6950_v52  ;;  %v7886_v54 = vsel %vm181_vm0, %v6960_v42, %v6964_v55  ;;  %v1035_v52 = vsel %vm7876_vm3, %v7470_v4, %v184_v50  ;;  %v11287_v45 = vld [vmem:[#allocation26_spill] sm:$0xff] }
 0x14e   :  { %v7894_v53 = vsel %vm181_vm0, %v6955_v32, %v6969_v29  ;;  %v7897_v10 = vsel %vm181_vm0, %v6969_v29, %v6960_v42  ;;  %v11286_v42 = vld [vmem:[#allocation29_spill] sm:$0xff]  ;;  %v11289_v50 = vld [vmem:[#allocation22_spill] sm:$0xff] }
 0x151   :  { %1010 = vrot.lane.b32.xlu2 %v974_v15, %s7384_s17  ;;  %v862_v15 = vshll.u32 %v7714_v21, 16  ;;  %v1033_v21 = vsel %vm7876_vm3, %v7466_v2, %v182_v48  ;;  %v295_v2 = vsel %vm11195_vm4, %v11287_v45, %v11286_v42  ;;  %v11290_v48 = vld [vmem:[#allocation30_spill] sm:$0xff] }
 0x153   :  { %1008 = vrot.lane.b32.xlu1 %v972_v7, %s7384_s17  ;;  %v183_v7 = vsel %vm181_vm0, %v6940_v25, %v6944_v49  ;;  %v11283_v25 = vunpack.i.h.bf16 %v7610_v61  ;;  %v11284_v49 = vld [vmem:[#allocation8_spill] sm:$0xff]  ;;  %v864_v29 = vrot.slane %v862_v15, 5  ;;  %v1038_v61 = vsel %vm7876_vm3, %v11293_v34, %v187_v28 }
 0x154   :  { %1006 = vrot.lane.b32.xlu0 %v969_v57, %s7384_s17  ;;  %v1034_v37 = vsel %vm7876_vm3, %v7468_v3, %v183_v7  ;;  %v1036_v32 = vsel %vm7876_vm3, %v11284_v49, %v185_v58  ;;  %v852_v3 = vrot.slane %v850_v6, 5  ;;  %v11291_v58 = vld [vmem:[#allocation27_spill] sm:$0xff]  ;;  %v6974_v49 = vunpack.i.l.bf16 %v11292_v40 }
 0x155   :  { %v7867_v57 = vpop.permute.xlu1 %752  ;;  %v7891_v47 = vsel %vm181_vm0, %v6964_v55, %v11283_v25  ;;  %v11288_v55 = vld [vmem:[#allocation9_spill] sm:$0xff]  ;;  %v293_v7 = vsel %vm11195_vm4, %v11291_v58, %v11290_v48  ;;  %v6975_v25 = vunpack.i.h.bf16 %v11292_v40  ;;  %v294_v28 = vsel %vm11195_vm4, %v11290_v48, %v11287_v45  ;;  %v11297_v58 = vld [vmem:[#allocation15_spill] sm:$0xff] }
 0x156   :  { %v7865_v62 = vpop.permute.xlu0 %7042  ;;  %11279 = vst [vmem:[#allocation54_spill] sm:$0xff] %v7867_v57  ;;  %v1037_v4 = vsel %vm7876_vm3, %v11288_v55, %v186_v60  ;;  %v7932_v60 = vpop.permute.xlu2 %7052  ;;  %v11294_v55 = vld [vmem:[#allocation12_spill] sm:$0xff]  ;;  %v1043_v40 = vsel %vm7876_vm3, %v11297_v58, %v7886_v54  ;;  %v7111_v48 = vpack.i.bf16 %v864_v29, %v852_v3  ;;  %v11306_v3 = vld [vmem:[#allocation39_spill] sm:$0xff] }
 0x157   :  { %v1040_v6 = vsel %vm7876_vm3, %v11294_v55, %v189_v26  ;;  %v11298_v26 = vld [vmem:[#allocation13_spill] sm:$0xff]  ;;  %v7956_v55 = vsel %vm11186_vm1, %v1033_v21, %v293_v7  ;;  %v7966_v54 = vsel %vm421_vm5, %v6974_v49, %v6975_v25  ;;  %v11301_v58 = vld [vmem:[#allocation36_spill] sm:$0xff]  ;;  %v6979_v7 = vunpack.i.l.bf16 %v7697_v36 }
 0x158   :  { %v1041_v34 = vsel %vm7876_vm3, %v11298_v26, %v7894_v53  ;;  %v299_v53 = vsel %vm11195_vm4, %v11302_v22, %v11301_v58  ;;  %v11303_v26 = vld [vmem:[#allocation28_spill] sm:$0xff]  ;;  %v298_v49 = vsel %vm11195_vm4, %v11306_v3, %v11302_v22  ;;  %v11320_v24 = vunpack.i.h.bf16 %v7932_v60 }
 0x159   :  { %v300_v21 = vsel %vm11195_vm4, %v11301_v58, %v11303_v26 }
 0x15a   :  { %v8004_v56 = vsel %vm11186_vm1, %v1040_v6, %v300_v21  ;;  %v6995_v6 = vunpack.i.h.bf16 %v7695_v9 }
 0x15b   :  { %7107 = vrot.lane.b32.xlu1 %v7106_v30, %s7381_s14 }
 0x15c   :  { %522 = vrot.lane.b32.xlu0 %v11289_v50, %s7380_s13  ;;  %v7942_v50 = vsel %vm11186_vm1, %v1035_v52, %v295_v2  ;;  %v11300_v2 = vld [vmem:[#allocation14_spill] sm:$0xff] }
 0x15d   :  { %v7939_v15 = vpop.permute.xlu1 %760  ;;  %v1042_v45 = vsel %vm7876_vm3, %v11300_v2, %v7897_v10  ;;  %v7982_v10 = vsel %vm11186_vm1, %v1034_v37, %v294_v28  ;;  %v11307_v2 = vld [vmem:[#allocation16_spill] sm:$0xff]  ;;  %v6980_v37 = vunpack.i.h.bf16 %v7697_v36  ;;  %v6994_v28 = vunpack.i.l.bf16 %v7695_v9 }
 0x15e   :  { %v7937_v30 = vpop.permute.xlu0 %7062  ;;  %11296 = vst [vmem:[#allocation11_spill] sm:$0xff] %v7939_v15  ;;  %v11299_v15 = vld [vmem:[#allocation33_spill] sm:$0xff]  ;;  %v1044_v58 = vsel %vm7876_vm3, %v11307_v2, %v7891_v47  ;;  %v1122_v47 = vsel %vm7977_vm8, %v7956_v55, %v7966_v54  ;;  %v423_v36 = vsel %vm421_vm5, %v6975_v25, %v6979_v7  ;;  %v11310_v54 = vld [vmem:[#allocation31_spill] sm:$0xff]  ;;  %v8040_v21 = vpop.permute.xlu2 %7057 }
 0x15f   :  { %11295 = vst [vmem:[#allocation8_spill] sm:$0xff] %v7937_v30  ;;  %v296_v52 = vsel %vm11195_vm4, %v11286_v42, %v11299_v15  ;;  %v297_v29 = vsel %vm11195_vm4, %v11299_v15, %v11306_v3  ;;  %v11308_v30 = vld [vmem:[#allocation38_spill] sm:$0xff]  ;;  %v8001_v15 = vsel %vm11186_vm1, %v1039_v51, %v299_v53  ;;  %v8019_v51 = vsel %vm11186_vm1, %v1038_v61, %v298_v49  ;;  %v11309_v55 = vld [vmem:[#allocation37_spill] sm:$0xff] }
 0x160   :  { %v7995_v57 = vsel %vm11186_vm1, %v1036_v32, %v296_v52  ;;  %v6984_v13 = vunpack.i.l.bf16 %v11308_v30  ;;  %v6985_v22 = vunpack.i.h.bf16 %v11308_v30  ;;  %v8016_v32 = vsel %vm11186_vm1, %v1037_v4, %v297_v29  ;;  %11311 = vst [vmem:[#allocation29_spill] sm:$0xff] %v8040_v21 }
 0x161   :  { %v6990_v30 = vunpack.i.h.bf16 %v7708_v11  ;;  %v6989_v52 = vunpack.i.l.bf16 %v7708_v11  ;;  %v424_v61 = vsel %vm421_vm5, %v6979_v7, %v6980_v37  ;;  %v6999_v11 = vunpack.i.l.bf16 %v7722_v59 }
 0x162   :  { %v8036_v9 = vsel %vm421_vm5, %v6980_v37, %v6984_v13  ;;  %v426_v53 = vsel %vm421_vm5, %v6984_v13, %v6994_v28  ;;  %v427_v3 = vsel %vm421_vm5, %v6994_v28, %v6985_v22  ;;  %v7004_v29 = vunpack.i.l.bf16 %v7710_v44 }
 0x163   :  { %1002 = vrot.lane.b32.xlu1 %v7784_v23, %s7384_s17  ;;  %v304_v23 = vsel %vm11195_vm4, %v7700_v5, %v11310_v54  ;;  %v11182_v37 = vunpack.i.h.bf16 %v7722_v59  ;;  %v1123_v28 = vsel %vm7977_vm8, %v7982_v10, %v423_v36  ;;  %v8061_v54 = vsel %vm421_vm5, %v6985_v22, %v6989_v52 }
 0x164   :  { %7112 = vrot.lane.b32.xlu0 %v7111_v48, %s7383_s16  ;;  %v303_v48 = vsel %vm11195_vm4, %v11309_v55, %v7700_v5  ;;  %v11312_v5 = vld [vmem:[#allocation41_spill] sm:$0xff]  ;;  %v8054_v13 = vsel %vm11186_vm1, %v1044_v58, %v304_v23  ;;  %v8077_v10 = vsel %vm421_vm5, %v6995_v6, %v6999_v11  ;;  %v773_v58 = vsel %vm772_vm13, %v7800_v20, %v7830_v19 }
 0x165   :  { %v8032_v4 = vpop.permute.xlu1 %7047  ;;  %v301_v49 = vsel %vm11195_vm4, %v11303_v26, %v11312_v5  ;;  %v302_v7 = vsel %vm11195_vm4, %v11312_v5, %v11309_v55  ;;  %v8051_v2 = vsel %vm11186_vm1, %v1043_v40, %v303_v48  ;;  %v8064_v26 = vsel %vm421_vm5, %v6989_v52, %v6990_v30 }
 0x166   :  { %v8030_v25 = vpop.permute.xlu0 %7067  ;;  %v1124_v40 = vsel %vm7977_vm8, %v7942_v50, %v424_v61  ;;  %v8074_v55 = vsel %vm421_vm5, %v7004_v29, %v6995_v6  ;;  %v8080_v22 = vsel %vm11186_vm1, %v1041_v34, %v301_v49  ;;  %v8083_v36 = vsel %vm11186_vm1, %v1042_v45, %v302_v7  ;;  %v11313_v6 = vld [vmem:[#allocation23_spill] sm:$0xff]  ;;  %v11314_v34 = vld [vmem:[#allocation34_spill] sm:$0xff] }
 0x167   :  { %v8086_v52 = vsel %vm421_vm5, %v6990_v30, %v7004_v29  ;;  %v1126_v50 = vsel %vm7977_vm8, %v8016_v32, %v426_v53  ;;  %v1127_v48 = vsel %vm7977_vm8, %v8019_v51, %v427_v3  ;;  %v8101_v45 = vsel %vm421_vm5, %v6999_v11, %v11182_v37 }
 0x168   :  { %v533_v30 = vsel %vm532_vm9, %v7726_v46, %v7724_v18  ;;  %v534_v3 = vsel %vm532_vm9, %v7724_v18, %v7732_v27  ;;  %v535_v29 = vsel %vm532_vm9, %v7732_v27, %v7741_v1  ;;  %v11184_v5 = vunpack.i.h.bf16 %v7760_v17 }
 0x169   :  { %v7014_v49 = vunpack.i.l.bf16 %v7760_v17  ;;  %v1142_v7 = vsel %vm1119_vm6, %v1122_v47, %v533_v30  ;;  %v538_v18 = vsel %vm532_vm9, %v7750_v38, %v7743_v33  ;;  %v7010_v27 = vunpack.i.h.bf16 %v7766_v16  ;;  %v8152_v30 = vpop.permute.xlu2 %976 }
 0x16a   :  { %v7009_v37 = vunpack.i.l.bf16 %v7766_v16  ;;  %v7029_v47 = vunpack.i.l.bf16 %v7794_v63  ;;  %v1146_v46 = vsel %vm1119_vm6, %v1123_v28, %v534_v3  ;;  %v8156_v61 = vsel %vm1119_vm6, %v1124_v40, %v535_v29 }
 0x16b   :  { %770 = vrot.lane.b32.xlu1 %v11314_v34, %s7382_s15  ;;  %v8161_v34 = vsel %vm532_vm9, %v7741_v1, %v7734_v8  ;;  %v8167_v16 = vsel %vm532_vm9, %v7743_v33, %v7737_v14  ;;  %v8172_v28 = vsel %vm661_vm10, %v7014_v49, %v11184_v5  ;;  %v11183_v40 = vunpack.i.h.bf16 %v7770_v31 }
 0x16c   :  { %530 = vrot.lane.b32.xlu0 %v11313_v6, %s7380_s13  ;;  %v537_v6 = vsel %vm532_vm9, %v7734_v8, %v7750_v38  ;;  %v1162_v3 = vsel %vm1119_vm6, %v1127_v48, %v538_v18  ;;  %v8179_v8 = vsel %vm532_vm9, %v7737_v14, %v7758_v0  ;;  %v11185_v1 = vunpack.i.l.bf16 %v7770_v31  ;;  %s5609_s13 = sshll.u32 %s11152_s12, 4  ;;  %s5610_s13 = int_to_ptr.hbm [resolvable:$true] %s5609_s13 }
 0x16d   :  { %v8128_v11 = vpop.permute.xlu1 %980  ;;  %v1158_v38 = vsel %vm1119_vm6, %v1126_v50, %v537_v6  ;;  %v663_v33 = vsel %vm661_vm10, %v7010_v27, %v7014_v49  ;;  %v662_v50 = vsel %vm661_vm10, %v7009_v37, %v7010_v27  ;;  %v667_v29 = vsel %vm661_vm10, %v7029_v47, %v11183_v40 }
 0x16e   :  { %v8126_v53 = vpop.permute.xlu0 %7072  ;;  %v7045_v6 = vunpack.i.h.bf16 %v7865_v62  ;;  %v7044_v48 = vunpack.i.l.bf16 %v7865_v62  ;;  %v7069_v27 = vunpack.i.l.bf16 %v8030_v25  ;;  %v7049_v23 = vunpack.i.l.bf16 %v8032_v4 }
 0x16f   :  { %v666_v62 = vsel %vm661_vm10, %v11185_v1, %v7029_v47  ;;  %v778_v40 = vsel %vm772_vm13, %v7818_v35, %v7806_v41  ;;  %v1211_v51 = vsel %vm8195_vm7, %v1142_v7, %v662_v50  ;;  %v1216_v32 = vsel %vm8195_vm7, %v1162_v3, %v667_v29  ;;  %v1370_v1 = vld [vmem:[%s11142_s2] sm:$0x3f] }
 0x170   :  { %v774_v5 = vsel %vm772_vm13, %v7830_v19, %v7787_v43  ;;  %v777_v7 = vsel %vm772_vm13, %v7841_v12, %v7818_v35  ;;  %v902_v3 = vsel %vm11197_vm14, %v7044_v48, %v7045_v6  ;;  %vm11193_vm1 = vcmask 1044480  }
 0x171   :  { %v7385_v19 = vmov 65535   ;;  %v7386_v29 = vmov 0   ;;  %v8233_v47 = vpop.permute.xlu2 %988  ;;  %v903_v37 = vsel %vm11197_vm14, %v7045_v6, %v7049_v23  ;;  %v1212_v35 = vsel %vm8195_vm7, %v1146_v46, %v663_v33 }
 0x172   :  { %v1381_v50 = vsel %vm11196_vm15, 4294967295, %v7385_v19  ;;  %7116 = vset.pattern.permute.xlu0 %v7386_v29  ;;  %7197 = vset.pattern.permute.xlu1 %v7386_v29  ;;  %v11319_v48 = vunpack.i.l.bf16 %v7932_v60  ;;  %v907_v44 = vsel %vm11197_vm14, %v7069_v27, %v11320_v24  ;;  %v1231_v19 = vsel %vm1208_vm11, %v1211_v51, %v773_v58 }
 0x173   :  { %v1215_v29 = vsel %vm8195_vm7, %v1158_v38, %v666_v62  ;;  %v1251_v6 = vsel %vm1208_vm11, %v1216_v32, %v778_v40  ;;  %v1300_v46 = vsel %vm8228_vm12, %v1231_v19, %v902_v3  ;;  %v8251_v33 = vsel %vm11193_vm1, %v1381_v50, 0 }
 0x174   :  { %v906_v59 = vsel %vm11197_vm14, %v11319_v48, %v7069_v27  ;;  %1373 = vperm.xlu0 %7116, %v1370_v1   ;;  %v1235_v48 = vsel %vm1208_vm11, %v1212_v35, %v774_v5  ;;  %v1247_v21 = vsel %vm1208_vm11, %v1215_v29, %v777_v7  ;;  %v7050_v24 = vunpack.i.h.bf16 %v8032_v4 }
 0x175   :  { %v8191_v14 = vpop.permute.xlu1 %984  ;;  %v1301_v58 = vsel %vm8228_vm12, %v1235_v48, %v903_v37  ;;  %v1304_v32 = vsel %vm8228_vm12, %v1247_v21, %v906_v59  ;;  %v1305_v38 = vsel %vm8228_vm12, %v1251_v6, %v907_v44  ;;  %v11321_v50 = vunpack.i.l.bf16 %v7770_v31 }
 0x176   :  { %v8189_v18 = vpop.permute.xlu0 %7077  ;;  %v11322_v35 = vunpack.i.h.bf16 %v7760_v17  ;;  %v7025_v29 = vunpack.i.h.bf16 %v7778_v39  ;;  %v7024_v6 = vunpack.i.l.bf16 %v7778_v39  ;;  %vm11194_vm1 = vcmask 72704  }
 0x177   :  { %v11343_v39 = vsel %vm7977_vm8, %v8054_v13, %v8101_v45 }
 0x178   :  { %v665_v19 = vsel %vm661_vm10, %v11322_v35, %v11321_v50  ;;  %v11334_v35 = vld [vmem:[#allocation47_spill] sm:$0xff] }
 0x17d   :  { %v987_v51 = vpop.permute.xlu1 %986 }
 0x17e   :  { %v979_v1 = vpop.permute.xlu0 %978  ;;  %v1017_v4 = vsel %vm1012_vm2, %v8191_v14, %v987_v51  ;;  %v1018_v27 = vsel %vm1012_vm2, %v987_v51, %v8233_v47  ;;  %v8301_v51 = vld [vmem:[%s11141_s1] sm:$0x7]  ;;  %s7387_s1 = smov 60  }
 0x17f   :  { %v1013_v40 = vsel %vm1012_vm2, %v8152_v30, %v979_v1  ;;  %v1014_v5 = vsel %vm1012_vm2, %v979_v1, %v8128_v11  ;;  %v1332_v59 = vsel %vm11196_vm15, %v1304_v32, %v1017_v4  ;;  %v1335_v44 = vsel %vm11196_vm15, %v1305_v38, %v1018_v27 }
 0x180   :  { %v1320_v37 = vsel %vm11196_vm15, %v1300_v46, %v1013_v40  ;;  %v1323_v62 = vsel %vm11196_vm15, %v1301_v58, %v1014_v5  ;;  %v1391_v7 = vand.u32 %v8251_v33, %v1332_v59  ;;  %v1393_v3 = vand.u32 %v8251_v33, %v1335_v44  ;;  %v11323_v46 = vld [vmem:[#allocation48_spill] sm:$0xff] }
 0x181   :  { %v1383_v21 = vand.u32 %v8251_v33, %v1320_v37  ;;  %v1385_v30 = vand.u32 %v8251_v33, %v1323_v62  ;;  %v775_v48 = vsel %vm772_vm13, %v7787_v43, %v11323_v46  ;;  %v11324_v1 = vsel %vm7977_vm8, %v7995_v57, %v8036_v9 }
 0x182   :  { %v1154_v58 = vsel %vm1119_vm6, %v11324_v1, %v8161_v34  ;;  %v776_v17 = vsel %vm772_vm13, %v11323_v46, %v7841_v12  ;;  %v904_v43 = vsel %vm11197_vm14, %v7049_v23, %v7050_v24  ;;  %v11325_v57 = vsel %vm7977_vm8, %v8001_v15, %v8061_v54  ;;  %1476 = vmatpush.bf16.msra.mxu0 %v1391_v7  ;;  %v11328_v54 = vld [vmem:[#allocation43_spill] sm:$0xff]  ;;  %v11332_v7 = vld [vmem:[#allocation54_spill] sm:$0xff] }
 0x183   :  { %1424 = vmatpush.bf16.msra.mxu2 %v1383_v21  ;;  %1437 = vmatpush.bf16.msra.mxu3 %v1385_v30  ;;  %v1166_v9 = vsel %vm1119_vm6, %v11325_v57, %v8167_v16  ;;  %v1213_v12 = vsel %vm8195_vm7, %v8156_v61, %v8172_v28  ;;  %v11326_v34 = vunpack.i.l.bf16 %v7932_v60  ;;  %v11327_v23 = vsel %vm7977_vm8, %v8004_v56, %v8064_v26  ;;  %v11329_v16 = vld [vmem:[#allocation44_spill] sm:$0xff] }
 0x184   :  { %1489 = vmatpush.bf16.msra.mxu1 %v1393_v3  ;;  %v1170_v15 = vsel %vm1119_vm6, %v11327_v23, %v8179_v8  ;;  %v543_v38 = vsel %vm532_vm9, %v11329_v16, %v11328_v54  ;;  %v1239_v61 = vsel %vm1208_vm11, %v1213_v12, %v775_v48  ;;  %v1214_v28 = vsel %vm8195_vm7, %v1154_v58, %v665_v19  ;;  %v11330_v56 = vld [vmem:[#allocation8_spill] sm:$0xff]  ;;  %v11333_v3 = vld [vmem:[#allocation50_spill] sm:$0xff] }
 0x185   :  { %v905_v32 = vsel %vm11197_vm14, %v7050_v24, %v11326_v34  ;;  %v8331_v24 = vpop.permute.xlu2 %996  ;;  %v669_v40 = vsel %vm661_vm10, %v7024_v6, %v7025_v29  ;;  %v1243_v5 = vsel %vm1208_vm11, %v1214_v28, %v776_v17  ;;  %v7065_v26 = vunpack.i.h.bf16 %v11330_v56  ;;  %v8344_v27 = vpop.permute.xlu1 %992  ;;  %5622 = vmatmul.msk.bf16.vlgmr.msra.gmra.mxu0 %vm11194_vm1, %v8301_v51  ;;  %v11336_v17 = vld [vmem:[#allocation49_spill] sm:$0xff] }
 0x186   :  { %5619 = vmatmul.msk.bf16.vlgmr.msra.gmra.mxu3 %vm11194_vm1, %v8301_v51  ;;  %v983_v8 = vpop.permute.xlu0 %982  ;;  %5618 = vmatmul.msk.bf16.vlgmr.msra.gmra.mxu2 %vm11194_vm1, %v8301_v51  ;;  %v1302_v4 = vsel %vm8228_vm12, %v1239_v61, %v904_v43  ;;  %v7064_v37 = vunpack.i.l.bf16 %v11330_v56  ;;  %v1303_v44 = vsel %vm8228_vm12, %v1243_v5, %v905_v32  ;;  %v11331_v21 = vunpack.i.h.bf16 %v7770_v31  ;;  %v11335_v31 = vld [vmem:[#allocation46_spill] sm:$0xff] }
 0x187   :  { %v1015_v62 = vsel %vm1012_vm2, %v8128_v11, %v983_v8  ;;  %v1016_v59 = vsel %vm1012_vm2, %v983_v8, %v8191_v14  ;;  %5623 = vmatmul.msk.bf16.vlgmr.msra.gmra.mxu1 %vm11194_vm1, %v8301_v51  ;;  %v780_v11 = vsel %vm772_vm13, %v11333_v3, %v11332_v7  ;;  %v7035_v19 = vunpack.i.h.bf16 %v11334_v35 }
 0x188   :  { %v668_v30 = vsel %vm661_vm10, %v11331_v21, %v7024_v6  ;;  %v1326_v50 = vsel %vm11196_vm15, %v1302_v4, %v1015_v62  ;;  %v1329_v14 = vsel %vm11196_vm15, %v1303_v44, %v1016_v59  ;;  %v7034_v46 = vunpack.i.l.bf16 %v11334_v35  ;;  %v11341_v21 = vld [vmem:[#allocation51_spill] sm:$0xff] }
 0x189   :  { %v1387_v48 = vand.u32 %v8251_v33, %v1326_v50  ;;  %v1389_v1 = vand.u32 %v8251_v33, %v1329_v14  ;;  %v542_v6 = vsel %vm532_vm9, %v11335_v31, %v11329_v16  ;;  %v779_v58 = vsel %vm772_vm13, %v7806_v41, %v11333_v3 }
 0x18a   :  { %v7039_v43 = vunpack.i.l.bf16 %v11336_v17  ;;  %v1218_v57 = vsel %vm8195_vm7, %v1170_v15, %v669_v40  ;;  %v7030_v12 = vunpack.i.h.bf16 %v7794_v63  ;;  %v11337_v34 = vunpack.i.h.bf16 %v7932_v60  ;;  %v11339_v63 = vld [vmem:[#allocation45_spill] sm:$0xff] }
 0x18b   :  { %v909_v23 = vsel %vm11197_vm14, %v7064_v37, %v7065_v26  ;;  %v1259_v16 = vsel %vm1208_vm11, %v1218_v57, %v780_v11  ;;  %1450 = vmatpush.bf16.msrb.mxu2 %v1387_v48  ;;  %1463 = vmatpush.bf16.msrb.mxu3 %v1389_v1  ;;  %v11338_v41 = vsel %vm7977_vm8, %v8051_v2, %v8077_v10  ;;  %v7070_v5 = vunpack.i.h.bf16 %v8030_v25 }
 0x18c   :  { %v908_v32 = vsel %vm11197_vm14, %v11337_v34, %v7064_v37  ;;  %v1182_v15 = vsel %vm1119_vm6, %v11338_v41, %v543_v38  ;;  %v544_v60 = vsel %vm532_vm9, %v11328_v54, %v11339_v63  ;;  %v541_v61 = vsel %vm532_vm9, %v7758_v0, %v11335_v31 }
 0x18d   :  { %v1217_v28 = vsel %vm8195_vm7, %v1166_v9, %v668_v30  ;;  %v11340_v40 = vsel %vm7977_vm8, %v8083_v36, %v8074_v55  ;;  %v672_v10 = vsel %vm661_vm10, %v7030_v12, %v7034_v46  ;;  %v673_v54 = vsel %vm661_vm10, %v7034_v46, %v7035_v19  ;;  %v8417_v36 = vpop.permute.xlu1 %1000  ;;  %v8421_v62 = vpop.permute.xlu2 %288  ;;  %v11342_v30 = vld [vmem:[#allocation53_spill] sm:$0xff] }
 0x18e   :  { %v1178_v2 = vsel %vm1119_vm6, %v11340_v40, %v542_v6  ;;  %v1255_v38 = vsel %vm1208_vm11, %v1217_v28, %v779_v58  ;;  %v671_v0 = vsel %vm661_vm10, %v7039_v43, %v7030_v12  ;;  %v991_v8 = vpop.permute.xlu0 %990  ;;  %v1307_v55 = vsel %vm8228_vm12, %v1259_v16, %v909_v23  ;;  %v11345_v6 = vld [vmem:[#allocation52_spill] sm:$0xff] }
 0x18f   :  { %v1306_v9 = vsel %vm8228_vm12, %v1255_v38, %v908_v32  ;;  %v7075_v4 = vunpack.i.h.bf16 %v8126_v53  ;;  %v7074_v37 = vunpack.i.l.bf16 %v8126_v53  ;;  %v1019_v59 = vsel %vm1012_vm2, %v8233_v47, %v991_v8 }
 0x190   :  { %v1020_v25 = vsel %vm1012_vm2, %v991_v8, %v8344_v27  ;;  %v670_v44 = vsel %vm661_vm10, %v7025_v29, %v7039_v43  ;;  %v782_v3 = vsel %vm772_vm13, %v11342_v30, %v11341_v21  ;;  %v1338_v11 = vsel %vm11196_vm15, %v1306_v9, %v1019_v59  ;;  %v11346_v43 = vld [vmem:[#allocation11_spill] sm:$0xff] }
 0x191   :  { %v1341_v50 = vsel %vm11196_vm15, %v1307_v55, %v1020_v25  ;;  %v1220_v14 = vsel %vm8195_vm7, %v1178_v2, %v671_v0  ;;  %v7079_v47 = vunpack.i.l.bf16 %v8189_v18  ;;  %v1395_v46 = vand.u32 %v8251_v33, %v1338_v11 }
 0x192   :  { %v1397_v48 = vand.u32 %v8251_v33, %v1341_v50  ;;  %v1186_v29 = vsel %vm1119_vm6, %v11343_v39, %v544_v60  ;;  %v11344_v1 = vsel %vm7977_vm8, %v8080_v22, %v8086_v52  ;;  %v783_v58 = vsel %vm772_vm13, %v11341_v21, %v11345_v6 }
 0x193   :  { %v1174_v31 = vsel %vm1119_vm6, %v11344_v1, %v541_v61  ;;  %v784_v57 = vsel %vm772_vm13, %v11345_v6, %v11346_v43  ;;  %v781_v13 = vsel %vm772_vm13, %v11332_v7, %v11342_v30  ;;  %v912_v45 = vsel %vm11197_vm14, %v7070_v5, %v7074_v37  ;;  %1502 = vmatpush.bf16.msra.mxu2 %v1395_v46 }
 0x194   :  { %v913_v22 = vsel %vm11197_vm14, %v7074_v37, %v7075_v4  ;;  %1515 = vmatpush.bf16.msra.mxu3 %v1397_v48  ;;  %v1267_v52 = vsel %vm1208_vm11, %v1220_v14, %v782_v3  ;;  %v1221_v12 = vsel %vm8195_vm7, %v1182_v15, %v672_v10  ;;  %v1219_v34 = vsel %vm8195_vm7, %v1174_v31, %v670_v44  ;;  %v11348_v31 = vld [vmem:[#allocation25_spill] sm:$0xff] }
 0x195   :  { %v1222_v32 = vsel %vm8195_vm7, %v1186_v29, %v673_v54  ;;  %v1271_v7 = vsel %vm1208_vm11, %v1221_v12, %v783_v58  ;;  %v910_v16 = vsel %vm11197_vm14, %v7065_v26, %v7079_v47  ;;  %v911_v41 = vsel %vm11197_vm14, %v7079_v47, %v7070_v5  ;;  %v995_v56 = vpop.permute.xlu1 %994  ;;  %v527_v9 = vpop.permute.xlu2 %526  ;;  %v11347_v47 = vld [vmem:[#allocation29_spill] sm:$0xff]  ;;  %v11349_v12 = vld [vmem:[#allocation40_spill] sm:$0xff] }
 0x196   :  { %v1275_v23 = vsel %vm1208_vm11, %v1222_v32, %v784_v57  ;;  %v1263_v60 = vsel %vm1208_vm11, %v1219_v34, %v781_v13  ;;  %5621 = vmatmul.msk.bf16.vlgmr.msrb.gmra.mxu3 %vm11194_vm1, %v8301_v51  ;;  %v1310_v15 = vsel %vm8228_vm12, %v1271_v7, %v912_v45  ;;  %v999_v61 = vpop.permute.xlu0 %998  ;;  %5620 = vmatmul.msk.bf16.vlgmr.msrb.gmra.mxu2 %vm11194_vm1, %v8301_v51  ;;  %v7060_v46 = vunpack.i.h.bf16 %v11347_v47 }
 0x197   :  { %v1311_v28 = vsel %vm8228_vm12, %v1275_v23, %v913_v22  ;;  %v1023_v26 = vsel %vm1012_vm2, %v8331_v24, %v999_v61  ;;  %v1024_v40 = vsel %vm1012_vm2, %v999_v61, %v8417_v36  ;;  %v1021_v2 = vsel %vm1012_vm2, %v8344_v27, %v995_v56 }
 0x198   :  { %v1022_v10 = vsel %vm1012_vm2, %v995_v56, %v8331_v24  ;;  %v1350_v54 = vsel %vm11196_vm15, %v1310_v15, %v1023_v26  ;;  %v1353_v38 = vsel %vm11196_vm15, %v1311_v28, %v1024_v40  ;;  %v1308_v0 = vsel %vm8228_vm12, %v1263_v60, %v910_v16  ;;  %v11350_v16 = vld [vmem:[#allocation19_spill] sm:$0xff]  ;;  %v11352_v15 = vld [vmem:[#allocation20_spill] sm:$0xff] }
 0x199   :  { %v1309_v5 = vsel %vm8228_vm12, %v1267_v52, %v911_v41  ;;  %v1403_v8 = vand.u32 %v8251_v33, %v1350_v54  ;;  %v1405_v55 = vand.u32 %v8251_v33, %v1353_v38  ;;  %v1344_v27 = vsel %vm11196_vm15, %v1308_v0, %v1021_v2 }
 0x19a   :  { %v1347_v37 = vsel %vm11196_vm15, %v1309_v5, %v1022_v10  ;;  %v1399_v24 = vand.u32 %v8251_v33, %v1344_v27  ;;  %v7059_v48 = vunpack.i.l.bf16 %v11347_v47  ;;  %v6970_v6 = vunpack.i.h.bf16 %v11348_v31 }
 0x19b   :  { %v1401_v59 = vand.u32 %v8251_v33, %v1347_v37  ;;  %1554 = vmatpush.bf16.msrb.mxu2 %v1403_v8  ;;  %1567 = vmatpush.bf16.msrb.mxu3 %v1405_v55  ;;  %v7005_v34 = vunpack.i.h.bf16 %v11349_v12  ;;  %v7040_v23 = vunpack.i.h.bf16 %v11336_v17 }
 0x19c   :  { %1528 = vmatpush.bf16.msrb.mxu0 %v1399_v24  ;;  %v196_v58 = vsel %vm181_vm0, %v6970_v6, %v7059_v48  ;;  %v197_v57 = vsel %vm181_vm0, %v7059_v48, %v7060_v46 }
 0x19d   :  { %1541 = vmatpush.bf16.msrb.mxu1 %v1401_v59  ;;  %v287_v44 = vpop.permute.xlu1 %286  ;;  %v8513_v21 = vpop.permute.xlu2 %764  ;;  %v1047_v60 = vsel %vm7876_vm3, %v11350_v16, %v196_v58  ;;  %v1048_v61 = vsel %vm7876_vm3, %v11352_v15, %v197_v57  ;;  %v7080_v59 = vunpack.i.h.bf16 %v8189_v18 }
 0x19e   :  { %v8507_v25 = vpop.permute.xlu0 %284  ;;  %v308_v52 = vsel %vm11195_vm4, %v287_v44, %v8421_v62 }
 0x19f   :  { %5626 = vmatmul.msk.bf16.vlgmr.msrb.gmra.mxu0 %vm11194_vm1, %v8301_v51  ;;  %v307_v22 = vsel %vm11195_vm4, %v8507_v25, %v287_v44 }
 0x1a0   :  { %5627 = vmatmul.msk.bf16.vlgmr.msrb.gmra.mxu1 %vm11194_vm1, %v8301_v51 }
 0x1a5   :  { %v8521_v3 = vpop.permute.xlu1 %524  ;;  %v8523_v11 = vpop.permute.xlu2 %7092 }
 0x1a6   :  { %5625 = vmatmul.msk.bf16.vlgmr.msra.gmra.mxu3 %vm11194_vm1, %v8301_v51  ;;  %v8517_v30 = vpop.permute.xlu0 %7082  ;;  %5624 = vmatmul.msk.bf16.vlgmr.msra.gmra.mxu2 %vm11194_vm1, %v8301_v51  ;;  %v547_v38 = vsel %vm532_vm9, %v8521_v3, %v527_v9 }
 0x1a7   :  { %v7085_v13 = vunpack.i.h.bf16 %v8517_v30  ;;  %v7084_v45 = vunpack.i.l.bf16 %v8517_v30 }
 0x1a9   :  { %v436_v28 = vsel %vm421_vm5, %v7005_v34, %v7084_v45  ;;  %v437_v56 = vsel %vm421_vm5, %v7084_v45, %v7085_v13 }
 0x1ad   :  { %v8527_v14 = vpop.permute.xlu1 %7087  ;;  %v8537_v1 = vpop.permute.xlu2 %1004 }
 0x1ae   :  { %v8525_v50 = vpop.permute.xlu0 %528  ;;  %v7090_v32 = vunpack.i.h.bf16 %v8527_v14  ;;  %v7089_v7 = vunpack.i.l.bf16 %v8527_v14 }
 0x1af   :  { %v548_v54 = vsel %vm532_vm9, %v527_v9, %v8525_v50 }
 0x1b0   :  { %v676_v0 = vsel %vm661_vm10, %v7040_v23, %v7089_v7  ;;  %v677_v5 = vsel %vm661_vm10, %v7089_v7, %v7090_v32  ;;  %v7094_v7 = vunpack.i.l.bf16 %v8523_v11 }
 0x1b5   :  { %v8535_v29 = vpop.permute.xlu1 %768  ;;  %v8582_v27 = vpop.permute.xlu2 %7102 }
 0x1b6   :  { %5629 = vmatmul.msk.bf16.vlgmr.msrb.gmra.mxu3 %vm11194_vm1, %v8301_v51  ;;  %v767_v39 = vpop.permute.xlu0 %766  ;;  %5628 = vmatmul.msk.bf16.vlgmr.msrb.gmra.mxu2 %vm11194_vm1, %v8301_v51  ;;  %vm11353_vm1 = vcmask 1040384   ;;  %v7105_v47 = vunpack.i.h.bf16 %v8582_v27 }
 0x1b7   :  { %v1109_v26 = vsel %vm11353_vm1, %v1047_v60, %v307_v22  ;;  %vm11354_vm4 = vmmov %vm11353_vm1  ;;  %v788_v24 = vsel %vm772_vm13, %v767_v39, %v8535_v29  ;;  %v787_v31 = vsel %vm772_vm13, %v8513_v21, %v767_v39  ;;  %vm11358_vm1 = vcmask 1031168  }
 0x1b8   :  { %v1113_v40 = vsel %vm11354_vm4, %v1048_v61, %v308_v52  ;;  %v1136_v9 = vsel %vm7977_vm8, %v1109_v26, %v436_v28  ;;  %vm11359_vm4 = vmmov %vm11358_vm1 }
 0x1b9   :  { %v1137_v37 = vsel %vm7977_vm8, %v1113_v40, %v437_v56  ;;  %v1198_v48 = vsel %vm1119_vm6, %v1136_v9, %v547_v38 }
 0x1ba   :  { %v1202_v44 = vsel %vm1119_vm6, %v1137_v37, %v548_v54  ;;  %v1225_v58 = vsel %vm8195_vm7, %v1198_v48, %v676_v0  ;;  %v11355_v0 = vld [vmem:[#allocation24_spill] sm:$0xff]  ;;  %v195_v37 = vsel %vm181_vm0, %v7094_v7, %v6970_v6 }
 0x1bb   :  { %v1226_v57 = vsel %vm8195_vm7, %v1202_v44, %v677_v5  ;;  %v1287_v39 = vsel %vm1208_vm11, %v1225_v58, %v787_v31  ;;  %v11356_v5 = vunpack.i.h.bf16 %v11355_v0  ;;  %v7104_v31 = vunpack.i.l.bf16 %v8582_v27  ;;  %v11360_v58 = vld [vmem:[#allocation17_spill] sm:$0xff] }
 0x1bc   :  { %v1291_v52 = vsel %vm1208_vm11, %v1226_v57, %v788_v24  ;;  %v11357_v24 = vld [vmem:[#allocation31_spill] sm:$0xff] }
 0x1bd   :  { %v283_v10 = vpop.permute.xlu1 %282  ;;  %v763_v9 = vpop.permute.xlu2 %762 }
 0x1be   :  { %v8568_v2 = vpop.permute.xlu0 %7097  ;;  %v305_v44 = vsel %vm11358_vm1, %v11357_v24, %v283_v10  ;;  %v306_v48 = vsel %vm11359_vm4, %v283_v10, %v8507_v25 }
 0x1bf   :  { %v7100_v8 = vunpack.i.h.bf16 %v8568_v2  ;;  %v7099_v55 = vunpack.i.l.bf16 %v8568_v2 }
 0x1c1   :  { %v916_v45 = vsel %vm11197_vm14, %v7080_v59, %v7099_v55  ;;  %v917_v22 = vsel %vm11197_vm14, %v7099_v55, %v7100_v8  ;;  %v194_v55 = vsel %vm181_vm0, %v11356_v5, %v7094_v7  ;;  %vm11364_vm14 = vcmask 1040384  }
 0x1c2   :  { %v1314_v61 = vsel %vm8228_vm12, %v1287_v39, %v916_v45  ;;  %v1315_v56 = vsel %vm8228_vm12, %v1291_v52, %v917_v22  ;;  %v1045_v57 = vsel %vm7876_vm3, %v11360_v58, %v194_v55  ;;  %v11361_v45 = vld [vmem:[#allocation18_spill] sm:$0xff]  ;;  %vm11365_vm4 = vmmov %vm11364_vm14  ;;  %v438_v58 = vsel %vm421_vm5, %v7085_v13, %v7105_v47 }
 0x1c3   :  { %v1046_v22 = vsel %vm7876_vm3, %v11361_v45, %v195_v37  ;;  %v1101_v25 = vsel %vm11364_vm14, %v1045_v57, %v305_v44  ;;  %vm11368_vm14 = vcmask 1031168  }
 0x1c4   :  { %v1105_v10 = vsel %vm11365_vm4, %v1046_v22, %v306_v48  ;;  %vm11372_vm4 = vcmask 1043456  }
 0x1c5   :  { %v8608_v60 = vpop.permute.xlu1 %1008  ;;  %v291_v17 = vpop.permute.xlu2 %290 }
 0x1c6   :  { %v1007_v16 = vpop.permute.xlu0 %1006 }
 0x1c7   :  { %v1027_v15 = vsel %vm1012_vm2, %v8537_v1, %v1007_v16  ;;  %v1028_v28 = vsel %vm1012_vm2, %v1007_v16, %v8608_v60 }
 0x1c8   :  { %v1362_v26 = vsel %vm11196_vm15, %v1314_v61, %v1027_v15  ;;  %v1365_v40 = vsel %vm11196_vm15, %v1315_v56, %v1028_v28  ;;  %vm11362_vm15 = vcmask 72704   ;;  %v11366_v15 = vld [vmem:[#allocation42_spill] sm:$0xff]  ;;  %v435_v56 = vsel %vm421_vm5, %v7104_v31, %v7005_v34 }
 0x1c9   :  { %v1411_v54 = vand.u32 %v8251_v33, %v1362_v26  ;;  %v1413_v38 = vand.u32 %v8251_v33, %v1365_v40  ;;  %vm11363_vm1 = vmmov %vm11362_vm15  ;;  %v11367_v61 = vunpack.i.h.bf16 %v11366_v15  ;;  %v7095_v34 = vunpack.i.h.bf16 %v8523_v11 }
 0x1cb   :  { %1606 = vmatpush.bf16.msra.mxu2 %v1411_v54  ;;  %1619 = vmatpush.bf16.msra.mxu3 %v1413_v38  ;;  %v434_v28 = vsel %vm421_vm5, %v11367_v61, %v7104_v31  ;;  %v786_v38 = vsel %vm772_vm13, %v763_v9, %v8513_v21  ;;  %v198_v24 = vsel %vm181_vm0, %v7060_v46, %v7095_v34 }
 0x1cc   :  { %v309_v21 = vsel %vm11368_vm14, %v8421_v62, %v291_v17  ;;  %vm11373_vm14 = vmmov %vm11372_vm4 }
 0x1cd   :  { %v7108_v52 = vpop.permute.xlu1 %7107 }
 0x1ce   :  { %v523_v6 = vpop.permute.xlu0 %522  ;;  %5632 = vmatmul.msk.bf16.vlgmr.msra.gmra.mxu2 %vm11362_vm15, %v8301_v51  ;;  %5633 = vmatmul.msk.bf16.vlgmr.msra.gmra.mxu3 %vm11363_vm1, %v8301_v51  ;;  %v7109_v7 = vunpack.i.l.bf16 %v7108_v52  ;;  %vm11369_vm15 = vcmask 515072   ;;  %v7110_v31 = vunpack.i.h.bf16 %v7108_v52 }
 0x1cf   :  { %v545_v16 = vsel %vm532_vm9, %v11339_v63, %v523_v6  ;;  %v546_v39 = vsel %vm532_vm9, %v523_v6, %v8521_v3  ;;  %v1134_v63 = vsel %vm7977_vm8, %v1101_v25, %v434_v28  ;;  %v1135_v3 = vsel %vm7977_vm8, %v1105_v10, %v435_v56  ;;  %vm11370_vm1 = vmmov %vm11369_vm15  ;;  %v1011_v25 = vpop.permute.xlu2 %1010 }
 0x1d0   :  { %v674_v26 = vsel %vm661_vm10, %v7035_v19, %v7109_v7  ;;  %v675_v40 = vsel %vm661_vm10, %v7109_v7, %v7040_v23  ;;  %v1190_v54 = vsel %vm1119_vm6, %v1134_v63, %v545_v16  ;;  %v1194_v12 = vsel %vm1119_vm6, %v1135_v3, %v546_v39 }
 0x1d1   :  { %v1223_v35 = vsel %vm8195_vm7, %v1190_v54, %v674_v26  ;;  %v1224_v19 = vsel %vm8195_vm7, %v1194_v12, %v675_v40  ;;  %v785_v23 = vsel %vm772_vm13, %v11346_v43, %v763_v9  ;;  %v678_v30 = vsel %vm661_vm10, %v7090_v32, %v7110_v31  ;;  %vm11378_vm10 = vmmov %vm11372_vm4 }
 0x1d2   :  { %v1279_v37 = vsel %vm1208_vm11, %v1223_v35, %v785_v23  ;;  %v1283_v11 = vsel %vm1208_vm11, %v1224_v19, %v786_v38  ;;  %v1029_v14 = vsel %vm1012_vm2, %v8608_v60, %v1011_v25 }
 0x1d5   :  { %v1003_v5 = vpop.permute.xlu1 %1002 }
 0x1d6   :  { %v7113_v0 = vpop.permute.xlu0 %7112  ;;  %v1025_v44 = vsel %vm1012_vm2, %v8417_v36, %v1003_v5  ;;  %v1026_v43 = vsel %vm1012_vm2, %v1003_v5, %v8537_v1  ;;  %v11371_v1 = vld [vmem:[#allocation21_spill] sm:$0xff] }
 0x1d7   :  { %v7114_v55 = vunpack.i.l.bf16 %v7113_v0  ;;  %v1049_v62 = vsel %vm7876_vm3, %v11371_v1, %v198_v24  ;;  %v7115_v57 = vunpack.i.h.bf16 %v7113_v0  ;;  %vm11375_vm3 = vcmask 72704  }
 0x1d9   :  { %v914_v9 = vsel %vm11369_vm15, %v7075_v4, %v7114_v55  ;;  %v915_v48 = vsel %vm11370_vm1, %v7114_v55, %v7080_v59  ;;  %vm11374_vm15 = vcmask 1040384  }
 0x1da   :  { %v1312_v46 = vsel %vm8228_vm12, %v1279_v37, %v914_v9  ;;  %v1313_v36 = vsel %vm8228_vm12, %v1283_v11, %v915_v48  ;;  %v1117_v18 = vsel %vm11374_vm15, %v1049_v62, %v309_v21 }
 0x1db   :  { %v1356_v53 = vsel %vm11372_vm4, %v1312_v46, %v1025_v44  ;;  %v1359_v4 = vsel %vm11373_vm14, %v1313_v36, %v1026_v43  ;;  %v1138_v6 = vsel %vm7977_vm8, %v1117_v18, %v438_v58  ;;  %vm11377_vm8 = vmmov %vm11370_vm1  ;;  %vm11381_vm14 = vcmask 1031168  }
 0x1dc   :  { %v1407_v59 = vand.u32 %v8251_v33, %v1356_v53  ;;  %v1409_v27 = vand.u32 %v8251_v33, %v1359_v4  ;;  %v918_v42 = vsel %vm11377_vm8, %v7100_v8, %v7115_v57  ;;  %vm11380_vm1 = vmmov %vm11374_vm15  ;;  %vm11382_vm15 = vcmask 1044480  }
 0x1dd   :  { %v771_v41 = vpop.permute.xlu1 %770  ;;  %vm11385_vm8 = vmmov %vm11372_vm4 }
 0x1de   :  { %v531_v45 = vpop.permute.xlu0 %530  ;;  %1580 = vmatpush.bf16.msra.mxu0 %v1407_v59  ;;  %1593 = vmatpush.bf16.msra.mxu1 %v1409_v27  ;;  %v789_v52 = vsel %vm772_vm13, %v8535_v29, %v771_v41 }
 0x1df   :  { %v549_v22 = vsel %vm532_vm9, %v8525_v50, %v531_v45  ;;  %vm11376_vm9 = vmmov %vm11375_vm3 }
 0x1e0   :  { %v1206_v13 = vsel %vm1119_vm6, %v1138_v6, %v549_v22 }
 0x1e1   :  { %v1227_v10 = vsel %vm8195_vm7, %v1206_v13, %v678_v30  ;;  %5630 = vmatmul.msk.bf16.vlgmr.msra.gmra.mxu0 %vm11375_vm3, %v8301_v51  ;;  %5631 = vmatmul.msk.bf16.vlgmr.msra.gmra.mxu1 %vm11376_vm9, %v8301_v51  ;;  %vm11379_vm7 = vmmov %vm11375_vm3 }
 0x1e2   :  { %v1295_v50 = vsel %vm1208_vm11, %v1227_v10, %v789_v52  ;;  %vm11383_vm3 = vmmov %vm11380_vm1 }
 0x1e3   :  { %v1316_v29 = vsel %vm8228_vm12, %v1295_v50, %v918_v42  ;;  %vm2562_vm12 = vcmask 1046528   ;;  %vm11384_vm9 = vmmov %vm11381_vm14 }
 0x1e4   :  { %v1368_v49 = vsel %vm11378_vm10, %v1316_v29, %v1029_v14  ;;  %vm2456_vm10 = vcmask 1045504  }
 0x1e5   :  { %v1415_v32 = vand.u32 %v8251_v33, %v1368_v49 }
 0x1e6   :  { %v8735_v7 = vpop.permute.xlu0 %1373 }
 0x1e7   :  { %1632 = vmatpush.bf16.msrb.mxu0 %v1415_v32 }
 0x1f1   :  { %5634 = vmatmul.msk.bf16.vlgmr.msrb.gmra.mxu0 %vm11379_vm7, %v8301_v51  ;;  %vm11386_vm7 = vmmov %vm11380_vm1 }
 0x202   :  { %v1478_v2 = vpop.f32.mrf.mxu0 }
 0x203   :  { %v8738_v16 = vadd.f32 %v1478_v2, %v8735_v7 }
 0x204   :  { %v1491_v8 = vpop.f32.mrf.mxu1 }
 0x205   :  { %v8741_v60 = vadd.f32 %v1491_v8, %v8735_v7  ;;  %v1642_v20 = vmax.f32 %v8738_v16, 0.0 }
 0x207   :  { %v1643_v39 = vmax.f32 %v8741_v60, 0.0 }
 0x209   :  { %v1426_v15 = vpop.f32.mrf.mxu2  ;;  %v1439_v33 = vpop.f32.mrf.mxu3  ;;  %v7117_v51 = vpack.i.bf16 %v1643_v39, %v1642_v20 }
 0x20a   :  { %v8750_v61 = vadd.f32 %v1426_v15, %v8735_v7  ;;  %v8753_v28 = vadd.f32 %v1439_v33, %v8735_v7  ;;  %v1480_v40 = vpop.f32.mrf.mxu0 }
 0x20b   :  { %7118 = vrot.lane.b32.xlu1 %v7117_v51, %s7377_s27 }
 0x20c   :  { %v1638_v56 = vmax.f32 %v8750_v61, 0.0  ;;  %v1639_v26 = vmax.f32 %v8753_v28, 0.0  ;;  %v1493_v63 = vpop.f32.mrf.mxu1 }
 0x20e   :  { %v7122_v3 = vpack.i.bf16 %v1639_v26, %v1638_v56 }
 0x211   :  { %v1428_v54 = vpop.f32.mrf.mxu2  ;;  %v1441_v12 = vpop.f32.mrf.mxu3 }
 0x213   :  { %7123 = vrot.lane.b32.xlu1 %v7122_v3, %s7377_s27 }
 0x219   :  { %v1452_v34 = vpop.f32.mrf.mxu2  ;;  %v1465_v35 = vpop.f32.mrf.mxu3 }
 0x21a   :  { %v8764_v19 = vadd.f32 %v1452_v34, %v8735_v7  ;;  %v8767_v17 = vadd.f32 %v1465_v35, %v8735_v7 }
 0x21c   :  { %v1640_v23 = vmax.f32 %v8764_v19, 0.0  ;;  %v1641_v38 = vmax.f32 %v8767_v17, 0.0  ;;  %v1530_v0 = vpop.f32.mrf.mxu0 }
 0x21d   :  { %v1543_v5 = vpop.f32.mrf.mxu1  ;;  %v8772_v55 = vadd.f32 %v1530_v0, %v8735_v7 }
 0x21e   :  { %v8775_v37 = vadd.f32 %v1543_v5, %v8735_v7  ;;  %v7132_v11 = vpack.i.bf16 %v1641_v38, %v1640_v23 }
 0x21f   :  { %v1646_v24 = vmax.f32 %v8772_v55, 0.0 }
 0x220   :  { %v1647_v44 = vmax.f32 %v8775_v37, 0.0  ;;  %7133 = vrot.lane.b32.xlu2 %v7132_v11, %s7377_s27 }
 0x221   :  { %v1454_v43 = vpop.f32.mrf.mxu2  ;;  %v1467_v21 = vpop.f32.mrf.mxu3 }
 0x222   :  { %v7127_v9 = vpack.i.bf16 %v1647_v44, %v1646_v24 }
 0x224   :  { %7128 = vrot.lane.b32.xlu0 %v7127_v9, %s7377_s27  ;;  %v1532_v48 = vpop.f32.mrf.mxu0 }
 0x225   :  { %v1545_v47 = vpop.f32.mrf.mxu1 }
 0x229   :  { %v1504_v46 = vpop.f32.mrf.mxu2  ;;  %v1517_v36 = vpop.f32.mrf.mxu3 }
 0x22a   :  { %v1505_v8 = vadd.f32 %v1504_v46, %v8735_v7  ;;  %v1518_v15 = vadd.f32 %v1517_v36, %v8735_v7 }
 0x22c   :  { %v1644_v63 = vmax.f32 %v1505_v8, 0.0  ;;  %v1645_v3 = vmax.f32 %v1518_v15, 0.0 }
 0x22e   :  { %v7142_v54 = vpack.i.bf16 %v1645_v3, %v1644_v63 }
 0x231   :  { %v1506_v1 = vpop.f32.mrf.mxu2  ;;  %v1519_v62 = vpop.f32.mrf.mxu3 }
 0x239   :  { %v1556_v53 = vpop.f32.mrf.mxu2  ;;  %v1569_v4 = vpop.f32.mrf.mxu3 }
 0x23a   :  { %v8790_v18 = vadd.f32 %v1556_v53, %v8735_v7  ;;  %v8793_v31 = vadd.f32 %v1569_v4, %v8735_v7 }
 0x23c   :  { %v1648_v59 = vmax.f32 %v8790_v18, 0.0  ;;  %v1649_v27 = vmax.f32 %v8793_v31, 0.0 }
 0x23e   :  { %v7147_v58 = vpack.i.bf16 %v1649_v27, %v1648_v59 }
 0x240   :  { %7148 = vrot.lane.b32.xlu1 %v7147_v58, %s7377_s27 }
 0x241   :  { %v1558_v57 = vpop.f32.mrf.mxu2  ;;  %v1571_v45 = vpop.f32.mrf.mxu3 }
 0x251   :  { %v1608_v41 = vpop.f32.mrf.mxu2  ;;  %v1621_v22 = vpop.f32.mrf.mxu3 }
 0x252   :  { %v8803_v6 = vadd.f32 %v1608_v41, %v8735_v7  ;;  %v8806_v52 = vadd.f32 %v1621_v22, %v8735_v7 }
 0x254   :  { %v1652_v25 = vmax.f32 %v8803_v6, 0.0  ;;  %v1653_v30 = vmax.f32 %v8806_v52, 0.0 }
 0x256   :  { %v7152_v13 = vpack.i.bf16 %v1653_v30, %v1652_v25 }
 0x258   :  { %7153 = vrot.lane.b32.xlu0 %v7152_v13, %s7377_s27 }
 0x259   :  { %v1610_v10 = vpop.f32.mrf.mxu2  ;;  %v1623_v42 = vpop.f32.mrf.mxu3 }
 0x25e   :  { %v1582_v50 = vpop.f32.mrf.mxu0  ;;  %v1595_v14 = vpop.f32.mrf.mxu1 }
 0x25f   :  { %v8816_v29 = vadd.f32 %v1582_v50, %v8735_v7  ;;  %v8819_v49 = vadd.f32 %v1595_v14, %v8735_v7 }
 0x261   :  { %v1650_v32 = vmax.f32 %v8816_v29, 0.0  ;;  %v1651_v2 = vmax.f32 %v8819_v49, 0.0 }
 0x263   :  { %v7137_v33 = vpack.i.bf16 %v1651_v2, %v1650_v32 }
 0x265   :  { %7138 = vrot.lane.b32.xlu2 %v7137_v33, %s7377_s27 }
 0x266   :  { %v1584_v51 = vpop.f32.mrf.mxu0  ;;  %v1597_v40 = vpop.f32.mrf.mxu1 }
 0x26d   :  { %7143 = vrot.lane.b32.xlu2 %v7142_v54, %s7377_s27 }
 0x26e   :  { %v1634_v12 = vpop.f32.mrf.mxu0 }
 0x26f   :  { %v8832_v34 = vadd.f32 %v1634_v12, %v8735_v7 }
 0x271   :  { %v1654_v35 = vmax.f32 %v8832_v34, 0.0 }
 0x275   :  { %1704 = vrot.lane.b32.xlu2 %v1654_v35, %s7377_s27 }
 0x276   :  { %v1636_v0 = vpop.f32.mrf.mxu0 }
 0x27a   :  { %v7134_v5 = vpop.permute.xlu2 %7133 }
 0x27b   :  { %v7136_v11 = vunpack.i.h.bf16 %v7134_v5  ;;  %v7135_v43 = vunpack.i.l.bf16 %v7134_v5 }
 0x27d   :  { %v7119_v21 = vpop.permute.xlu1 %7118  ;;  %v1709_v48 = vsel %vm181_vm0, %v7135_v43, %v7136_v11 }
 0x27e   :  { %v7120_v9 = vunpack.i.l.bf16 %v7119_v21  ;;  %v8842_v7 = vmax.f32 %v1640_v23, %v1709_v48  ;;  %v7121_v45 = vunpack.i.h.bf16 %v7119_v21 }
 0x280   :  { %v1710_v47 = vsel %vm181_vm0, %v7136_v11, %v7120_v9  ;;  %v1711_v50 = vsel %vm181_vm0, %v7120_v9, %v7121_v45 }
 0x281   :  { %v8846_v46 = vmax.f32 %v1641_v38, %v1710_v47  ;;  %v8875_v12 = vmax.f32 %v1642_v20, %v1711_v50 }
 0x283   :  { %v7162_v36 = vpack.i.bf16 %v8846_v46, %v8842_v7 }
 0x285   :  { %v7124_v1 = vpop.permute.xlu1 %7123  ;;  %7163 = vrot.lane.b32.xlu2 %v7162_v36, %s7379_s30 }
 0x286   :  { %v7126_v62 = vunpack.i.h.bf16 %v7124_v1  ;;  %v7125_v53 = vunpack.i.l.bf16 %v7124_v1 }
 0x288   :  { %v1707_v4 = vsel %vm181_vm0, %v7125_v53, %v7126_v62  ;;  %v1708_v58 = vsel %vm181_vm0, %v7126_v62, %v7135_v43 }
 0x289   :  { %v8855_v19 = vmax.f32 %v1638_v56, %v1707_v4  ;;  %v8859_v17 = vmax.f32 %v1639_v26, %v1708_v58 }
 0x28b   :  { %v7157_v23 = vpack.i.bf16 %v8859_v17, %v8855_v19 }
 0x28d   :  { %7158 = vrot.lane.b32.xlu1 %v7157_v23, %s7379_s30 }
 0x296   :  { %v7129_v57 = vpop.permute.xlu0 %7128 }
 0x297   :  { %v7130_v42 = vunpack.i.l.bf16 %v7129_v57  ;;  %v7131_v5 = vunpack.i.h.bf16 %v7129_v57 }
 0x299   :  { %v1715_v21 = vsel %vm181_vm0, %v7130_v42, %v7131_v5 }
 0x29a   :  { %v8908_v9 = vmax.f32 %v1646_v24, %v1715_v21 }
 0x2b2   :  { %v7149_v41 = vpop.permute.xlu1 %7148 }
 0x2b3   :  { %v7150_v28 = vunpack.i.l.bf16 %v7149_v41 }
 0x2b5   :  { %v1716_v20 = vsel %vm181_vm0, %v7131_v5, %v7150_v28 }
 0x2b6   :  { %v8904_v49 = vmax.f32 %v1647_v44, %v1716_v20 }
 0x2b8   :  { %v7177_v47 = vpack.i.bf16 %v8904_v49, %v8908_v9 }
 0x2bf   :  { %v7139_v38 = vpop.permute.xlu2 %7138 }
 0x2c0   :  { %v7141_v22 = vunpack.i.h.bf16 %v7139_v38  ;;  %v7140_v13 = vunpack.i.l.bf16 %v7139_v38 }
 0x2c2   :  { %v1719_v54 = vsel %vm181_vm0, %v7140_v13, %v7141_v22 }
 0x2c7   :  { %v7144_v10 = vpop.permute.xlu2 %7143 }
 0x2c8   :  { %v7146_v61 = vunpack.i.h.bf16 %v7144_v10  ;;  %v7145_v56 = vunpack.i.l.bf16 %v7144_v10 }
 0x2ca   :  { %v7154_v26 = vpop.permute.xlu0 %7153  ;;  %v1713_v14 = vsel %vm181_vm0, %v7145_v56, %v7146_v61  ;;  %v1714_v8 = vsel %vm181_vm0, %v7146_v61, %v7130_v42  ;;  %v1712_v15 = vsel %vm181_vm0, %v7121_v45, %v7145_v56 }
 0x2cb   :  { %v7155_v33 = vunpack.i.l.bf16 %v7154_v26  ;;  %v8868_v51 = vmax.f32 %v1644_v63, %v1713_v14  ;;  %v8870_v40 = vmax.f32 %v1645_v3, %v1714_v8  ;;  %v8879_v0 = vmax.f32 %v1643_v39, %v1712_v15 }
 0x2cc   :  { %v8888_v3 = vmax.f32 %v1650_v32, %v1719_v54  ;;  %v7156_v32 = vunpack.i.h.bf16 %v7154_v26 }
 0x2cd   :  { %v7172_v11 = vpack.i.bf16 %v8870_v40, %v8868_v51  ;;  %v1720_v43 = vsel %vm181_vm0, %v7141_v22, %v7155_v33  ;;  %v7167_v63 = vpack.i.bf16 %v8879_v0, %v8875_v12 }
 0x2ce   :  { %v8892_v16 = vmax.f32 %v1651_v2, %v1720_v43  ;;  %v7151_v2 = vunpack.i.h.bf16 %v7149_v41  ;;  %v1721_v37 = vsel %vm181_vm0, %v7155_v33, %v7156_v32 }
 0x2cf   :  { %7173 = vrot.lane.b32.xlu1 %v7172_v11, %s7379_s30  ;;  %v1705_v60 = vpop.permute.xlu2 %1704  ;;  %7168 = vrot.lane.b32.xlu0 %v7167_v63, %s7379_s30  ;;  %v8930_v34 = vmax.f32 %v1652_v25, %v1721_v37 }
 0x2d0   :  { %v7187_v39 = vpack.i.bf16 %v8892_v16, %v8888_v3  ;;  %v1741_v29 = vsel %vm181_vm0, %v1705_v60, %v7125_v53  ;;  %v1718_v36 = vsel %vm181_vm0, %v7151_v2, %v7140_v13  ;;  %v1722_v1 = vsel %vm181_vm0, %v7156_v32, %v1705_v60 }
 0x2d1   :  { %v1758_v48 = vmax.f32 %v1654_v35, %v1741_v29  ;;  %v1717_v55 = vsel %vm181_vm0, %v7150_v28, %v7151_v2  ;;  %v8922_v24 = vmax.f32 %v1649_v27, %v1718_v36  ;;  %v8926_v44 = vmax.f32 %v1653_v30, %v1722_v1 }
 0x2d2   :  { %7188 = vrot.lane.b32.xlu2 %v7187_v39, %s7379_s30  ;;  %v8934_v35 = vmax.f32 %v1648_v59, %v1717_v55  ;;  %vm2053_vm0 = vcmask 1014784  }
 0x2d3   :  { %v7192_v31 = vpack.i.bf16 %v8926_v44, %v8930_v34 }
 0x2d4   :  { %v7182_v62 = vpack.i.bf16 %v8922_v24, %v8934_v35 }
 0x2d7   :  { %1808 = vrot.lane.b32.xlu1 %v1758_v48, %s7379_s30  ;;  %7178 = vrot.lane.b32.xlu0 %v7177_v47, %s7379_s30 }
 0x2df   :  { %7183 = vrot.lane.b32.xlu1 %v7182_v62, %s7379_s30  ;;  %7193 = vrot.lane.b32.xlu0 %v7192_v31, %s7379_s30  ;;  %v7164_v27 = vpop.permute.xlu2 %7163 }
 0x2e0   :  { %v7165_v30 = vunpack.i.l.bf16 %v7164_v27 }
 0x2ff   :  { %v7159_v52 = vpop.permute.xlu1 %7158 }
 0x300   :  { %v7161_v6 = vunpack.i.h.bf16 %v7159_v52  ;;  %v7160_v25 = vunpack.i.l.bf16 %v7159_v52 }
 0x302   :  { %v1811_v53 = vsel %vm421_vm5, %v7160_v25, %v7161_v6  ;;  %v1812_v18 = vsel %vm421_vm5, %v7161_v6, %v7165_v30 }
 0x303   :  { %v1846_v59 = vmax.f32 %v8855_v19, %v1811_v53  ;;  %v1847_v4 = vmax.f32 %v8859_v17, %v1812_v18  ;;  %v7166_v17 = vunpack.i.h.bf16 %v7164_v27 }
 0x305   :  { %v1863_v58 = vpack.c.bf16 %v1847_v4, %v1846_v59  ;;  %v1813_v10 = vsel %vm421_vm5, %v7165_v30, %v7166_v17 }
 0x306   :  { %v1848_v26 = vmax.f32 %v8842_v7, %v1813_v10 }
 0x307   :  { %1872 = vst [vmem:[#allocation2] sm:$0x77] %v1863_v58 }
 0x30e   :  { %v8946_v23 = vld [vmem:[#allocation2] sm:$0x77] }
 0x30f   :  { %v1908_v38 = vunpack.c.h.b16 %v8946_v23 }
 0x311   :  { %v8949_v57 = vpack.c.b16 %v1908_v38, %v1908_v38 }
 0x313   :  { %2134 = vrot.lane.b32.xlu1 %v8949_v57, %s7384_s17  ;;  %v2180_v45 = vrot.slane %v8949_v57, 1  ;;  %v2070_v19 = vrot.slane %v8949_v57, 7 }
 0x31b   :  { %2197 = vrot.lane.b32.xlu1 %v2180_v45, %s7387_s1 }
 0x323   :  { %2087 = vrot.lane.b32.xlu1 %v2070_v19, %s7382_s15 }
 0x32c   :  { %v7189_v11 = vpop.permute.xlu2 %7188 }
 0x32d   :  { %v7191_v21 = vunpack.i.h.bf16 %v7189_v11 }
 0x341   :  { %v7174_v41 = vpop.permute.xlu1 %7173  ;;  %v7169_v13 = vpop.permute.xlu0 %7168 }
 0x342   :  { %v7175_v22 = vunpack.i.l.bf16 %v7174_v41  ;;  %v7171_v42 = vunpack.i.h.bf16 %v7169_v13  ;;  %v7170_v61 = vunpack.i.l.bf16 %v7169_v13  ;;  %v7176_v33 = vunpack.i.h.bf16 %v7174_v41 }
 0x343   :  { %v1907_v13 = vunpack.c.l.b16 %v8946_v23 }
 0x344   :  { %v1816_v56 = vsel %vm421_vm5, %v7171_v42, %v7175_v22  ;;  %v1814_v50 = vsel %vm421_vm5, %v7166_v17, %v7170_v61  ;;  %v1815_v28 = vsel %vm421_vm5, %v7170_v61, %v7171_v42  ;;  %v1817_v20 = vsel %vm421_vm5, %v7175_v22, %v7176_v33 }
 0x345   :  { %v1851_v14 = vmax.f32 %v8879_v0, %v1816_v56  ;;  %v1849_v8 = vmax.f32 %v8846_v46, %v1814_v50  ;;  %v1850_v15 = vmax.f32 %v8875_v12, %v1815_v28  ;;  %v7190_v0 = vunpack.i.l.bf16 %v7189_v11 }
 0x346   :  { %v1852_v32 = vmax.f32 %v8868_v51, %v1817_v20  ;;  %v2006_v11 = vrot.slane %v8949_v57, 2 }
 0x347   :  { %v1864_v54 = vpack.c.bf16 %v1849_v8, %v1848_v26  ;;  %v1865_v5 = vpack.c.bf16 %v1851_v14, %v1850_v15  ;;  %v1823_v47 = vsel %vm421_vm5, %v7190_v0, %v7191_v21 }
 0x348   :  { %v1858_v30 = vmax.f32 %v8888_v3, %v1823_v47 }
 0x349   :  { %v1809_v43 = vpop.permute.xlu1 %1808  ;;  %1873 = vst [vmem:[#allocation2 + $0x8] sm:$0x77] %v1864_v54  ;;  %v7179_v60 = vpop.permute.xlu0 %7178 }
 0x34a   :  { %v1845_v63 = vsel %vm421_vm5, %v1809_v43, %v7160_v25  ;;  %1874 = vst [vmem:[#allocation2 + $0x10] sm:$0x77] %v1865_v5  ;;  %v7180_v7 = vunpack.i.l.bf16 %v7179_v60  ;;  %v7181_v29 = vunpack.i.h.bf16 %v7179_v60 }
 0x34b   :  { %v1862_v39 = vmax.f32 %v1758_v48, %v1845_v63 }
 0x34c   :  { %v1818_v12 = vsel %vm421_vm5, %v7176_v33, %v7180_v7  ;;  %v1819_v36 = vsel %vm421_vm5, %v7180_v7, %v7181_v29 }
 0x34d   :  { %v1871_v46 = vpack.c.bf16 %v1862_v39, %v1862_v39  ;;  %v1853_v2 = vmax.f32 %v8870_v40, %v1818_v12  ;;  %v1854_v51 = vmax.f32 %v8908_v9, %v1819_v36 }
 0x34f   :  { %1880 = vst [vmem:[#allocation2 + $0x40] sm:$0x7] %v1871_v46  ;;  %v1866_v1 = vpack.c.bf16 %v1853_v2, %v1852_v32  ;;  %v1943_v46 = vrot.slane %v8949_v57, 5 }
 0x350   :  { %v1890_v55 = vld [vmem:[#allocation2 + $0x4] sm:$0x77] }
 0x351   :  { %v7184_v37 = vpop.permute.xlu1 %7183  ;;  %1875 = vst [vmem:[#allocation2 + $0x18] sm:$0x77] %v1866_v1  ;;  %v7194_v31 = vpop.permute.xlu0 %7193  ;;  %v2251_v27 = vunpack.c.l.b16 %v1890_v55  ;;  %v2252_v52 = vunpack.c.h.b16 %v1890_v55  ;;  %v1882_v22 = vld [vmem:[#allocation2 + $0x8] sm:$0x77] }
 0x352   :  { %v7186_v48 = vunpack.i.h.bf16 %v7184_v37  ;;  %v7185_v62 = vunpack.i.l.bf16 %v7184_v37  ;;  %v7196_v6 = vunpack.i.h.bf16 %v7194_v31  ;;  %v7195_v40 = vunpack.i.l.bf16 %v7194_v31  ;;  %v1891_v33 = vld [vmem:[#allocation2 + $0xc] sm:$0x77] }
 0x353   :  { %v8977_v59 = vpack.c.b16 %v2251_v27, %v2251_v27  ;;  %v8988_v17 = vpack.c.b16 %v2252_v52, %v2252_v52  ;;  %v1909_v61 = vunpack.c.l.b16 %v1882_v22  ;;  %v1910_v56 = vunpack.c.h.b16 %v1882_v22 }
 0x354   :  { %v1820_v25 = vsel %vm421_vm5, %v7181_v29, %v7185_v62  ;;  %v1821_v53 = vsel %vm421_vm5, %v7185_v62, %v7186_v48  ;;  %v1822_v18 = vsel %vm421_vm5, %v7186_v48, %v7190_v0  ;;  %v1826_v3 = vsel %vm421_vm5, %v7196_v6, %v1809_v43 }
 0x355   :  { %v1855_v4 = vmax.f32 %v8904_v49, %v1820_v25  ;;  %v1856_v58 = vmax.f32 %v8934_v35, %v1821_v53  ;;  %v1857_v38 = vmax.f32 %v8922_v24, %v1822_v18  ;;  %v1861_v9 = vmax.f32 %v8926_v44, %v1826_v3  ;;  %2364 = vrot.lane.b32.xlu0 %v8977_v59, %s7388_s21 }
 0x356   :  { %v1824_v45 = vsel %vm421_vm5, %v7191_v21, %v7195_v40  ;;  %v1825_v19 = vsel %vm421_vm5, %v7195_v40, %v7196_v6  ;;  %2366 = vrot.lane.b32.xlu2 %v8988_v17, %s7388_s21  ;;  %v2301_v44 = vrot.slane %v8977_v59, 3  ;;  %v2302_v50 = vrot.slane %v8988_v17, 3  ;;  %v1883_v21 = vld [vmem:[#allocation2 + $0x10] sm:$0x77] }
 0x357   :  { %v1867_v41 = vpack.c.bf16 %v1855_v4, %v1854_v51  ;;  %v1868_v49 = vpack.c.bf16 %v1857_v38, %v1856_v58  ;;  %v1859_v35 = vmax.f32 %v8892_v16, %v1824_v45  ;;  %v1860_v24 = vmax.f32 %v8930_v34, %v1825_v19 }
 0x358   :  { %2317 = vrot.lane.b32.xlu1 %v2301_v44, %s7378_s0  ;;  %v8997_v16 = vpack.c.b16 %v1907_v13, %v1907_v13  ;;  %v9001_v34 = vpack.c.b16 %v1909_v61, %v1909_v61  ;;  %v9009_v28 = vpack.c.b16 %v1910_v56, %v1910_v56  ;;  %v2254_v5 = vunpack.c.h.b16 %v1891_v33  ;;  %v1892_v63 = vld [vmem:[#allocation2 + $0x14] sm:$0x77] }
 0x359   :  { %1876 = vst [vmem:[#allocation2 + $0x20] sm:$0x77] %v1867_v41  ;;  %v1869_v10 = vpack.c.bf16 %v1859_v35, %v1858_v30  ;;  %v1870_v42 = vpack.c.bf16 %v1861_v9, %v1860_v24  ;;  %v2255_v20 = vunpack.c.l.b16 %v1892_v63  ;;  %v1912_v29 = vunpack.c.h.b16 %v1883_v21  ;;  %v1884_v36 = vld [vmem:[#allocation2 + $0x18] sm:$0x77] }
 0x35a   :  { %1877 = vst [vmem:[#allocation2 + $0x28] sm:$0x77] %v1868_v49  ;;  %v2005_v23 = vrot.slane %v8997_v16, 2  ;;  %v1942_v26 = vrot.slane %v8997_v16, 5  ;;  %v2007_v14 = vrot.slane %v9001_v34, 2  ;;  %v2181_v8 = vrot.slane %v9001_v34, 1 }
 0x35b   :  { %1878 = vst [vmem:[#allocation2 + $0x30] sm:$0x77] %v1869_v10  ;;  %v2072_v15 = vrot.slane %v9009_v28, 7  ;;  %v2179_v54 = vrot.slane %v8997_v16, 1  ;;  %v9025_v43 = vpack.c.b16 %v2254_v5, %v2254_v5  ;;  %v1944_v60 = vrot.slane %v9001_v34, 5 }
 0x35c   :  { %1879 = vst [vmem:[#allocation2 + $0x38] sm:$0x77] %v1870_v42  ;;  %v2071_v39 = vrot.slane %v9001_v34, 7  ;;  %v9033_v7 = vpack.c.b16 %v2255_v20, %v2255_v20  ;;  %v2008_v0 = vrot.slane %v9009_v28, 2  ;;  %v9041_v12 = vpack.c.b16 %v1912_v29, %v1912_v29 }
 0x35d   :  { %2132 = vrot.lane.b32.xlu0 %v8997_v16, %s7384_s17  ;;  %v2253_v32 = vunpack.c.l.b16 %v1891_v33  ;;  %v1911_v47 = vunpack.c.l.b16 %v1883_v21  ;;  %v2069_v1 = vrot.slane %v8997_v16, 7  ;;  %v1914_v55 = vunpack.c.h.b16 %v1884_v36 }
 0x35e   :  { %2136 = vrot.lane.b32.xlu2 %v9001_v34, %s7384_s17  ;;  %v2182_v62 = vrot.slane %v9009_v28, 1  ;;  %v2304_v27 = vrot.slane %v9025_v43, 3  ;;  %v1945_v52 = vrot.slane %v9009_v28, 5  ;;  %v1913_v30 = vunpack.c.l.b16 %v1884_v36 }
 0x35f   :  { %v9045_v2 = vpack.c.b16 %v2253_v32, %v2253_v32  ;;  %v9051_v37 = vpack.c.b16 %v1911_v47, %v1911_v47  ;;  %v9055_v48 = vpack.c.b16 %v1914_v55, %v1914_v55  ;;  %v2184_v51 = vrot.slane %v9041_v12, 1 }
 0x360   :  { %2021 = vrot.lane.b32.xlu1 %v2005_v23, %s7388_s21  ;;  %v2256_v6 = vunpack.c.h.b16 %v1892_v63  ;;  %v9069_v40 = vpack.c.b16 %v1913_v30, %v1913_v30  ;;  %v2010_v25 = vrot.slane %v9041_v12, 2  ;;  %v2305_v38 = vrot.slane %v9033_v7, 3  ;;  %v1893_v20 = vld [vmem:[#allocation2 + $0x1c] sm:$0x77] }
 0x361   :  { %v2303_v31 = vrot.slane %v9045_v2, 3  ;;  %v2183_v9 = vrot.slane %v9051_v37, 1  ;;  %v2073_v19 = vrot.slane %v9051_v37, 7  ;;  %v2009_v35 = vrot.slane %v9051_v37, 2  ;;  %v9104_v44 = vld [vmem:[#allocation2 + $0x24] sm:$0x77] }
 0x362   :  { %v9073_v53 = vpack.c.b16 %v2256_v6, %v2256_v6  ;;  %v2011_v18 = vrot.slane %v9069_v40, 2  ;;  %v2075_v4 = vrot.slane %v9069_v40, 7  ;;  %v2185_v45 = vrot.slane %v9069_v40, 1  ;;  %v1885_v36 = vld [vmem:[#allocation2 + $0x20] sm:$0x77] }
 0x363   :  { %v2012_v22 = vrot.slane %v9055_v48, 2  ;;  %v1948_v42 = vrot.slane %v9069_v40, 5  ;;  %v2260_v61 = vunpack.c.h.b16 %v9104_v44  ;;  %v2074_v23 = vrot.slane %v9041_v12, 7 }
 0x364   :  { %v2306_v24 = vrot.slane %v9073_v53, 3  ;;  %vm2227_vm5 = vcmask 490496   ;;  %v2282_v33 = vrot.slane %v8988_v17, 6  ;;  %v2186_v32 = vrot.slane %v9055_v48, 1 }
 0x365   :  { %2319 = vrot.lane.b32.xlu0 %v2302_v50, %s7378_s0  ;;  %v9116_v50 = vpack.c.b16 %v2260_v61, %v2260_v61  ;;  %v1949_v30 = vrot.slane %v9055_v48, 5 }
 0x366   :  { %2138 = vrot.lane.b32.xlu2 %v9009_v28, %s7384_s17 }
 0x368   :  { %1958 = vrot.lane.b32.xlu1 %v1942_v26, %s7378_s0 }
 0x36d   :  { %2025 = vrot.lane.b32.xlu0 %v2007_v14, %s7388_s21  ;;  %v1886_v14 = vld [vmem:[#allocation2 + $0x28] sm:$0x77] }
 0x36e   :  { %2199 = vrot.lane.b32.xlu2 %v2181_v8, %s7387_s1  ;;  %v1918_v63 = vunpack.c.h.b16 %v1886_v14  ;;  %v1917_v6 = vunpack.c.l.b16 %v1886_v14 }
 0x370   :  { %2091 = vrot.lane.b32.xlu1 %v2072_v15, %s7382_s15  ;;  %v9136_v21 = vpack.c.b16 %v1918_v63, %v1918_v63 }
 0x375   :  { %2195 = vrot.lane.b32.xlu0 %v2179_v54, %s7387_s1 }
 0x376   :  { %2023 = vrot.lane.b32.xlu2 %v2006_v11, %s7388_s21  ;;  %v1946_v11 = vrot.slane %v9051_v37, 5 }
 0x378   :  { %2370 = vrot.lane.b32.xlu1 %v9025_v43, %s7388_s21 }
 0x37d   :  { %1962 = vrot.lane.b32.xlu0 %v1944_v60, %s7378_s0 }
 0x37e   :  { %2089 = vrot.lane.b32.xlu2 %v2071_v39, %s7382_s15  ;;  %v1947_v39 = vrot.slane %v9041_v12, 5 }
 0x380   :  { %2372 = vrot.lane.b32.xlu1 %v9033_v7, %s7388_s21 }
 0x385   :  { %2027 = vrot.lane.b32.xlu0 %v2008_v0, %s7388_s21  ;;  %v9081_v58 = vpop.permute.xlu1 %2134  ;;  %v2258_v0 = vunpack.c.h.b16 %v1893_v20 }
 0x386   :  { %1960 = vrot.lane.b32.xlu2 %v1943_v46, %s7378_s0 }
 0x387   :  { %v9141_v47 = vpack.c.b16 %v2258_v0, %v2258_v0 }
 0x388   :  { %2142 = vrot.lane.b32.xlu1 %v9041_v12, %s7384_s17 }
 0x38d   :  { %2368 = vrot.lane.b32.xlu0 %v9045_v2, %s7388_s21  ;;  %v9094_v41 = vpop.permute.xlu1 %2197 }
 0x38e   :  { %2085 = vrot.lane.b32.xlu2 %v2069_v1, %s7382_s15  ;;  %v2076_v1 = vrot.slane %v9055_v48, 7 }
 0x390   :  { %2140 = vrot.lane.b32.xlu1 %v9051_v37, %s7384_s17 }
 0x395   :  { %2146 = vrot.lane.b32.xlu0 %v9055_v48, %s7384_s17  ;;  %v9109_v10 = vpop.permute.xlu1 %2087 }
 0x396   :  { %2201 = vrot.lane.b32.xlu2 %v2182_v62, %s7387_s1  ;;  %v2308_v62 = vrot.slane %v9141_v47, 3 }
 0x398   :  { %2321 = vrot.lane.b32.xlu1 %v2303_v31, %s7378_s0  ;;  %v1916_v31 = vunpack.c.h.b16 %v1885_v36 }
 0x39d   :  { %2323 = vrot.lane.b32.xlu0 %v2304_v27, %s7378_s0 }
 0x39e   :  { %1964 = vrot.lane.b32.xlu2 %v1945_v52, %s7378_s0 }
 0x3a0   :  { %2205 = vrot.lane.b32.xlu1 %v2184_v51, %s7387_s1  ;;  %v9153_v51 = vpack.c.b16 %v1916_v31, %v1916_v31  ;;  %v2283_v31 = vrot.slane %v9045_v2, 6 }
 0x3a5   :  { %2031 = vrot.lane.b32.xlu0 %v2010_v25, %s7388_s21 }
 0x3a6   :  { %2374 = vrot.lane.b32.xlu2 %v9073_v53, %s7388_s21 }
 0x3a8   :  { %2033 = vrot.lane.b32.xlu1 %v2011_v18, %s7388_s21  ;;  %v2014_v18 = vrot.slane %v9153_v51, 2 }
 0x3ad   :  { %2097 = vrot.lane.b32.xlu0 %v2075_v4, %s7382_s15  ;;  %v2257_v4 = vunpack.c.l.b16 %v1893_v20 }
 0x3ae   :  { %2144 = vrot.lane.b32.xlu2 %v9069_v40, %s7384_s17 }
 0x3b0   :  { %2325 = vrot.lane.b32.xlu1 %v2305_v38, %s7378_s0  ;;  %v9087_v3 = vpop.permute.xlu2 %2366 }
 0x3b5   :  { %2203 = vrot.lane.b32.xlu0 %v2183_v9, %s7387_s1 }
 0x3b6   :  { %2207 = vrot.lane.b32.xlu2 %v2185_v45, %s7387_s1 }
 0x3b8   :  { %2093 = vrot.lane.b32.xlu1 %v2073_v19, %s7382_s15  ;;  %v9097_v49 = vpop.permute.xlu2 %2136 }
 0x3b9   :  { %v2165_v45 = vsel %vm1012_vm2, %v9081_v58, %v9097_v49 }
 0x3bd   :  { %2029 = vrot.lane.b32.xlu0 %v2009_v35, %s7388_s21 }
 0x3be   :  { %2327 = vrot.lane.b32.xlu2 %v2306_v24, %s7378_s0  ;;  %v2259_v24 = vunpack.c.l.b16 %v9104_v44 }
 0x3c0   :  { %2035 = vrot.lane.b32.xlu1 %v2012_v22, %s7388_s21  ;;  %v9107_v13 = vpop.permute.xlu2 %2138 }
 0x3c5   :  { %1970 = vrot.lane.b32.xlu0 %v1948_v42, %s7378_s0  ;;  %v9178_v42 = vpack.c.b16 %v1917_v6, %v1917_v6 }
 0x3c6   :  { %2095 = vrot.lane.b32.xlu2 %v2074_v23, %s7382_s15  ;;  %v9182_v23 = vpack.c.b16 %v2257_v4, %v2257_v4 }
 0x3c7   :  { %v2365_v56 = vpop.permute.xlu0 %2364  ;;  %v2079_v14 = vrot.slane %v9178_v42, 7 }
 0x3c8   :  { %v2396_v26 = vsel %vm2053_vm0, %v2365_v56, %v9087_v3  ;;  %v9121_v15 = vpop.permute.xlu2 %2199  ;;  %2382 = vrot.lane.b32.xlu1 %v9116_v50, %s7388_s21 }
 0x3c9   :  { %v2707_v8 = vsel %vm1208_vm11, %v2396_v26, 0  ;;  %v2229_v54 = vsel %vm2227_vm5, %v9094_v41, %v9121_v15  ;;  %v9189_v26 = vpack.c.b16 %v2259_v24, %v2259_v24  ;;  %v2166_v24 = vsel %vm1012_vm2, %v9097_v49, %v9107_v13 }
 0x3ca   :  { %2755 = vmatpush.bf16.msrb.mxu1 %v2707_v8  ;;  %v2318_v5 = vpop.permute.xlu1 %2317  ;;  %v9131_v60 = vsel %vm1119_vm6, %v2229_v54, %v2282_v33  ;;  %v2281_v8 = vrot.slane %v8977_v59, 6  ;;  %v1915_v33 = vunpack.c.l.b16 %v1885_v36 }
 0x3cd   :  { %1966 = vrot.lane.b32.xlu0 %v1946_v11, %s7378_s0 }
 0x3ce   :  { %1968 = vrot.lane.b32.xlu2 %v1947_v39, %s7378_s0 }
 0x3cf   :  { %v2133_v17 = vpop.permute.xlu0 %2132 }
 0x3d0   :  { %v2024_v29 = vpop.permute.xlu2 %2023  ;;  %2154 = vrot.lane.b32.xlu1 %v9136_v21, %s7384_s17  ;;  %v2164_v59 = vsel %vm1012_vm2, %v2133_v17, %v9081_v58 }
 0x3d2   :  { %v2022_v46 = vpop.permute.xlu1 %2021 }
 0x3d3   :  { %v2054_v39 = vsel %vm2053_vm0, %v2022_v46, %v2024_v29 }
 0x3d5   :  { %2209 = vrot.lane.b32.xlu0 %v2186_v32, %s7387_s1 }
 0x3d6   :  { %2099 = vrot.lane.b32.xlu2 %v2076_v1, %s7382_s15 }
 0x3d7   :  { %v9146_v55 = vpop.permute.xlu0 %2319 }
 0x3d8   :  { %v9149_v27 = vpop.permute.xlu2 %2089  ;;  %2331 = vrot.lane.b32.xlu1 %v2308_v62, %s7378_s0 }
 0x3d9   :  { %v2118_v38 = vsel %vm772_vm13, %v9109_v10, %v9149_v27 }
 0x3da   :  { %v1959_v52 = vpop.permute.xlu1 %1958 }
 0x3dd   :  { %1972 = vrot.lane.b32.xlu0 %v1949_v30, %s7378_s0 }
 0x3de   :  { %2378 = vrot.lane.b32.xlu2 %v9141_v47, %s7388_s21 }
 0x3df   :  { %v9158_v25 = vpop.permute.xlu0 %2025 }
 0x3e0   :  { %v9166_v9 = vsel %vm2053_vm0, %v2024_v29, %v9158_v25  ;;  %v9173_v35 = vpop.permute.xlu2 %1960  ;;  %2039 = vrot.lane.b32.xlu1 %v2014_v18, %s7388_s21  ;;  %v2307_v18 = vrot.slane %v9182_v23, 3 }
 0x3e1   :  { %v2505_v19 = vsel %vm11380_vm1, %v9166_v9, %v2118_v38  ;;  %v1990_v1 = vsel %vm11384_vm9, %v1959_v52, %v9173_v35  ;;  %vm11387_vm1 = vmmov %vm11372_vm4 }
 0x3e2   :  { %v2535_v22 = vsel %vm11372_vm4, %v2505_v19, %v2165_v45  ;;  %v9180_v61 = vpop.permute.xlu1 %2091  ;;  %v2413_v29 = vsel %vm1208_vm11, %v8997_v16, %v1990_v1  ;;  %vm11388_vm4 = vmmov %vm11384_vm9 }
 0x3e3   :  { %v9185_v56 = vsel %vm2562_vm12, %v2535_v22, %v2229_v54  ;;  %v2349_v54 = vsel %vm11381_vm14, %v2318_v5, %v9146_v55  ;;  %v9208_v5 = vpack.c.b16 %v1915_v33, %v1915_v33  ;;  %v2458_v30 = vsel %vm2456_vm10, %v2413_v29, %v2054_v39  ;;  %vm11389_vm14 = vmmov %vm11382_vm15 }
 0x3e4   :  { %v2119_v45 = vsel %vm772_vm13, %v9149_v27, %v9180_v61  ;;  %v2189_v27 = vrot.slane %v9178_v42, 1  ;;  %v2188_v33 = vrot.slane %v9153_v51, 1  ;;  %vm11392_vm9 = vmmov %vm11389_vm14 }
 0x3e5   :  { %2376 = vrot.lane.b32.xlu0 %v9182_v23, %s7388_s21  ;;  %v2187_v17 = vrot.slane %v9208_v5, 1 }
 0x3e6   :  { %2380 = vrot.lane.b32.xlu2 %v9189_v26, %s7388_s21 }
 0x3e7   :  { %v2196_v44 = vpop.permute.xlu0 %2195 }
 0x3e8   :  { %v2228_v11 = vsel %vm2227_vm5, %v2196_v44, %v9094_v41  ;;  %v2086_v63 = vpop.permute.xlu2 %2085  ;;  %2105 = vrot.lane.b32.xlu1 %v2079_v14, %s7382_s15 }
 0x3e9   :  { %v2609_v20 = vsel %vm1119_vm6, %v2228_v11, %v2281_v8  ;;  %v2117_v0 = vsel %vm772_vm13, %v2086_v63, %v9109_v10 }
 0x3ea   :  { %v2639_v32 = vsel %vm11382_vm15, %v2609_v20, %v2349_v54  ;;  %v2503_v41 = vsel %vm11383_vm3, %v2054_v39, %v2117_v0  ;;  %v2371_v36 = vpop.permute.xlu1 %2370  ;;  %vm11390_vm15 = vmmov %vm11388_vm4 }
 0x3eb   :  { %2756 = vmatpush.bf16.msrb.mxu1 %v2639_v32  ;;  %v2533_v62 = vsel %vm11385_vm8, %v2503_v41, %v2164_v59  ;;  %vm11391_vm3 = vmmov %vm11388_vm4 }
 0x3ec   :  { %v2564_v10 = vsel %vm2562_vm12, %v2533_v62, %v2228_v11  ;;  %v1952_v11 = vrot.slane %v9178_v42, 5  ;;  %v1950_v62 = vrot.slane %v9208_v5, 5  ;;  %vm11393_vm8 = vmmov %vm11391_vm3 }
 0x3ed   :  { %2152 = vrot.lane.b32.xlu0 %v9178_v42, %s7384_s17 }
 0x3ee   :  { %2150 = vrot.lane.b32.xlu2 %v9153_v51, %s7384_s17 }
 0x3ef   :  { %v9218_v58 = vpop.permute.xlu0 %1962  ;;  %2757 = vmatpush.bf16.msrb.mxu1 %v2564_v10 }
 0x3f0   :  { %v9223_v46 = vpop.permute.xlu2 %2201  ;;  %2211 = vrot.lane.b32.xlu1 %v2187_v17, %s7387_s1 }
 0x3f1   :  { %v2230_v52 = vsel %vm2227_vm5, %v9121_v15, %v9223_v46  ;;  %v2013_v15 = vrot.slane %v9208_v5, 2 }
 0x3f2   :  { %v2373_v6 = vpop.permute.xlu1 %2372  ;;  %v2613_v4 = vsel %vm1119_vm6, %v2230_v52, %v2283_v31  ;;  %v2078_v31 = vrot.slane %v9153_v51, 7 }
 0x3f3   :  { %2758 = vmatpush.bf16.msrb.mxu1 %v2458_v30  ;;  %v2399_v16 = vsel %vm2053_vm0, %v2371_v36, %v2373_v6 }
 0x3f4   :  { %v2716_v38 = vsel %vm1208_vm11, %v2399_v16, 0 }
 0x3f5   :  { %2329 = vrot.lane.b32.xlu0 %v2307_v18, %s7378_s0  ;;  %2797 = vmatpush.bf16.msra.mxu0 %v2716_v38  ;;  %v1991_v18 = vsel %vm11390_vm15, %v9173_v35, %v9218_v58  ;;  %v2190_v38 = vrot.slane %v9136_v21, 1  ;;  %vm11396_vm15 = vmmov %vm11391_vm3 }
 0x3f6   :  { %2148 = vrot.lane.b32.xlu2 %v9208_v5, %s7384_s17  ;;  %v2416_v35 = vsel %vm1208_vm11, %v8949_v57, %v1991_v18 }
 0x3f7   :  { %v9238_v2 = vpop.permute.xlu0 %2027 }
 0x3f8   :  { %v9247_v19 = vsel %vm2053_vm0, %v9158_v25, %v9238_v2  ;;  %v9254_v44 = vpop.permute.xlu2 %1964  ;;  %2037 = vrot.lane.b32.xlu1 %v2013_v15, %s7388_s21 }
 0x3f9   :  { %v2507_v22 = vsel %vm11386_vm7, %v9247_v19, %v2119_v45  ;;  %v1992_v45 = vsel %vm11393_vm8, %v9218_v58, %v9254_v44  ;;  %vm11399_vm8 = vmmov %vm11386_vm7 }
 0x3fa   :  { %v2537_v14 = vsel %vm11387_vm1, %v2507_v22, %v2166_v24  ;;  %v9258_v8 = vpop.permute.xlu1 %2142  ;;  %v1951_v22 = vrot.slane %v9153_v51, 5  ;;  %v2419_v57 = vsel %vm1208_vm11, %v9001_v34, %v1992_v45  ;;  %v2080_v34 = vrot.slane %v9136_v21, 7 }
 0x3fb   :  { %v2570_v25 = vsel %vm2562_vm12, %v2537_v14, %v2230_v52  ;;  %vm2702_vm1 = vcmask 441344   ;;  %v2284_v45 = vrot.slane %v9025_v43, 6 }
 0x3fd   :  { %2215 = vrot.lane.b32.xlu0 %v2189_v27, %s7387_s1  ;;  %v1953_v27 = vrot.slane %v9136_v21, 5 }
 0x3fe   :  { %2213 = vrot.lane.b32.xlu2 %v2188_v33, %s7387_s1  ;;  %v9333_v33 = vld [vmem:[#allocation2 + $0x38] sm:$0x77] }
 0x3ff   :  { %v2369_v49 = vpop.permute.xlu0 %2368 }
 0x400   :  { %v2397_v54 = vsel %vm2053_vm0, %v9087_v3, %v2369_v49  ;;  %v2398_v63 = vsel %vm2053_vm0, %v2369_v49, %v2371_v36  ;;  %v9271_v0 = vpop.permute.xlu2 %2374  ;;  %1978 = vrot.lane.b32.xlu1 %v1952_v11, %s7378_s0  ;;  %v2310_v3 = vrot.slane %v9116_v50, 3  ;;  %v2015_v36 = vrot.slane %v9178_v42, 2 }
 0x401   :  { %v2710_v20 = vsel %vm1208_vm11, %v2397_v54, 0  ;;  %v2713_v39 = vsel %vm1208_vm11, %v2398_v63, 0  ;;  %v2400_v32 = vsel %vm2053_vm0, %v2373_v6, %v9271_v0  ;;  %v2309_v6 = vrot.slane %v9189_v26, 3  ;;  %v1895_v63 = vld [vmem:[#allocation2 + $0x2c] sm:$0x77] }
 0x402   :  { %2769 = vmatpush.bf16.msrb.mxu2 %v2710_v20  ;;  %2783 = vmatpush.bf16.msrb.mxu3 %v2713_v39  ;;  %v2719_v59 = vsel %vm1208_vm11, %v2400_v32, 0  ;;  %v9277_v41 = vpop.permute.xlu1 %2140  ;;  %v1938_v11 = vunpack.c.l.b16 %v9333_v33  ;;  %v2016_v20 = vrot.slane %v9136_v21, 2  ;;  %v2262_v32 = vunpack.c.h.b16 %v1895_v63 }
 0x403   :  { %2811 = vmatpush.bf16.msra.mxu1 %v2719_v59  ;;  %v1898_v59 = vld [vmem:[#allocation2 + $0x3c] sm:$0x77] }
 0x404   :  { %v9354_v39 = vpack.c.b16 %v1938_v11, %v1938_v11 }
 0x405   :  { %2335 = vrot.lane.b32.xlu0 %v2310_v3, %s7378_s0 }
 0x406   :  { %2041 = vrot.lane.b32.xlu2 %v2015_v36, %s7388_s21  ;;  %v2261_v36 = vunpack.c.l.b16 %v1895_v63 }
 0x407   :  { %v9283_v1 = vpop.permute.xlu0 %2146 }
 0x408   :  { %v9286_v10 = vpop.permute.xlu2 %2144  ;;  %1974 = vrot.lane.b32.xlu1 %v1950_v62, %s7378_s0 }
 0x409   :  { %v2169_v17 = vsel %vm1012_vm2, %v9258_v8, %v9286_v10 }
 0x40a   :  { %v2322_v29 = vpop.permute.xlu1 %2321 }
 0x40b   :  { %v2350_v52 = vsel %vm11388_vm4, %v9146_v55, %v2322_v29  ;;  %vm11394_vm4 = vcmask 1043456  }
 0x40c   :  { %v2642_v30 = vsel %vm11389_vm14, %v9131_v60, %v2350_v52  ;;  %v9362_v52 = vpack.c.b16 %v2262_v32, %v2262_v32  ;;  %vm11395_vm14 = vmmov %vm11391_vm3 }
 0x40d   :  { %2103 = vrot.lane.b32.xlu0 %v2078_v31, %s7382_s15  ;;  %2770 = vmatpush.bf16.msrb.mxu2 %v2642_v30  ;;  %v2298_v30 = vunpack.c.h.b16 %v1898_v59 }
 0x40e   :  { %2333 = vrot.lane.b32.xlu2 %v2309_v6, %s7378_s0  ;;  %v9367_v6 = vld [vmem:[%s11143_s3] sm:$0xff] }
 0x40f   :  { %v9303_v16 = vpop.permute.xlu0 %2323  ;;  %5639 = vmatmul.msk.bf16.vlgmr.msrb.gmra.mxu1 %vm2702_vm1, %v9367_v6 }
 0x410   :  { %v2351_v55 = vsel %vm11391_vm3, %v2322_v29, %v9303_v16  ;;  %v9308_v15 = vpop.permute.xlu2 %2207  ;;  %2217 = vrot.lane.b32.xlu1 %v2190_v38, %s7387_s1  ;;  %v9372_v38 = vpack.c.b16 %v2261_v36, %v2261_v36  ;;  %vm11397_vm3 = vmmov %vm11392_vm9 }
 0x411   :  { %v2645_v60 = vsel %vm11392_vm9, %v2613_v4, %v2351_v55  ;;  %2771 = vmatpush.bf16.msrb.mxu2 %v9185_v56  ;;  %v2461_v4 = vsel %vm2456_vm10, %v2416_v35, %v9166_v9  ;;  %v2077_v56 = vrot.slane %v9208_v5, 7  ;;  %v2464_v9 = vsel %vm2456_vm10, %v2419_v57, %v9247_v19  ;;  %v1896_v55 = vld [vmem:[#allocation2 + $0x34] sm:$0x77]  ;;  %vm11398_vm9 = vmmov %vm11397_vm3 }
 0x412   :  { %2784 = vmatpush.bf16.msrb.mxu3 %v2645_v60  ;;  %v2206_v24 = vpop.permute.xlu1 %2205  ;;  %v9386_v35 = vpack.c.b16 %v2298_v30, %v2298_v30  ;;  %v2263_v36 = vunpack.c.l.b16 %v1896_v55 }
 0x413   :  { %v9321_v14 = vsel %vm2227_vm5, %v2206_v24, %v9308_v15 }
 0x415   :  { %1976 = vrot.lane.b32.xlu0 %v1951_v22, %s7378_s0  ;;  %2772 = vmatpush.bf16.msrb.mxu2 %v2461_v4  ;;  %v2285_v22 = vrot.slane %v9033_v7, 6  ;;  %v2297_v4 = vunpack.c.l.b16 %v1898_v59  ;;  %v2311_v59 = vrot.slane %v9372_v38, 3 }
 0x416   :  { %2785 = vmatpush.bf16.msrb.mxu3 %v2570_v25  ;;  %2101 = vrot.lane.b32.xlu2 %v2077_v56, %s7382_s15 }
 0x417   :  { %v9330_v58 = vpop.permute.xlu0 %2031 }
 0x418   :  { %v9335_v49 = vpop.permute.xlu2 %2327  ;;  %1980 = vrot.lane.b32.xlu1 %v1953_v27, %s7378_s0  ;;  %5640 = vmatmul.msk.bf16.vlgmr.msrb.gmra.mxu2 %vm2702_vm1, %v9367_v6  ;;  %v2264_v27 = vunpack.c.h.b16 %v1896_v55 }
 0x41a   :  { %2786 = vmatpush.bf16.msrb.mxu3 %v2464_v9  ;;  %v9340_v25 = vpop.permute.xlu1 %2033 }
 0x41b   :  { %v9347_v54 = vsel %vm2053_vm0, %v9330_v58, %v9340_v25 }
 0x41d   :  { %2107 = vrot.lane.b32.xlu0 %v2080_v34, %s7382_s15  ;;  %5641 = vmatmul.msk.bf16.vlgmr.msrb.gmra.mxu3 %vm2702_vm1, %v9367_v6 }
 0x41e   :  { %2043 = vrot.lane.b32.xlu2 %v2016_v20, %s7388_s21  ;;  %v2299_v20 = vpack.c.b16 %v2297_v4, %v2297_v4  ;;  %v9433_v4 = vpack.c.b16 %v2263_v36, %v2263_v36 }
 0x41f   :  { %v9352_v19 = vpop.permute.xlu0 %2097 }
 0x420   :  { %v2096_v3 = vpop.permute.xlu2 %2095  ;;  %2160 = vrot.lane.b32.xlu1 %v9354_v39, %s7384_s17 }
 0x421   :  { %v2122_v62 = vsel %vm772_vm13, %v2096_v3, %v9352_v19 }
 0x422   :  { %v2513_v29 = vsel %vm11386_vm7, %v9347_v54, %v2122_v62  ;;  %v2326_v31 = vpop.permute.xlu1 %2325 }
 0x423   :  { %v2543_v18 = vsel %vm11394_vm4, %v2513_v29, %v2169_v17  ;;  %v2352_v9 = vsel %vm11395_vm14, %v9303_v16, %v2326_v31  ;;  %v2353_v34 = vsel %vm11396_vm15, %v2326_v31, %v9335_v49  ;;  %v9404_v16 = vpack.c.b16 %v2264_v27, %v2264_v27  ;;  %vm11400_vm14 = vmmov %vm11394_vm4  ;;  %v1887_v27 = vld [vmem:[#allocation2 + $0x30] sm:$0x77] }
 0x424   :  { %v9378_v60 = vsel %vm2562_vm12, %v2543_v18, %v9321_v14  ;;  %v2167_v18 = vsel %vm1012_vm2, %v9107_v13, %v9277_v41  ;;  %vm11401_vm15 = vmmov %vm11386_vm7 }
 0x425   :  { %2386 = vrot.lane.b32.xlu0 %v9362_v52, %s7388_s21 }
 0x426   :  { %2384 = vrot.lane.b32.xlu2 %v9372_v38, %s7388_s21 }
 0x427   :  { %v2204_v17 = vpop.permute.xlu0 %2203 }
 0x428   :  { %v2231_v56 = vsel %vm2227_vm5, %v9223_v46, %v2204_v17  ;;  %v2232_v57 = vsel %vm2227_vm5, %v2204_v17, %v2206_v24  ;;  %v1969_v11 = vpop.permute.xlu2 %1968  ;;  %2394 = vrot.lane.b32.xlu1 %v9386_v35, %s7388_s21  ;;  %v2168_v17 = vsel %vm1012_vm2, %v9277_v41, %v9258_v8 }
 0x429   :  { %v2615_v43 = vsel %vm1119_vm6, %v2231_v56, %v2284_v45  ;;  %v2617_v7 = vsel %vm1119_vm6, %v2232_v57, %v2285_v22 }
 0x42a   :  { %v2648_v63 = vsel %vm11397_vm3, %v2615_v43, %v2352_v9  ;;  %v2651_v46 = vsel %vm11398_vm9, %v2617_v7, %v2353_v34  ;;  %v2094_v24 = vpop.permute.xlu1 %2093  ;;  %vm11402_vm3 = vmmov %vm11394_vm4  ;;  %v2193_v34 = vrot.slane %v9354_v39, 1  ;;  %v1920_v43 = vunpack.c.h.b16 %v1887_v27 }
 0x42b   :  { %2798 = vmatpush.bf16.msra.mxu0 %v2648_v63  ;;  %2812 = vmatpush.bf16.msra.mxu1 %v2651_v46  ;;  %v2120_v62 = vsel %vm772_vm13, %v9180_v61, %v2094_v24  ;;  %v2121_v29 = vsel %vm772_vm13, %v2094_v24, %v2096_v3  ;;  %vm11403_vm9 = vcmask 1031168  }
 0x42d   :  { %2392 = vrot.lane.b32.xlu0 %v2299_v20, %s7388_s21 }
 0x42e   :  { %2390 = vrot.lane.b32.xlu2 %v9404_v16, %s7388_s21 }
 0x42f   :  { %v2030_v32 = vpop.permute.xlu0 %2029 }
 0x430   :  { %v2057_v31 = vsel %vm2053_vm0, %v9238_v2, %v2030_v32  ;;  %v2058_v30 = vsel %vm2053_vm0, %v2030_v32, %v9330_v58  ;;  %v9424_v45 = vpop.permute.xlu2 %2099  ;;  %2337 = vrot.lane.b32.xlu1 %v2311_v59, %s7378_s0  ;;  %v9467_v32 = vpack.c.b16 %v1920_v43, %v1920_v43  ;;  %v2315_v59 = vrot.slane %v2299_v20, 3 }
 0x431   :  { %v2509_v55 = vsel %vm11399_vm8, %v2057_v31, %v2120_v62  ;;  %v2511_v61 = vsel %vm11386_vm7, %v2058_v30, %v2121_v29  ;;  %v2123_v8 = vsel %vm772_vm13, %v9352_v19, %v9424_v45  ;;  %v2312_v19 = vrot.slane %v9362_v52, 3  ;;  %vm11404_vm8 = vmmov %vm11403_vm9 }
 0x432   :  { %v2539_v2 = vsel %vm11394_vm4, %v2509_v55, %v2167_v18  ;;  %v2541_v58 = vsel %vm11400_vm14, %v2511_v61, %v2168_v17  ;;  %v9429_v3 = vpop.permute.xlu1 %2035  ;;  %v2314_v62 = vrot.slane %v9404_v16, 3  ;;  %v1919_v29 = vunpack.c.l.b16 %v1887_v27  ;;  %vm11405_vm7 = vmmov %vm11404_vm8 }
 0x433   :  { %v2573_v13 = vsel %vm2562_vm12, %v2539_v2, %v2231_v56  ;;  %v2576_v22 = vsel %vm2562_vm12, %v2541_v58, %v2232_v57  ;;  %v9441_v41 = vsel %vm2053_vm0, %v9340_v25, %v9429_v3  ;;  %v2170_v56 = vsel %vm1012_vm2, %v9286_v10, %v9283_v1  ;;  %vm11406_vm4 = vmmov %vm11405_vm7 }
 0x434   :  { %2799 = vmatpush.bf16.msra.mxu0 %v2573_v13  ;;  %2813 = vmatpush.bf16.msra.mxu1 %v2576_v22  ;;  %v2515_v57 = vsel %vm11401_vm15, %v9441_v41, %v2123_v8  ;;  %vm11407_vm14 = vmmov %vm11406_vm4  ;;  %vm11408_vm15 = vcmask 1044480  }
 0x435   :  { %2388 = vrot.lane.b32.xlu0 %v9433_v4, %s7388_s21  ;;  %v2545_v9 = vsel %vm11402_vm3, %v2515_v57, %v2170_v56  ;;  %v2192_v57 = vrot.slane %v9467_v32, 1  ;;  %vm11409_vm3 = vmmov %vm11408_vm15 }
 0x436   :  { %2339 = vrot.lane.b32.xlu2 %v2312_v19, %s7378_s0  ;;  %v2083_v19 = vrot.slane %v9354_v39, 7 }
 0x437   :  { %v9453_v25 = vpop.permute.xlu0 %1970 }
 0x438   :  { %v1995_v10 = vsel %vm11403_vm9, %v1969_v11, %v9453_v25  ;;  %v2379_v7 = vpop.permute.xlu2 %2378  ;;  %2223 = vrot.lane.b32.xlu1 %v2193_v34, %s7387_s1  ;;  %vm11410_vm9 = vmmov %vm11406_vm4 }
 0x439   :  { %v2428_v63 = vsel %vm1208_vm11, %v9041_v12, %v1995_v10 }
 0x43a   :  { %v9463_v46 = vsel %vm2456_vm10, %v2428_v63, %v9347_v54  ;;  %v9465_v24 = vpop.permute.xlu1 %2382 }
 0x43d   :  { %2158 = vrot.lane.b32.xlu0 %v9467_v32, %s7384_s17 }
 0x43e   :  { %2345 = vrot.lane.b32.xlu2 %v2315_v59, %s7378_s0 }
 0x43f   :  { %v1967_v36 = vpop.permute.xlu0 %1966 }
 0x440   :  { %v1993_v12 = vsel %vm11404_vm8, %v9254_v44, %v1967_v36  ;;  %v1994_v54 = vsel %vm11405_vm7, %v1967_v36, %v1969_v11  ;;  %v2381_v18 = vpop.permute.xlu2 %2380  ;;  %2343 = vrot.lane.b32.xlu1 %v2314_v62, %s7378_s0  ;;  %v2316_v36 = vrot.slane %v9386_v35, 3  ;;  %v1939_v35 = vunpack.c.h.b16 %v9333_v33  ;;  %vm11411_vm8 = vmmov %vm11406_vm4 }
 0x441   :  { %v2422_v17 = vsel %vm1208_vm11, %v9009_v28, %v1993_v12  ;;  %v2425_v20 = vsel %vm1208_vm11, %v9051_v37, %v1994_v54  ;;  %v2403_v55 = vsel %vm2053_vm0, %v2379_v7, %v2381_v18  ;;  %v2404_v61 = vsel %vm2053_vm0, %v2381_v18, %v9465_v24  ;;  %vm11412_vm7 = vmmov %vm11409_vm3 }
 0x442   :  { %v2467_v2 = vsel %vm2456_vm10, %v2422_v17, %v2057_v31  ;;  %v2470_v44 = vsel %vm2456_vm10, %v2425_v20, %v2058_v30  ;;  %v2728_v11 = vsel %vm1208_vm11, %v2403_v55, 0  ;;  %v2731_v58 = vsel %vm1208_vm11, %v2404_v61, 0  ;;  %v9488_v13 = vpop.permute.xlu1 %2154 }
 0x443   :  { %2800 = vmatpush.bf16.msra.mxu0 %v2467_v2  ;;  %2814 = vmatpush.bf16.msra.mxu1 %v2470_v44  ;;  %v9490_v28 = vpack.c.b16 %v1919_v29, %v1919_v29  ;;  %v2018_v37 = vrot.slane %v9467_v32, 2  ;;  %v2082_v30 = vrot.slane %v9467_v32, 7  ;;  %v2313_v20 = vrot.slane %v9433_v4, 3 }
 0x444   :  { %v9543_v55 = vpack.c.b16 %v1939_v35, %v1939_v35 }
 0x445   :  { %2156 = vrot.lane.b32.xlu0 %v9490_v28, %s7384_s17  ;;  %v2191_v63 = vrot.slane %v9490_v28, 1 }
 0x446   :  { %5642 = vmatmul.msk.bf16.vlgmr.msra.gmra.mxu0 %vm2702_vm1, %v9367_v6  ;;  %5643 = vmatmul.msk.bf16.vlgmr.msra.gmra.mxu1 %vm2702_vm1, %v9367_v6 }
 0x447   :  { %2853 = vmatpush.bf16.msrb.mxu0 %v2728_v11  ;;  %2867 = vmatpush.bf16.msrb.mxu1 %v2731_v58  ;;  %v2210_v31 = vpop.permute.xlu0 %2209  ;;  %v2081_v11 = vrot.slane %v9490_v28, 7  ;;  %v1956_v58 = vrot.slane %v9354_v39, 5 }
 0x448   :  { %2047 = vrot.lane.b32.xlu2 %v2018_v37, %s7388_s21  ;;  %v2234_v22 = vsel %vm2227_vm5, %v9308_v15, %v2210_v31  ;;  %v9503_v8 = vpop.permute.xlu2 %2150  ;;  %2111 = vrot.lane.b32.xlu1 %v2082_v30, %s7382_s15  ;;  %v1955_v15 = vrot.slane %v9467_v32, 5  ;;  %v2686_v37 = vld [vmem:[%s11144_s4 + $0x8] sm:$0xff]  ;;  %v2286_v30 = vrot.slane %v9073_v53, 6 }
 0x449   :  { %v9507_v27 = vsel %vm2562_vm12, %v2545_v9, %v2234_v22  ;;  %v2019_v9 = vrot.slane %v9354_v39, 2 }
 0x44a   :  { %v2332_v56 = vpop.permute.xlu1 %2331 }
 0x44d   :  { %2221 = vrot.lane.b32.xlu0 %v2192_v57, %s7387_s1  ;;  %v2287_v57 = vrot.slane %v9182_v23, 6 }
 0x44f   :  { %v9513_v34 = vpop.permute.xlu0 %1972 }
 0x450   :  { %2113 = vrot.lane.b32.xlu2 %v2083_v19, %s7382_s15  ;;  %v9516_v43 = vpop.permute.xlu2 %2148  ;;  %1984 = vrot.lane.b32.xlu1 %v1955_v15, %s7378_s0 }
 0x452   :  { %v9519_v10 = vpop.permute.xlu1 %2039 }
 0x455   :  { %2049 = vrot.lane.b32.xlu0 %v2019_v9, %s7388_s21  ;;  %v2288_v9 = vrot.slane %v9141_v47, 6 }
 0x457   :  { %v2377_v59 = vpop.permute.xlu0 %2376 }
 0x458   :  { %2219 = vrot.lane.b32.xlu2 %v2191_v63, %s7387_s1  ;;  %v2401_v62 = vsel %vm2053_vm0, %v9271_v0, %v2377_v59  ;;  %v2402_v29 = vsel %vm2053_vm0, %v2377_v59, %v2379_v7  ;;  %v9531_v18 = vpop.permute.xlu2 %2213  ;;  %2347 = vrot.lane.b32.xlu1 %v2316_v36, %s7378_s0  ;;  %v2017_v0 = vrot.slane %v9490_v28, 2  ;;  %v2619_v59 = vsel %vm1119_vm6, %v9321_v14, %v2286_v30 }
 0x459   :  { %v2722_v12 = vsel %vm1208_vm11, %v2401_v62, 0  ;;  %v2725_v54 = vsel %vm1208_vm11, %v2402_v29, 0  ;;  %v2621_v36 = vsel %vm1119_vm6, %v2234_v22, %v2287_v57  ;;  %v2194_v22 = vrot.slane %v9543_v55, 1 }
 0x45a   :  { %2825 = vmatpush.bf16.msra.mxu2 %v2722_v12  ;;  %2839 = vmatpush.bf16.msra.mxu3 %v2725_v54  ;;  %v9534_v17 = vpop.permute.xlu1 %2105  ;;  %v1954_v12 = vrot.slane %v9490_v28, 5 }
 0x45d   :  { %2341 = vrot.lane.b32.xlu0 %v2313_v20, %s7378_s0 }
 0x45f   :  { %v9541_v7 = vpop.permute.xlu0 %2152 }
 0x460   :  { %2045 = vrot.lane.b32.xlu2 %v2017_v0, %s7388_s21  ;;  %v9548_v61 = vsel %vm1012_vm2, %v9503_v8, %v9541_v7  ;;  %v9550_v2 = vpop.permute.xlu2 %2041  ;;  %2162 = vrot.lane.b32.xlu1 %v9543_v55, %s7384_s17 }
 0x461   :  { %v9557_v33 = vsel %vm2053_vm0, %v9519_v10, %v9550_v2 }
 0x462   :  { %v2212_v44 = vpop.permute.xlu1 %2211 }
 0x463   :  { %v2235_v19 = vsel %vm2227_vm5, %v2210_v31, %v2212_v44 }
 0x464   :  { %v2623_v47 = vsel %vm1119_vm6, %v2235_v19, %v2288_v9  ;;  %v1957_v9 = vrot.slane %v9543_v55, 5 }
 0x465   :  { %2109 = vrot.lane.b32.xlu0 %v2081_v11, %s7382_s15 }
 0x467   :  { %v2330_v15 = vpop.permute.xlu0 %2329 }
 0x468   :  { %1986 = vrot.lane.b32.xlu2 %v1956_v58, %s7378_s0  ;;  %v2354_v63 = vsel %vm11406_vm4, %v9335_v49, %v2330_v15  ;;  %v2355_v39 = vsel %vm11407_vm14, %v2330_v15, %v2332_v56  ;;  %v2334_v53 = vpop.permute.xlu2 %2333  ;;  %2694 = vperm.xlu1 %7197, %v2686_v37   ;;  %v1996_v49 = vsel %vm11411_vm8, %v9453_v25, %v9513_v34  ;;  %vm11413_vm4 = vcmask 1040384   ;;  %v2685_v15 = vld [vmem:[%s11144_s4] sm:$0xff] }
 0x469   :  { %v2654_v23 = vsel %vm11408_vm15, %v2619_v59, %v2354_v63  ;;  %v2657_v31 = vsel %vm11409_vm3, %v2621_v36, %v2355_v39  ;;  %v2356_v62 = vsel %vm11410_vm9, %v2332_v56, %v2334_v53  ;;  %v2431_v56 = vsel %vm1208_vm11, %v9069_v40, %v1996_v49  ;;  %vm11415_vm15 = vmmov %vm11411_vm8 }
 0x46a   :  { %2826 = vmatpush.bf16.msra.mxu2 %v2654_v23  ;;  %2840 = vmatpush.bf16.msra.mxu3 %v2657_v31  ;;  %v2038_v29 = vpop.permute.xlu1 %2037  ;;  %v2660_v14 = vsel %vm11412_vm7, %v2623_v47, %v2356_v62  ;;  %v2476_v20 = vsel %vm2456_vm10, %v2431_v56, %v9441_v41  ;;  %v2171_v40 = vsel %vm1012_vm2, %v9283_v1, %v9516_v43  ;;  %vm11414_vm14 = vcmask 1043456   ;;  %vm11416_vm9 = vmmov %vm11411_vm8 }
 0x46b   :  { %2854 = vmatpush.bf16.msrb.mxu0 %v2660_v14  ;;  %v2061_v35 = vsel %vm2053_vm0, %v9429_v3, %v2038_v29  ;;  %v2084_v41 = vrot.slane %v9543_v55, 7  ;;  %v2236_v3 = vsel %vm2227_vm5, %v2212_v44, %v9531_v18  ;;  %v2020_v1 = vrot.slane %v9543_v55, 2  ;;  %vm11417_vm8 = vmmov %vm11413_vm4 }
 0x46c   :  { %v2062_v36 = vsel %vm2053_vm0, %v2038_v29, %v9519_v10  ;;  %v2172_v55 = vsel %vm1012_vm2, %v9516_v43, %v9503_v8  ;;  %vm11418_vm7 = vmmov %vm11413_vm4 }
 0x46d   :  { %2225 = vrot.lane.b32.xlu0 %v2194_v22, %s7387_s1 }
 0x46e   :  { %2827 = vmatpush.bf16.msra.mxu2 %v9378_v60  ;;  %2841 = vmatpush.bf16.msra.mxu3 %v9507_v27 }
 0x46f   :  { %v9592_v25 = vpop.permute.xlu0 %2215 }
 0x470   :  { %1982 = vrot.lane.b32.xlu2 %v1954_v12, %s7378_s0  ;;  %v2102_v54 = vpop.permute.xlu2 %2101  ;;  %v2237_v62 = vsel %vm2227_vm5, %v9531_v18, %v9592_v25 }
 0x471   :  { %v2124_v0 = vsel %vm772_vm13, %v9424_v45, %v2102_v54 }
 0x472   :  { %2828 = vmatpush.bf16.msra.mxu2 %v9463_v46  ;;  %2842 = vmatpush.bf16.msra.mxu3 %v2476_v20  ;;  %v2517_v60 = vsel %vm11413_vm4, %v2061_v35, %v2124_v0  ;;  %v9605_v27 = vpop.permute.xlu1 %1978  ;;  %v2289_v46 = vrot.slane %v9189_v26, 6  ;;  %vm11419_vm4 = vmmov %vm11414_vm14 }
 0x473   :  { %v2547_v11 = vsel %vm11414_vm14, %v2517_v60, %v2171_v40  ;;  %vm11420_vm14 = vmmov %vm11419_vm4 }
 0x474   :  { %v2585_v45 = vsel %vm2562_vm12, %v2547_v11, %v2235_v19  ;;  %v2625_v37 = vsel %vm1119_vm6, %v2236_v3, %v2289_v46 }
 0x475   :  { %5644 = vmatmul.msk.bf16.vlgmr.msra.gmra.mxu2 %vm2702_vm1, %v9367_v6  ;;  %5645 = vmatmul.msk.bf16.vlgmr.msra.gmra.mxu3 %vm2702_vm1, %v9367_v6 }
 0x476   :  { %2855 = vmatpush.bf16.msrb.mxu0 %v2585_v45  ;;  %2115 = vrot.lane.b32.xlu0 %v2084_v41, %s7382_s15 }
 0x477   :  { %v9620_v58 = vpop.permute.xlu0 %2335 }
 0x478   :  { %2051 = vrot.lane.b32.xlu2 %v2020_v1, %s7388_s21  ;;  %v2357_v44 = vsel %vm11415_vm15, %v2334_v53, %v9620_v58  ;;  %v9625_v30 = vpop.permute.xlu2 %2043  ;;  %vm11421_vm15 = vmmov %vm11416_vm9 }
 0x479   :  { %v2663_v57 = vsel %vm11409_vm3, %v2625_v37, %v2357_v44  ;;  %v2064_v20 = vsel %vm2053_vm0, %v9550_v2, %v9625_v30  ;;  %vm11422_vm3 = vmmov %vm11418_vm7  ;;  %v2290_v44 = vrot.slane %v9116_v50, 6  ;;  %v2291_v37 = vrot.slane %v9372_v38, 6 }
 0x47a   :  { %2868 = vmatpush.bf16.msrb.mxu1 %v2663_v57  ;;  %v1975_v19 = vpop.permute.xlu1 %1974 }
 0x47b   :  { %v1997_v26 = vsel %vm11416_vm9, %v9513_v34, %v1975_v19  ;;  %vm11423_vm9 = vmmov %vm11419_vm4 }
 0x47c   :  { %v2434_v63 = vsel %vm1208_vm11, %v9055_v48, %v1997_v26  ;;  %v2627_v26 = vsel %vm1119_vm6, %v2237_v62, %v2290_v44 }
 0x47d   :  { %v2479_v39 = vsel %vm2456_vm10, %v2434_v63, %v2061_v35 }
 0x47e   :  { %2689 = vperm.xlu0 %7116, %v2685_v15   ;;  %2856 = vmatpush.bf16.msrb.mxu0 %v2479_v39 }
 0x47f   :  { %v2104_v59 = vpop.permute.xlu0 %2103 }
 0x480   :  { %1988 = vrot.lane.b32.xlu2 %v1957_v9, %s7378_s0  ;;  %v2125_v53 = vsel %vm772_vm13, %v2102_v54, %v2104_v59  ;;  %v2126_v34 = vsel %vm772_vm13, %v2104_v59, %v9534_v17  ;;  %v2385_v31 = vpop.permute.xlu2 %2384 }
 0x481   :  { %v2519_v48 = vsel %vm11417_vm8, %v2062_v36, %v2125_v53  ;;  %v2521_v23 = vsel %vm11418_vm7, %v9557_v33, %v2126_v34  ;;  %v2405_v10 = vsel %vm2053_vm0, %v9465_v24, %v2385_v31  ;;  %5646 = vmatmul.msk.bf16.vlgmr.msrb.gmra.mxu0 %vm2702_vm1, %v9367_v6  ;;  %vm11424_vm8 = vmmov %vm11421_vm15 }
 0x482   :  { %v2549_v47 = vsel %vm11419_vm4, %v2519_v48, %v2172_v55  ;;  %v2551_v8 = vsel %vm11420_vm14, %v2521_v23, %v9548_v61  ;;  %v2734_v43 = vsel %vm1208_vm11, %v2405_v10, 0  ;;  %v9660_v49 = vpop.permute.xlu1 %2217  ;;  %vm11425_vm7 = vmmov %vm11424_vm8  ;;  %vm11426_vm4 = vcmask 1044480  }
 0x483   :  { %v2588_v29 = vsel %vm2562_vm12, %v2549_v47, %v2236_v3  ;;  %v2591_v14 = vsel %vm2562_vm12, %v2551_v8, %v2237_v62  ;;  %2881 = vmatpush.bf16.msrb.mxu2 %v2734_v43  ;;  %vm11427_vm14 = vmmov %vm11426_vm4 }
 0x484   :  { %2869 = vmatpush.bf16.msrb.mxu1 %v2588_v29 }
 0x487   :  { %v1977_v18 = vpop.permute.xlu0 %1976 }
 0x488   :  { %v1998_v24 = vsel %vm11421_vm15, %v1975_v19, %v1977_v18  ;;  %v2391_v22 = vpop.permute.xlu2 %2390  ;;  %vm11428_vm15 = vmmov %vm11425_vm7 }
 0x489   :  { %v2437_v12 = vsel %vm1208_vm11, %v9208_v5, %v1998_v24  ;;  %v2174_v5 = vsel %vm1012_vm2, %v9541_v7, %v9488_v13  ;;  %v2238_v7 = vsel %vm2227_vm5, %v9592_v25, %v9660_v49  ;;  %v1999_v50 = vsel %vm11428_vm15, %v1977_v18, %v9605_v27 }
 0x48a   :  { %v2482_v56 = vsel %vm2456_vm10, %v2437_v12, %v2062_v36  ;;  %v9668_v61 = vpop.permute.xlu1 %1980  ;;  %v2629_v9 = vsel %vm1119_vm6, %v2238_v7, %v2291_v37  ;;  %v2440_v48 = vsel %vm1208_vm11, %v9153_v51, %v1999_v50  ;;  %v2293_v50 = vrot.slane %v9433_v4, 6 }
 0x48b   :  { %2870 = vmatpush.bf16.msrb.mxu1 %v2482_v56  ;;  %v2485_v10 = vsel %vm2456_vm10, %v2440_v48, %v9557_v33 }
 0x48e   :  { %5647 = vmatmul.msk.bf16.vlgmr.msrb.gmra.mxu1 %vm2702_vm1, %v9367_v6 }
 0x48f   :  { %v9672_v54 = vpop.permute.xlu0 %2107 }
 0x490   :  { %v2127_v35 = vsel %vm772_vm13, %v9534_v17, %v9672_v54  ;;  %v9684_v40 = vpop.permute.xlu2 %2339 }
 0x491   :  { %v2523_v0 = vsel %vm11422_vm3, %v2064_v20, %v2127_v35  ;;  %vm11429_vm3 = vmmov %vm11425_vm7 }
 0x492   :  { %v2553_v60 = vsel %vm11423_vm9, %v2523_v0, %v2174_v5  ;;  %v9687_v11 = vpop.permute.xlu1 %2160  ;;  %v2000_v38 = vsel %vm11429_vm3, %v9605_v27, %v9668_v61  ;;  %vm11430_vm9 = vmmov %vm11429_vm3 }
 0x493   :  { %v2594_v55 = vsel %vm2562_vm12, %v2553_v60, %v2238_v7  ;;  %v2443_v27 = vsel %vm1208_vm11, %v9178_v42, %v2000_v38  ;;  %vm11435_vm15 = vmmov %vm11429_vm3 }
 0x494   :  { %v2488_v47 = vsel %vm2456_vm10, %v2443_v27, %v2064_v20 }
 0x497   :  { %v2387_v41 = vpop.permute.xlu0 %2386 }
 0x498   :  { %v2406_v3 = vsel %vm2053_vm0, %v2385_v31, %v2387_v41  ;;  %v9691_v45 = vpop.permute.xlu2 %2345 }
 0x499   :  { %v2737_v2 = vsel %vm1208_vm11, %v2406_v3, 0 }
 0x49a   :  { %2895 = vmatpush.bf16.msrb.mxu3 %v2737_v2  ;;  %v2395_v17 = vpop.permute.xlu1 %2394 }
 0x49f   :  { %v2393_v1 = vpop.permute.xlu0 %2392 }
 0x4a0   :  { %v2409_v23 = vsel %vm2053_vm0, %v2391_v22, %v2393_v1  ;;  %v2410_v31 = vsel %vm2053_vm0, %v2393_v1, %v2395_v17 }
 0x4a1   :  { %v2746_v8 = vsel %vm1208_vm11, %v2409_v23, 0  ;;  %v2749_v51 = vsel %vm1208_vm11, %v2410_v31, 0 }
 0x4a2   :  { %v9696_v46 = vpop.permute.xlu2 %2047  ;;  %v2338_v57 = vpop.permute.xlu1 %2337 }
 0x4a3   :  { %v2358_v19 = vsel %vm11424_vm8, %v9620_v58, %v2338_v57  ;;  %v2359_v15 = vsel %vm11425_vm7, %v2338_v57, %v9684_v40  ;;  %vm11431_vm8 = vmmov %vm11426_vm4  ;;  %vm11432_vm7 = vcmask 1040384  }
 0x4a4   :  { %v2666_v63 = vsel %vm11426_vm4, %v2627_v26, %v2358_v19  ;;  %v2669_v25 = vsel %vm11427_vm14, %v2629_v9, %v2359_v15  ;;  %vm11433_vm4 = vmmov %vm11429_vm3  ;;  %vm11434_vm14 = vcmask 1043456  }
 0x4a5   :  { %2882 = vmatpush.bf16.msrb.mxu2 %v2666_v63  ;;  %2896 = vmatpush.bf16.msrb.mxu3 %v2669_v25  ;;  %v9774_v63 = vpop.f32.mrf.mxu3  ;;  %v2292_v25 = vrot.slane %v9362_v52, 6 }
 0x4a7   :  { %v2389_v58 = vpop.permute.xlu0 %2388 }
 0x4a8   :  { %v2407_v39 = vsel %vm2053_vm0, %v2387_v41, %v2389_v58  ;;  %v2408_v59 = vsel %vm2053_vm0, %v2389_v58, %v2391_v22  ;;  %v2294_v22 = vrot.slane %v9404_v16, 6 }
 0x4a9   :  { %v2740_v36 = vsel %vm1208_vm11, %v2407_v39, 0  ;;  %v2743_v53 = vsel %vm1208_vm11, %v2408_v59, 0  ;;  %2883 = vmatpush.bf16.msrb.mxu2 %v2591_v14  ;;  %2897 = vmatpush.bf16.msrb.mxu3 %v2594_v55 }
 0x4aa   :  { %v9717_v34 = vpop.permute.xlu2 %2113  ;;  %v9726_v62 = vpop.permute.xlu1 %2223  ;;  %2909 = vmatpush.bf16.msra.mxu0 %v2740_v36  ;;  %2923 = vmatpush.bf16.msra.mxu1 %v2743_v53 }
 0x4ab   :  { %v9786_v36 = vpop.f32.mrf.mxu1  ;;  %v9790_v53 = vpop.f32.mrf.mxu2 }
 0x4ad   :  { %2884 = vmatpush.bf16.msrb.mxu2 %v2485_v10  ;;  %2898 = vmatpush.bf16.msrb.mxu3 %v2488_v47 }
 0x4af   :  { %v2159_v42 = vpop.permute.xlu0 %2158 }
 0x4b0   :  { %5648 = vmatmul.msk.bf16.vlgmr.msrb.gmra.mxu2 %vm2702_vm1, %v9367_v6  ;;  %5649 = vmatmul.msk.bf16.vlgmr.msrb.gmra.mxu3 %vm2702_vm1, %v9367_v6  ;;  %v2177_v3 = vsel %vm1012_vm2, %v2159_v42, %v9687_v11 }
 0x4b1   :  { %2937 = vmatpush.bf16.msra.mxu2 %v2746_v8  ;;  %2951 = vmatpush.bf16.msra.mxu3 %v2749_v51 }
 0x4b2   :  { %v2220_v43 = vpop.permute.xlu2 %2219  ;;  %v2344_v29 = vpop.permute.xlu1 %2343 }
 0x4b3   :  { %v2362_v56 = vsel %vm11430_vm9, %v2344_v29, %v9691_v45  ;;  %vm11436_vm9 = vmmov %vm11429_vm3 }
 0x4b7   :  { %v2157_v33 = vpop.permute.xlu0 %2156 }
 0x4b8   :  { %v2175_v23 = vsel %vm1012_vm2, %v9488_v13, %v2157_v33  ;;  %v2176_v8 = vsel %vm1012_vm2, %v2157_v33, %v2159_v42  ;;  %v2776_v42 = vpop.f32.mrf.mxu2 }
 0x4ba   :  { %v2046_v14 = vpop.permute.xlu2 %2045  ;;  %v2112_v18 = vpop.permute.xlu1 %2111 }
 0x4bb   :  { %v2130_v41 = vsel %vm772_vm13, %v2112_v18, %v9717_v34  ;;  %v2065_v44 = vsel %vm2053_vm0, %v9625_v30, %v2046_v14  ;;  %v2066_v31 = vsel %vm2053_vm0, %v2046_v14, %v9696_v46 }
 0x4bf   :  { %v2222_v24 = vpop.permute.xlu0 %2221 }
 0x4c0   :  { %v2241_v12 = vsel %vm2227_vm5, %v2222_v24, %v9726_v62  ;;  %v2240_v9 = vsel %vm2227_vm5, %v2220_v43, %v2222_v24  ;;  %v2790_v24 = vpop.f32.mrf.mxu3 }
 0x4c1   :  { %v2635_v35 = vsel %vm1119_vm6, %v2241_v12, %v2294_v22 }
 0x4c2   :  { %v9742_v20 = vpop.permute.xlu2 %1986  ;;  %v2678_v5 = vsel %vm11431_vm8, %v2635_v35, %v2362_v56  ;;  %v1985_v0 = vpop.permute.xlu1 %1984 }
 0x4c3   :  { %2938 = vmatpush.bf16.msra.mxu2 %v2678_v5  ;;  %v2003_v37 = vsel %vm11435_vm15, %v1985_v0, %v9742_v20  ;;  %v9779_v58 = vpop.f32.mrf.mxu0 }
 0x4c4   :  { %v2452_v30 = vsel %vm1208_vm11, %v9467_v32, %v2003_v37  ;;  %v2633_v32 = vsel %vm1119_vm6, %v2240_v9, %v2293_v50 }
 0x4c7   :  { %v9746_v60 = vpop.permute.xlu0 %2049 }
 0x4c8   :  { %v2067_v16 = vsel %vm2053_vm0, %v9696_v46, %v9746_v60  ;;  %v2762_v46 = vpop.f32.mrf.mxu1 }
 0x4c9   :  { %v2529_v2 = vsel %vm11432_vm7, %v2067_v16, %v2130_v41  ;;  %vm11437_vm7 = vmmov %vm11431_vm8 }
 0x4ca   :  { %v1983_v17 = vpop.permute.xlu2 %1982  ;;  %v2559_v7 = vsel %vm11434_vm14, %v2529_v2, %v2177_v3  ;;  %v9763_v57 = vpop.permute.xlu1 %2347  ;;  %vm11439_vm14 = vcmask 1040384  }
 0x4cb   :  { %v2001_v1 = vsel %vm11433_vm4, %v9668_v61, %v1983_v17  ;;  %v2603_v19 = vsel %vm2562_vm12, %v2559_v7, %v2241_v12  ;;  %v2239_v61 = vsel %vm2227_vm5, %v9660_v49, %v2220_v43  ;;  %vm11438_vm4 = vmmov %vm11429_vm3  ;;  %v2804_v22 = vpop.f32.mrf.mxu0 }
 0x4cc   :  { %v2446_v15 = vsel %vm1208_vm11, %v9136_v21, %v2001_v1  ;;  %2939 = vmatpush.bf16.msra.mxu2 %v2603_v19  ;;  %v2497_v21 = vsel %vm2456_vm10, %v2452_v30, %v2067_v16  ;;  %v2631_v59 = vsel %vm1119_vm6, %v2239_v61, %v2292_v25  ;;  %v2002_v51 = vsel %vm11438_vm4, %v1983_v17, %v1985_v0  ;;  %vm11440_vm15 = vmmov %vm11439_vm14 }
 0x4cd   :  { %v2491_v26 = vsel %vm2456_vm10, %v2446_v15, %v2065_v44  ;;  %v2449_v56 = vsel %vm1208_vm11, %v9490_v28, %v2002_v51 }
 0x4ce   :  { %v2494_v28 = vsel %vm2456_vm10, %v2449_v56, %v2066_v31 }
 0x4cf   :  { %v2342_v38 = vpop.permute.xlu0 %2341 }
 0x4d0   :  { %v2360_v39 = vsel %vm11429_vm3, %v9684_v40, %v2342_v38  ;;  %v2361_v49 = vsel %vm11436_vm9, %v2342_v38, %v2344_v29  ;;  %2940 = vmatpush.bf16.msra.mxu2 %v2497_v21  ;;  %v1897_v40 = vld [vmem:[#allocation2 + $0x3c] sm:$0x7]  ;;  %vm11441_vm3 = vcmask 1043456  }
 0x4d1   :  { %v2672_v52 = vsel %vm11431_vm8, %v2631_v59, %v2360_v39  ;;  %v2675_v4 = vsel %vm11437_vm7, %v2633_v32, %v2361_v49  ;;  %v2265_v27 = vunpack.c.l.b16 %v1897_v40  ;;  %vm11442_vm9 = vmmov %vm11441_vm3  ;;  %v2816_v40 = vpop.f32.mrf.mxu1 }
 0x4d2   :  { %2910 = vmatpush.bf16.msra.mxu0 %v2672_v52  ;;  %2924 = vmatpush.bf16.msra.mxu1 %v2675_v4  ;;  %v2163_v55 = vpop.permute.xlu1 %2162  ;;  %v2052_v0 = vpop.permute.xlu2 %2051  ;;  %vm11443_vm8 = vmmov %vm11438_vm4 }
 0x4d3   :  { %5652 = vmatmul.msk.bf16.vlgmr.msra.gmra.mxu2 %vm2702_vm1, %v9367_v6  ;;  %v2280_v33 = vpack.c.b16 %v2265_v27, %v2265_v27  ;;  %v2363_v37 = vsel %vm11443_vm8, %v9691_v45, %v9763_v57  ;;  %v2068_v25 = vsel %vm2053_vm0, %v9746_v60, %v2052_v0  ;;  %v2178_v38 = vsel %vm1012_vm2, %v9687_v11, %v2163_v55 }
 0x4d5   :  { %v2295_v1 = vrot.slane %v2280_v33, 6 }
 0x4d7   :  { %v2110_v48 = vpop.permute.xlu0 %2109 }
 0x4d8   :  { %v2128_v10 = vsel %vm772_vm13, %v9672_v54, %v2110_v48  ;;  %v2129_v47 = vsel %vm772_vm13, %v2110_v48, %v2112_v18 }
 0x4d9   :  { %v2525_v43 = vsel %vm11439_vm14, %v2065_v44, %v2128_v10  ;;  %v2527_v29 = vsel %vm11440_vm15, %v2066_v31, %v2129_v47  ;;  %v2818_v10 = vpop.f32.mrf.mxu1 }
 0x4da   :  { %v2555_v13 = vsel %vm11441_vm3, %v2525_v43, %v2175_v23  ;;  %v2557_v12 = vsel %vm11442_vm9, %v2527_v29, %v2176_v8  ;;  %v9807_v14 = vpop.permute.xlu1 %2694  ;;  %v1989_v57 = vpop.permute.xlu2 %1988 }
 0x4db   :  { %v2597_v54 = vsel %vm2562_vm12, %v2555_v13, %v2239_v61  ;;  %v2600_v18 = vsel %vm2562_vm12, %v2557_v12, %v2240_v9  ;;  %v9814_v35 = vadd.f32 %v2790_v24, %v9807_v14  ;;  %v9817_v5 = vadd.f32 %v2804_v22, %v9807_v14 }
 0x4dc   :  { %2911 = vmatpush.bf16.msra.mxu0 %v2597_v54  ;;  %2925 = vmatpush.bf16.msra.mxu1 %v2600_v18  ;;  %v9822_v3 = vadd.f32 %v2762_v46, %v9807_v14  ;;  %v9825_v2 = vadd.f32 %v2776_v42, %v9807_v14  ;;  %v9911_v29 = vadd.f32 %v2818_v10, %v9807_v14 }
 0x4dd   :  { %v2978_v41 = vmax.f32 %v9814_v35, 0.0  ;;  %v2979_v16 = vmax.f32 %v9817_v5, 0.0 }
 0x4de   :  { %v2976_v15 = vmax.f32 %v9822_v3, 0.0  ;;  %v2977_v61 = vmax.f32 %v9825_v2, 0.0  ;;  %v2980_v46 = vmax.f32 %v9911_v29, 0.0 }
 0x4df   :  { %v2226_v17 = vpop.permute.xlu0 %2225  ;;  %v7208_v44 = vpack.i.bf16 %v2979_v16, %v2978_v41 }
 0x4e0   :  { %v2242_v7 = vsel %vm2227_vm5, %v9726_v62, %v2226_v17  ;;  %2912 = vmatpush.bf16.msra.mxu0 %v2491_v26  ;;  %2926 = vmatpush.bf16.msra.mxu1 %v2494_v28  ;;  %vm11444_vm5 = vmmov %vm11437_vm7  ;;  %v1888_v26 = vld [vmem:[#allocation2 + $0x38] sm:$0x7]  ;;  %v7213_v45 = vpack.i.bf16 %v2977_v61, %v2976_v15 }
 0x4e1   :  { %v2637_v19 = vsel %vm1119_vm6, %v2242_v7, %v2295_v1  ;;  %7209 = vrot.lane.b32.xlu1 %v7208_v44, %s7378_s0  ;;  %v1921_v9 = vunpack.c.l.b16 %v1888_v26  ;;  %vm11445_vm7 = vmmov %vm11438_vm4 }
 0x4e2   :  { %v2681_v62 = vsel %vm11444_vm5, %v2637_v19, %v2363_v37  ;;  %v2004_v21 = vsel %vm11445_vm7, %v9742_v20, %v1989_v57  ;;  %vm11446_vm4 = vmmov %vm11439_vm14 }
 0x4e3   :  { %5650 = vmatmul.msk.bf16.vlgmr.msra.gmra.mxu0 %vm2702_vm1, %v9367_v6  ;;  %5651 = vmatmul.msk.bf16.vlgmr.msra.gmra.mxu1 %vm2702_vm1, %v9367_v6  ;;  %vm11447_vm14 = vmmov %vm11441_vm3  ;;  %v1936_v59 = vpack.c.b16 %v1921_v9, %v1921_v9 }
 0x4e4   :  { %2952 = vmatpush.bf16.msra.mxu3 %v2681_v62  ;;  %vm11449_vm2 = vmmov %vm11445_vm7 }
 0x4e5   :  { %v2455_v60 = vsel %vm1208_vm11, %v1936_v59, %v2004_v21  ;;  %vm11448_vm11 = vmmov %vm11445_vm7 }
 0x4e6   :  { %vm11450_vm0 = vmmov %vm11449_vm2 }
 0x4e7   :  { %vm11454_vm15 = vmmov %vm11450_vm0 }
 0x4e8   :  { %v2116_v30 = vpop.permute.xlu0 %2115  ;;  %vm11455_vm3 = vmmov %vm11450_vm0 }
 0x4e9   :  { %v2131_v50 = vsel %vm772_vm13, %v9717_v34, %v2116_v30  ;;  %7214 = vrot.lane.b32.xlu1 %v7213_v45, %s7378_s0  ;;  %v2500_v34 = vsel %vm2456_vm10, %v2455_v60, %v2068_v25  ;;  %vm11452_vm10 = vmmov %vm11450_vm0 }
 0x4ea   :  { %v2531_v39 = vsel %vm11446_vm4, %v2068_v25, %v2131_v50  ;;  %vm11456_vm9 = vmmov %vm11450_vm0 }
 0x4eb   :  { %v2561_v49 = vsel %vm11447_vm14, %v2531_v39, %v2178_v38  ;;  %vm11457_vm8 = vmmov %vm11450_vm0 }
 0x4ec   :  { %v2606_v32 = vsel %vm2562_vm12, %v2561_v49, %v2242_v7  ;;  %vm11451_vm12 = vmmov %vm11450_vm0 }
 0x4ed   :  { %2953 = vmatpush.bf16.msra.mxu3 %v2606_v32  ;;  %vm11459_vm5 = vmmov %vm11450_vm0 }
 0x4ee   :  { %vm11460_vm7 = vmmov %vm11450_vm0 }
 0x4ef   :  { %vm11461_vm4 = vmmov %vm11450_vm0 }
 0x4f0   :  { %v9863_v52 = vpop.permute.xlu0 %2689  ;;  %vm11462_vm14 = vmmov %vm11450_vm0 }
 0x4f1   :  { %2954 = vmatpush.bf16.msra.mxu3 %v2500_v34  ;;  %v9868_v11 = vadd.f32 %v9786_v36, %v9863_v52  ;;  %v9872_v20 = vadd.f32 %v9790_v53, %v9863_v52  ;;  %v9876_v4 = vadd.f32 %v9774_v63, %v9863_v52  ;;  %v9880_v55 = vadd.f32 %v9779_v58, %v9863_v52 }
 0x4f2   :  { %v9899_v53 = vadd.f32 %v2816_v40, %v9863_v52 }
 0x4f3   :  { %v2961_v48 = vmax.f32 %v9868_v11, 0.0  ;;  %v2962_v27 = vmax.f32 %v9872_v20, 0.0  ;;  %v2963_v36 = vmax.f32 %v9876_v4, 0.0  ;;  %v2964_v23 = vmax.f32 %v9880_v55, 0.0 }
 0x4f4   :  { %5653 = vmatmul.msk.bf16.vlgmr.msra.gmra.mxu3 %vm2702_vm1, %v9367_v6  ;;  %v2965_v47 = vmax.f32 %v9899_v53, 0.0  ;;  %vm11453_vm1 = vmmov %vm11450_vm0 }
 0x4f5   :  { %v7203_v63 = vpack.i.bf16 %v2962_v27, %v2961_v48  ;;  %v7198_v58 = vpack.i.bf16 %v2964_v23, %v2963_v36 }
 0x4f7   :  { %7204 = vrot.lane.b32.xlu0 %v7203_v63, %s7378_s0  ;;  %7199 = vrot.lane.b32.xlu2 %v7198_v58, %s7378_s0 }
 0x4f8   :  { %v2830_v31 = vpop.f32.mrf.mxu2  ;;  %v2844_v51 = vpop.f32.mrf.mxu3 }
 0x4f9   :  { %v9902_v6 = vadd.f32 %v2830_v31, %v9863_v52  ;;  %v9914_v24 = vadd.f32 %v2844_v51, %v9863_v52 }
 0x4fb   :  { %v2966_v8 = vmax.f32 %v9902_v6, 0.0  ;;  %v2967_v42 = vmax.f32 %v9914_v24, 0.0  ;;  %v10152_v6 = vld [vmem:[%s11145_s5 + $0x78] sm:$0xff] }
 0x4fc   :  { %3823 = vmatpush.bf16.msrb.mxu1 %v10152_v6 }
 0x4fd   :  { %v7218_v43 = vpack.i.bf16 %v2966_v8, %v2965_v47 }
 0x4fe   :  { %v2858_v22 = vpop.f32.mrf.mxu0 }
 0x4ff   :  { %7219 = vrot.lane.b32.xlu0 %v7218_v43, %s7378_s0  ;;  %v9918_v13 = vadd.f32 %v2858_v22, %v9863_v52 }
 0x500   :  { %v2832_v12 = vpop.f32.mrf.mxu2  ;;  %v2846_v50 = vpop.f32.mrf.mxu3 }
 0x501   :  { %v9922_v54 = vadd.f32 %v2832_v12, %v9807_v14  ;;  %v11199_v18 = vmax.f32 %v9918_v13, 0.0 }
 0x503   :  { %v11209_v33 = vmax.f32 %v9922_v54, 0.0  ;;  %v7223_v56 = vpack.i.bf16 %v11199_v18, %v2967_v42 }
 0x505   :  { %v7228_v0 = vpack.i.bf16 %v11209_v33, %v2980_v46 }
 0x506   :  { %v2860_v38 = vpop.f32.mrf.mxu0 }
 0x507   :  { %7224 = vrot.lane.b32.xlu0 %v7223_v56, %s7378_s0  ;;  %7229 = vrot.lane.b32.xlu2 %v7228_v0, %s7378_s0 }
 0x50b   :  { %v2872_v17 = vpop.f32.mrf.mxu1 }
 0x50c   :  { %v9938_v28 = vadd.f32 %v2872_v17, %v9863_v52 }
 0x50e   :  { %v11208_v37 = vmax.f32 %v9938_v28, 0.0 }
 0x513   :  { %v2874_v44 = vpop.f32.mrf.mxu1 }
 0x514   :  { %v9950_v26 = vadd.f32 %v2874_v44, %v9807_v14 }
 0x516   :  { %v11207_v57 = vmax.f32 %v9950_v26, 0.0 }
 0x533   :  { %v2886_v1 = vpop.f32.mrf.mxu2  ;;  %v2900_v39 = vpop.f32.mrf.mxu3 }
 0x534   :  { %v9941_v7 = vadd.f32 %v2886_v1, %v9863_v52  ;;  %v9964_v49 = vadd.f32 %v2900_v39, %v9863_v52 }
 0x536   :  { %v11206_v19 = vmax.f32 %v9941_v7, 0.0  ;;  %v11205_v63 = vmax.f32 %v9964_v49, 0.0 }
 0x538   :  { %v7233_v62 = vpack.i.bf16 %v11206_v19, %v11208_v37 }
 0x53a   :  { %7234 = vrot.lane.b32.xlu2 %v7233_v62, %s7378_s0 }
 0x53b   :  { %v2888_v45 = vpop.f32.mrf.mxu2  ;;  %v2902_v51 = vpop.f32.mrf.mxu3 }
 0x53c   :  { %v9955_v9 = vadd.f32 %v2888_v45, %v9807_v14  ;;  %v9990_v0 = vadd.f32 %v2902_v51, %v9807_v14  ;;  %v10010_v51 = vadd.f32 %v2846_v50, %v9807_v14 }
 0x53e   :  { %v2985_v30 = vmax.f32 %v9955_v9, 0.0 }
 0x540   :  { %v7243_v25 = vpack.i.bf16 %v2985_v30, %v11207_v57 }
 0x542   :  { %7244 = vrot.lane.b32.xlu1 %v7243_v25, %s7378_s0 }
 0x551   :  { %v7200_v50 = vpop.permute.xlu2 %7199 }
 0x553   :  { %v9987_v56 = vpop.permute.xlu1 %7209 }
 0x556   :  { %v2942_v21 = vpop.f32.mrf.mxu2 }
 0x557   :  { %v9967_v59 = vadd.f32 %v2942_v21, %v9863_v52  ;;  %v2986_v21 = vmax.f32 %v9990_v0, 0.0  ;;  %v10198_v0 = vld [vmem:[%s11145_s5 + $0x68] sm:$0xff] }
 0x559   :  { %v11198_v58 = vmax.f32 %v9967_v59, 0.0 }
 0x55b   :  { %v10029_v18 = vpop.permute.xlu1 %7214 }
 0x55e   :  { %v2944_v43 = vpop.f32.mrf.mxu2 }
 0x55f   :  { %v9993_v17 = vadd.f32 %v2944_v43, %v9807_v14  ;;  %v10013_v43 = vadd.f32 %v2860_v38, %v9807_v14  ;;  %v2982_v38 = vmax.f32 %v10010_v51, 0.0  ;;  %v10233_v51 = vld [vmem:[%s11145_s5 + $0x60] sm:$0xff] }
 0x560   :  { %v2914_v32 = vpop.f32.mrf.mxu0  ;;  %v2928_v60 = vpop.f32.mrf.mxu1 }
 0x561   :  { %v9970_v34 = vadd.f32 %v2914_v32, %v9863_v52  ;;  %v9973_v40 = vadd.f32 %v2928_v60, %v9863_v52  ;;  %v11203_v39 = vmax.f32 %v9993_v17, 0.0 }
 0x563   :  { %v11202_v31 = vmax.f32 %v9970_v34, 0.0  ;;  %v11201_v10 = vmax.f32 %v9973_v40, 0.0 }
 0x565   :  { %v7238_v22 = vpack.i.bf16 %v11202_v31, %v11205_v63  ;;  %v7253_v12 = vpack.i.bf16 %v11198_v58, %v11201_v10  ;;  %v11214_v58 = vmax.f32 %v10013_v43, 0.0  ;;  %v7201_v63 = vunpack.i.l.bf16 %v7200_v50 }
 0x567   :  { %7239 = vrot.lane.b32.xlu0 %v7238_v22, %s7378_s0  ;;  %7254 = vrot.lane.b32.xlu1 %v7253_v12, %s7378_s0  ;;  %v7258_v57 = vpack.i.bf16 %v11214_v58, %v2982_v38 }
 0x568   :  { %v2916_v1 = vpop.f32.mrf.mxu0  ;;  %v2930_v44 = vpop.f32.mrf.mxu1 }
 0x569   :  { %v9997_v62 = vpop.permute.xlu0 %7204  ;;  %v10000_v45 = vadd.f32 %v2916_v1, %v9807_v14  ;;  %v10003_v25 = vadd.f32 %v2930_v44, %v9807_v14  ;;  %v7212_v1 = vunpack.i.h.bf16 %v9987_v56  ;;  %v7211_v44 = vunpack.i.l.bf16 %v9987_v56 }
 0x56a   :  { %v7217_v56 = vunpack.i.h.bf16 %v10029_v18 }
 0x56b   :  { %v11200_v32 = vmax.f32 %v10000_v45, 0.0  ;;  %v11204_v60 = vmax.f32 %v10003_v25, 0.0  ;;  %v3098_v10 = vsel %vm11448_vm11, %v7211_v44, %v7212_v1  ;;  %vm11465_vm11 = vmmov %vm11450_vm0 }
 0x56c   :  { %v10037_v19 = vmax.f32 %v2978_v41, %v3098_v10  ;;  %v3097_v41 = vsel %vm11452_vm10, %v7217_v56, %v7211_v44  ;;  %vm11471_vm10 = vmmov %vm11450_vm0 }
 0x56d   :  { %v7248_v22 = vpack.i.bf16 %v11200_v32, %v2986_v21  ;;  %v7263_v12 = vpack.i.bf16 %v11203_v39, %v11204_v60  ;;  %v7202_v60 = vunpack.i.h.bf16 %v7200_v50 }
 0x56f   :  { %7264 = vrot.lane.b32.xlu0 %v7263_v12, %s7378_s0  ;;  %7249 = vrot.lane.b32.xlu2 %v7248_v22, %s7378_s0  ;;  %v11212_v12 = vunpack.i.l.bf16 %v10029_v18  ;;  %v3084_v35 = vsel %vm11451_vm12, %v7201_v63, %v7202_v60  ;;  %vm11470_vm12 = vmmov %vm11450_vm0 }
 0x571   :  { %v7220_v32 = vpop.permute.xlu0 %7219  ;;  %v3096_v10 = vsel %vm11453_vm1, %v11212_v12, %v7217_v56  ;;  %vm11472_vm1 = vmmov %vm11450_vm0 }
 0x572   :  { %v7222_v31 = vunpack.i.h.bf16 %v7220_v32  ;;  %v7221_v39 = vunpack.i.l.bf16 %v7220_v32  ;;  %v10073_v44 = vmax.f32 %v2976_v15, %v3096_v10 }
 0x574   :  { %v3086_v22 = vsel %vm11449_vm2, %v7221_v39, %v7222_v31  ;;  %v3085_v50 = vsel %vm11450_vm0, %v7202_v60, %v7221_v39  ;;  %v10065_v39 = vmax.f32 %v2963_v36, %v3084_v35  ;;  %v10069_v60 = vmax.f32 %v2977_v61, %v3097_v41  ;;  %vm11466_vm2 = vmmov %vm11450_vm0 }
 0x575   :  { %v10045_v32 = vmax.f32 %v2965_v47, %v3086_v22  ;;  %v10058_v53 = vmax.f32 %v2964_v23, %v3085_v50  ;;  %v7207_v47 = vunpack.i.h.bf16 %v9997_v62  ;;  %v7230_v23 = vpop.permute.xlu2 %7229 }
 0x576   :  { %v7288_v3 = vpack.i.bf16 %v10069_v60, %v10073_v44  ;;  %v7232_v61 = vunpack.i.h.bf16 %v7230_v23  ;;  %v7231_v56 = vunpack.i.l.bf16 %v7230_v23 }
 0x577   :  { %v2956_v37 = vpop.f32.mrf.mxu3  ;;  %7259 = vrot.lane.b32.xlu2 %v7258_v57, %s7378_s0  ;;  %v7283_v33 = vpack.i.bf16 %v10037_v19, %v10045_v32  ;;  %v11213_v57 = vunpack.i.l.bf16 %v9997_v62  ;;  %v7273_v55 = vpack.i.bf16 %v10058_v53, %v10065_v39  ;;  %v3083_v4 = vsel %vm11455_vm3, %v7207_v47, %v7201_v63  ;;  %vm11485_vm3 = vmmov %vm11450_vm0 }
 0x578   :  { %v10082_v36 = vadd.f32 %v2956_v37, %v9863_v52  ;;  %v10096_v63 = vmax.f32 %v2962_v27, %v3083_v4  ;;  %v3099_v50 = vsel %vm11456_vm9, %v7212_v1, %v7231_v56  ;;  %v3100_v11 = vsel %vm11457_vm8, %v7231_v56, %v7232_v61  ;;  %v10162_v4 = vld [vmem:[%s11145_s5 + $0x30] sm:$0xff]  ;;  %vm11489_vm9 = vmmov %vm11450_vm0 }
 0x579   :  { %7284 = vrot.lane.b32.xlu0 %v7283_v33, %s7382_s15  ;;  %v3082_v33 = vsel %vm11454_vm15, %v11213_v57, %v7207_v47  ;;  %v10115_v27 = vmax.f32 %v2979_v16, %v3099_v50  ;;  %v10119_v35 = vmax.f32 %v2980_v46, %v3100_v11  ;;  %v11480_v57 = vmax.f32 %v9964_v49, 0.0  ;;  %vm11483_vm15 = vmmov %vm11450_vm0 }
 0x57a   :  { %v10092_v22 = vmax.f32 %v2961_v48, %v3082_v33  ;;  %v11211_v52 = vmax.f32 %v10082_v36, 0.0  ;;  %v10109_v48 = vpop.permute.xlu0 %7224  ;;  %v10147_v33 = vld [vmem:[%s11145_s5 + $0x38] sm:$0xff]  ;;  %vm11491_vm8 = vmmov %vm11450_vm0 }
 0x57b   :  { %11458 = vst [vmem:[#allocation26_spill] sm:$0xff] %v10119_v35  ;;  %v11215_v1 = vunpack.i.h.bf16 %v10109_v48  ;;  %v7226_v41 = vunpack.i.l.bf16 %v10109_v48  ;;  %v7293_v10 = vpack.i.bf16 %v10119_v35, %v10115_v27  ;;  %3809 = vmatpush.bf16.msrb.mxu0 %v10147_v33  ;;  %v10359_v35 = vld [vmem:[%s11145_s5 + $0xa0] sm:$0xff] }
 0x57c   :  { %v7278_v20 = vpack.i.bf16 %v10096_v63, %v10092_v22 }
 0x57d   :  { %v3087_v47 = vsel %vm11459_vm5, %v7222_v31, %v7226_v41  ;;  %vm11497_vm5 = vmmov %vm11450_vm0 }
 0x57e   :  { %v10132_v5 = vmax.f32 %v2966_v8, %v3087_v47  ;;  %v10207_v47 = vld [vmem:[%s11145_s5 + $0xb8] sm:$0xff] }
 0x57f   :  { %v2958_v2 = vpop.f32.mrf.mxu3  ;;  %7274 = vrot.lane.b32.xlu2 %v7273_v55, %s7382_s15  ;;  %v3088_v55 = vsel %vm11460_vm7, %v7226_v41, %v11215_v1  ;;  %3810 = vmatpush.bf16.msrb.mxu0 %v10162_v4  ;;  %v10273_v1 = vld [vmem:[%s11145_s5 + $0xf0] sm:$0xff]  ;;  %vm11500_vm7 = vmmov %vm11450_vm0 }
 0x580   :  { %v10088_v15 = vadd.f32 %v2958_v2, %v9807_v14  ;;  %v3150_v16 = vmax.f32 %v2967_v42, %v3088_v55  ;;  %v10167_v2 = vld [vmem:[%s11145_s5 + $0x70] sm:$0xff]  ;;  %v10212_v55 = vld [vmem:[%s11145_s5 + $0xf8] sm:$0xff]  ;;  %3837 = vmatpush.bf16.msrb.mxu2 %v10207_v47  ;;  %11473 = vst [vmem:[#allocation35_spill] sm:$0xff] %v10273_v1 }
 0x581   :  { %7289 = vrot.lane.b32.xlu0 %v7288_v3, %s7382_s15  ;;  %3824 = vmatpush.bf16.msrb.mxu1 %v10167_v2  ;;  %11467 = vst [vmem:[#allocation30_spill] sm:$0xff] %v10212_v55 }
 0x582   :  { %v11210_v37 = vmax.f32 %v10088_v15, 0.0  ;;  %v7298_v29 = vpack.i.bf16 %v3150_v16, %v10132_v5  ;;  %v11468_v16 = vmax.f32 %v9922_v54, 0.0  ;;  %3851 = vmatpush.bf16.msrb.mxu3 %v10212_v55 }
 0x584   :  { %v7268_v14 = vpack.i.bf16 %v11210_v37, %v11211_v52 }
 0x585   :  { %3825 = vmatpush.bf16.msrb.mxu1 %v10198_v0 }
 0x586   :  { %7269 = vrot.lane.b32.xlu1 %v7268_v14, %s7378_s0  ;;  %3852 = vmatpush.bf16.msrb.mxu3 %v10273_v1  ;;  %v10364_v1 = vld [vmem:[%s11145_s5 + $0xe0] sm:$0xff]  ;;  %s7389_s0 = smov [#allocation5]  }
 0x587   :  { %7279 = vrot.lane.b32.xlu2 %v7278_v20, %s7382_s15  ;;  %s5607_s30 = sshll.u32 %s7389_s0, 4  ;;  %s5608_s30 = int_to_ptr.vmem [resolvable:$true] %s5607_s30 }
 0x589   :  { %3826 = vmatpush.bf16.msrb.mxu1 %v10233_v51 }
 0x58e   :  { %7294 = vrot.lane.b32.xlu1 %v7293_v10, %s7382_s15 }
 0x594   :  { %v10138_v46 = vpop.permute.xlu2 %7234 }
 0x596   :  { %7299 = vrot.lane.b32.xlu1 %v7298_v29, %s7382_s15 }
 0x5b4   :  { %v10140_v31 = vpop.permute.xlu1 %7244 }
 0x5b5   :  { %v7247_v8 = vunpack.i.h.bf16 %v10140_v31  ;;  %v11218_v54 = vunpack.i.l.bf16 %v10140_v31 }
 0x5c9   :  { %v10142_v23 = vpop.permute.xlu2 %7249 }
 0x5ca   :  { %v11219_v24 = vunpack.i.h.bf16 %v10142_v23  ;;  %v7251_v42 = vunpack.i.l.bf16 %v10142_v23 }
 0x5cc   :  { %v3105_v3 = vsel %vm11461_vm4, %v7247_v8, %v7251_v42  ;;  %v3106_v56 = vsel %vm11462_vm14, %v7251_v42, %v11219_v24  ;;  %v10225_v42 = vld [vmem:[%s11145_s5 + $0x20] sm:$0xff]  ;;  %vm11504_vm4 = vmmov %vm11450_vm0 }
 0x5cd   :  { %v10175_v14 = vmax.f32 %v2985_v30, %v3105_v3  ;;  %v10179_v50 = vmax.f32 %v2986_v21, %v3106_v56  ;;  %v10193_v30 = vld [vmem:[%s11145_s5 + $0x28] sm:$0xff]  ;;  %v7237_v3 = vunpack.i.h.bf16 %v10138_v46  ;;  %v11216_v56 = vunpack.i.l.bf16 %v10138_v46  ;;  %vm11506_vm14 = vmmov %vm11450_vm0 }
 0x5ce   :  { %3811 = vmatpush.bf16.msrb.mxu0 %v10193_v30 }
 0x5cf   :  { %11463 = vst [vmem:[#allocation9_spill] sm:$0xff] %v10175_v14  ;;  %v7313_v11 = vpack.i.bf16 %v10179_v50, %v10175_v14  ;;  %v11493_v14 = vmax.f32 %v10000_v45, 0.0 }
 0x5d0   :  { %11464 = vst [vmem:[#allocation22_spill] sm:$0xff] %v10179_v50 }
 0x5d1   :  { %v10185_v20 = vpop.permute.xlu2 %7259  ;;  %7314 = vrot.lane.b32.xlu0 %v7313_v11, %s7382_s15 }
 0x5d2   :  { %v11217_v41 = vunpack.i.h.bf16 %v10185_v20  ;;  %v7261_v9 = vunpack.i.l.bf16 %v10185_v20  ;;  %3812 = vmatpush.bf16.msrb.mxu0 %v10225_v42 }
 0x5d4   :  { %v3101_v21 = vsel %vm11465_vm11, %v7232_v61, %v7261_v9  ;;  %v3102_v10 = vsel %vm11466_vm2, %v7261_v9, %v11217_v41  ;;  %vm11508_vm11 = vmmov %vm11450_vm0 }
 0x5d5   :  { %v10216_v29 = vmax.f32 %v11468_v16, %v3101_v21  ;;  %v3165_v61 = vmax.f32 %v2982_v38, %v3102_v10  ;;  %v3090_v21 = vsel %vm11450_vm0, %v11216_v56, %v7237_v3  ;;  %v3104_v10 = vsel %vm11470_vm12, %v11218_v54, %v7247_v8  ;;  %v10264_v8 = vld [vmem:[%s11145_s5 + $0xb0] sm:$0xff]  ;;  %vm11510_vm2 = vmmov %vm11450_vm0 }
 0x5d6   :  { %v11474_v56 = vmax.f32 %v9938_v28, 0.0  ;;  %v11476_v54 = vmax.f32 %v9950_v26, 0.0  ;;  %3838 = vmatpush.bf16.msrb.mxu2 %v10264_v8  ;;  %v10297_v28 = vld [vmem:[%s11145_s5 + $0x10] sm:$0xff]  ;;  %vm11529_vm0 = vcmask 1043456   ;;  %vm5581_vm12 = vcmask 687104  }
 0x5d7   :  { %11469 = vst [vmem:[#allocation27_spill] sm:$0xff] %v10216_v29  ;;  %v7323_v38 = vpack.i.bf16 %v3165_v61, %v10216_v29  ;;  %v10254_v61 = vld [vmem:[%s11145_s5 + $0x18] sm:$0xff]  ;;  %v11487_v29 = vmax.f32 %v9973_v40, 0.0 }
 0x5d8   :  { %v10277_v41 = vmax.f32 %v11474_v56, %v3090_v21  ;;  %v10281_v24 = vmax.f32 %v11476_v54, %v3104_v10  ;;  %3813 = vmatpush.bf16.msrb.mxu0 %v10254_v61 }
 0x5d9   :  { %v7240_v11 = vpop.permute.xlu0 %7239  ;;  %v10238_v9 = vpop.permute.xlu2 %7274  ;;  %7324 = vrot.lane.b32.xlu0 %v7323_v38, %s7382_s15  ;;  %v10259_v38 = vld [vmem:[%s11145_s5 + $0x58] sm:$0xff] }
 0x5da   :  { %v7242_v16 = vunpack.i.h.bf16 %v7240_v11  ;;  %v7241_v37 = vunpack.i.l.bf16 %v7240_v11  ;;  %v10248_v52 = vpop.permute.xlu1 %7254  ;;  %11475 = vst [vmem:[#allocation10_spill] sm:$0xff] %v10277_v41  ;;  %3827 = vmatpush.bf16.msrb.mxu1 %v10259_v38  ;;  %v7276_v10 = vunpack.i.l.bf16 %v10238_v9 }
 0x5db   :  { %v7256_v58 = vunpack.i.l.bf16 %v10248_v52  ;;  %11477 = vst [vmem:[#allocation12_spill] sm:$0xff] %v10281_v24  ;;  %v11484_v54 = vunpack.i.h.bf16 %v10248_v52 }
 0x5dc   :  { %v3091_v11 = vsel %vm11471_vm10, %v7237_v3, %v7241_v37  ;;  %v3092_v12 = vsel %vm11472_vm1, %v7241_v37, %v7242_v16  ;;  %v11478_v3 = vmax.f32 %v9941_v7, 0.0  ;;  %v10302_v7 = vld [vmem:[%s11145_s5 + $0x50] sm:$0xff]  ;;  %3814 = vmatpush.bf16.msrb.mxu0 %v10297_v28 }
 0x5dd   :  { %v10289_v50 = vmax.f32 %v11480_v57, %v3092_v12  ;;  %v10312_v12 = vld [vmem:[%s11145_s5 + $0xa8] sm:$0xff]  ;;  %v3093_v56 = vsel %vm11483_vm15, %v7242_v16, %v7256_v58  ;;  %v3094_v21 = vsel %vm11485_vm3, %v7256_v58, %v11484_v54 }
 0x5de   :  { %v10285_v37 = vmax.f32 %v11478_v3, %v3091_v11  ;;  %v10317_v57 = vld [vmem:[%s11145_s5 + $0xe8] sm:$0xff]  ;;  %3828 = vmatpush.bf16.msrb.mxu1 %v10302_v7  ;;  %3839 = vmatpush.bf16.msrb.mxu2 %v10312_v12 }
 0x5df   :  { %11481 = vst [vmem:[#allocation13_spill] sm:$0xff] %v10289_v50  ;;  %v7308_v49 = vpack.i.bf16 %v10281_v24, %v10289_v50  ;;  %v10339_v58 = vld [vmem:[%s11145_s5 + $0x8] sm:$0xff]  ;;  %3853 = vmatpush.bf16.msrb.mxu3 %v10317_v57  ;;  %v11494_v50 = vmax.f32 %v10003_v25, 0.0  ;;  %v11495_v25 = vunpack.i.l.bf16 %v10140_v31  ;;  %v10413_v31 = vld [vmem:[%s11145_s5 + $0x98] sm:$0xff] }
 0x5e0   :  { %11479 = vst [vmem:[#allocation15_spill] sm:$0xff] %v10285_v37  ;;  %v7303_v26 = vpack.i.bf16 %v10285_v37, %v10277_v41  ;;  %v10352_v37 = vmax.f32 %v11487_v29, %v3094_v21  ;;  %3815 = vmatpush.bf16.msrb.mxu0 %v10339_v58 }
 0x5e1   :  { %11482 = vst [vmem:[#allocation33_spill] sm:$0xff] %v10317_v57  ;;  %v10324_v11 = vpop.permute.xlu0 %7264  ;;  %v10326_v3 = vpop.permute.xlu2 %7279  ;;  %7309 = vrot.lane.b32.xlu2 %v7308_v49, %s7382_s15  ;;  %v11486_v49 = vmax.f32 %v9970_v34, 0.0  ;;  %v11488_v34 = vunpack.i.h.bf16 %v10142_v23 }
 0x5e2   :  { %7304 = vrot.lane.b32.xlu1 %v7303_v26, %s7382_s15  ;;  %v7266_v41 = vunpack.i.l.bf16 %v10324_v11  ;;  %v7282_v16 = vunpack.i.h.bf16 %v10326_v3  ;;  %v10344_v26 = vld [vmem:[%s11145_s5 + $0x48] sm:$0xff]  ;;  %v11490_v29 = vunpack.i.h.bf16 %v10324_v11  ;;  %v11492_v21 = vunpack.i.l.bf16 %v10326_v3  ;;  %3840 = vmatpush.bf16.msrb.mxu2 %v10359_v35 }
 0x5e3   :  { %v10348_v54 = vmax.f32 %v11486_v49, %v3093_v56  ;;  %3829 = vmatpush.bf16.msrb.mxu1 %v10344_v26  ;;  %3854 = vmatpush.bf16.msrb.mxu3 %v10364_v1 }
 0x5e4   :  { %v3107_v40 = vsel %vm11489_vm9, %v11488_v34, %v7266_v41  ;;  %v3108_v56 = vsel %vm11491_vm8, %v7266_v41, %v11490_v29  ;;  %v3265_v49 = vsel %vm772_vm13, %v11492_v21, %v7282_v16  ;;  %v3266_v57 = vsel %vm772_vm13, %v7282_v16, %v7276_v10 }
 0x5e5   :  { %v10378_v24 = vmax.f32 %v11493_v14, %v3107_v40  ;;  %v10382_v55 = vmax.f32 %v11494_v50, %v3108_v56  ;;  %v3327_v23 = vmax.f32 %v10092_v22, %v3265_v49  ;;  %v3328_v34 = vmax.f32 %v10096_v63, %v3266_v57  ;;  %v10403_v50 = vld [vmem:[%s11145_s5] sm:$0xff] }
 0x5e6   :  { %v7318_v45 = vpack.i.bf16 %v10352_v37, %v10348_v54  ;;  %v11496_v22 = vunpack.i.h.bf16 %v10185_v20  ;;  %v7277_v14 = vunpack.i.h.bf16 %v10238_v9  ;;  %v10408_v57 = vld [vmem:[%s11145_s5 + $0x40] sm:$0xff]  ;;  %v10420_v20 = vld [vmem:[%s11145_s5 + $0xd8] sm:$0xff]  ;;  %v11498_v9 = vunpack.i.l.bf16 %v10138_v46  ;;  %3816 = vmatpush.bf16.msrb.mxu0 %v10403_v50  ;;  %3841 = vmatpush.bf16.msrb.mxu2 %v10413_v31  ;;  %v10438_v46 = vld [vmem:[%s11145_s5 + $0x90] sm:$0xff] }
 0x5e7   :  { %v3357_v41 = vpack.c.bf16 %v3328_v34, %v3327_v23  ;;  %v7328_v16 = vpack.i.bf16 %v10382_v55, %v10378_v24  ;;  %v11499_v40 = vunpack.i.h.bf16 %v10109_v48  ;;  %3830 = vmatpush.bf16.msrb.mxu1 %v10408_v57  ;;  %v11501_v56 = vmax.f32 %v10013_v43, 0.0  ;;  %3855 = vmatpush.bf16.msrb.mxu3 %v10420_v20  ;;  %v10443_v48 = vld [vmem:[%s11145_s5 + $0xd0] sm:$0xff] }
 0x5e8   :  { %v3103_v63 = vsel %vm11497_vm5, %v11496_v22, %v11495_v25  ;;  %v3267_v23 = vsel %vm772_vm13, %v7276_v10, %v7277_v14  ;;  %v11502_v34 = vmax.f32 %v9918_v13, 0.0  ;;  %v10459_v10 = vld [vmem:[%s11145_s5 + $0x88] sm:$0xff] }
 0x5e9   :  { %3373 = vst [vmem:[#allocation3] sm:$0xff] %v3357_v41  ;;  %7319 = vrot.lane.b32.xlu2 %v7318_v45, %s7382_s15  ;;  %v3089_v29 = vsel %vm11500_vm7, %v11499_v40, %v11498_v9  ;;  %v3166_v21 = vmax.f32 %v11501_v56, %v3103_v63  ;;  %v3329_v45 = vmax.f32 %v10065_v39, %v3267_v23  ;;  %v10465_v63 = vld [vmem:[%s11145_s5 + $0xc8] sm:$0xff]  ;;  %v10484_v9 = vld [vmem:[%s11145_s5 + $0xc0] sm:$0xff] }
 0x5ea   :  { %7329 = vrot.lane.b32.xlu1 %v7328_v16, %s7382_s15  ;;  %v3151_v41 = vmax.f32 %v11502_v34, %v3089_v29  ;;  %3842 = vmatpush.bf16.msrb.mxu2 %v10438_v46 }
 0x5eb   :  { %v10431_v49 = vpop.permute.xlu0 %7284  ;;  %3856 = vmatpush.bf16.msrb.mxu3 %v10443_v48 }
 0x5ec   :  { %v11232_v43 = vunpack.i.l.bf16 %v10431_v49  ;;  %v7343_v22 = vpack.i.bf16 %v3166_v21, %v3151_v41  ;;  %v7287_v40 = vunpack.i.h.bf16 %v10431_v49  ;;  %v10493_v21 = vld [vmem:[%s11145_s5 + $0x130] sm:$0xff] }
 0x5ee   :  { %v3268_v16 = vsel %vm772_vm13, %v7277_v14, %v11232_v43  ;;  %3843 = vmatpush.bf16.msrb.mxu2 %v10459_v10  ;;  %v10479_v14 = vld [vmem:[%s11145_s5 + $0x80] sm:$0xff] }
 0x5ef   :  { %v3330_v25 = vmax.f32 %v10058_v53, %v3268_v16  ;;  %v10470_v53 = vld [vmem:[%s11145_s5 + $0x138] sm:$0xff]  ;;  %3857 = vmatpush.bf16.msrb.mxu3 %v10465_v63 }
 0x5f0   :  { %3865 = vmatpush.bf16.msra.mxu0 %v10470_v53 }
 0x5f1   :  { %v3358_v13 = vpack.c.bf16 %v3330_v25, %v3329_v45  ;;  %v10507_v25 = vld [vmem:[%s11145_s5 + $0x128] sm:$0xff] }
 0x5f2   :  { %7344 = vrot.lane.b32.xlu1 %v7343_v22, %s7382_s15  ;;  %3844 = vmatpush.bf16.msrb.mxu2 %v10479_v14 }
 0x5f3   :  { %3374 = vst [vmem:[#allocation3 + $0x8] sm:$0xff] %v3358_v13  ;;  %v10472_v39 = vpop.permute.xlu0 %7289  ;;  %3858 = vmatpush.bf16.msrb.mxu3 %v10484_v9 }
 0x5f4   :  { %v7292_v29 = vunpack.i.h.bf16 %v10472_v39  ;;  %v11231_v56 = vunpack.i.l.bf16 %v10472_v39  ;;  %3866 = vmatpush.bf16.msra.mxu0 %v10493_v21 }
 0x5f6   :  { %v3280_v23 = vsel %vm772_vm13, %v7292_v29, %v7287_v40  ;;  %v3279_v34 = vsel %vm772_vm13, %v11231_v56, %v7292_v29  ;;  %3933 = vmatpush.bf16.msra.mxu2 %v10147_v33  ;;  %v11507_v56 = vunpack.i.l.bf16 %v9997_v62  ;;  %v11509_v33 = vunpack.i.l.bf16 %v10029_v18 }
 0x5f7   :  { %v3343_v41 = vmax.f32 %v10069_v60, %v3280_v23  ;;  %v3342_v16 = vmax.f32 %v10073_v44, %v3279_v34  ;;  %3947 = vmatpush.bf16.msra.mxu3 %v10152_v6  ;;  %v11503_v60 = vunpack.i.h.bf16 %v10324_v11  ;;  %v11505_v23 = vunpack.i.h.bf16 %v10248_v52 }
 0x5f8   :  { %v7270_v45 = vpop.permute.xlu1 %7269  ;;  %v11512_v11 = vmax.f32 %v9967_v59, 0.0  ;;  %v11513_v52 = vmax.f32 %v10082_v36, 0.0  ;;  %v11514_v62 = vmax.f32 %v10088_v15, 0.0  ;;  %3867 = vmatpush.bf16.msra.mxu0 %v10507_v25 }
 0x5f9   :  { %v3365_v22 = vpack.c.bf16 %v3343_v41, %v3342_v16  ;;  %v7272_v13 = vunpack.i.h.bf16 %v7270_v45  ;;  %v7271_v29 = vunpack.i.l.bf16 %v7270_v45  ;;  %v11511_v16 = vmax.f32 %v9993_v17, 0.0 }
 0x5fa   :  { %3934 = vmatpush.bf16.msra.mxu2 %v10162_v4 }
 0x5fb   :  { %3381 = vst [vmem:[#allocation3 + $0x3c] sm:$0xff] %v3365_v22  ;;  %v3109_v44 = vsel %vm11504_vm4, %v11503_v60, %v7272_v13  ;;  %v3095_v34 = vsel %vm11506_vm14, %v11505_v23, %v7271_v29  ;;  %v3142_v43 = vsel %vm11508_vm11, %v7271_v29, %v11507_v56  ;;  %v3143_v41 = vsel %vm11510_vm2, %v7272_v13, %v11509_v33 }
 0x5fc   :  { %v10525_v6 = vmax.f32 %v11511_v16, %v3109_v44  ;;  %v10529_v45 = vmax.f32 %v11512_v11, %v3095_v34  ;;  %v10533_v22 = vmax.f32 %v11513_v52, %v3142_v43  ;;  %v10537_v60 = vmax.f32 %v11514_v62, %v3143_v41  ;;  %3948 = vmatpush.bf16.msra.mxu3 %v10167_v2  ;;  %v5656_v43 = vld [vmem:[#allocation3] sm:$0xf]  ;;  %v6761_v2 = vld [vmem:[#allocation3 + $0x4] sm:$0xf] }
 0x5fd   :  { %v11515_v16 = vunpack.i.l.bf16 %v10431_v49 }
 0x5fe   :  { %v7333_v18 = vpack.i.bf16 %v10533_v22, %v10529_v45  ;;  %v7338_v59 = vpack.i.bf16 %v10537_v60, %v10525_v6  ;;  %3935 = vmatpush.bf16.msra.mxu2 %v10193_v30 }
 0x600   :  { %v10546_v17 = vpop.permute.xlu1 %7294  ;;  %7334 = vrot.lane.b32.xlu2 %v7333_v18, %s7382_s15  ;;  %7339 = vrot.lane.b32.xlu0 %v7338_v59, %s7382_s15 }
 0x601   :  { %v7297_v36 = vunpack.i.h.bf16 %v10546_v17  ;;  %v7296_v15 = vunpack.i.l.bf16 %v10546_v17  ;;  %3949 = vmatpush.bf16.msra.mxu3 %v10198_v0 }
 0x602   :  { %v6764_v4 = vld [vmem:[#allocation3 + $0x38] sm:$0xf0]  ;;  %v5658_v56 = vld [vmem:[#allocation3 + $0x3c] sm:$0xf0]  ;;  %3936 = vmatpush.bf16.msra.mxu2 %v10225_v42 }
 0x603   :  { %v3281_v13 = vsel %vm772_vm13, %v7287_v40, %v7296_v15  ;;  %v3282_v29 = vsel %vm772_vm13, %v7296_v15, %v7297_v36  ;;  %v5657_v44 = vor.u32 %v6764_v4, %v5656_v43  ;;  %v5661_v23 = vor.u32 %v6761_v2, %v5658_v56  ;;  %v6754_v15 = vld [vmem:[%s11145_s5 + $0x148] sm:$0xff]  ;;  %v6753_v56 = vld [vmem:[%s11145_s5 + $0x140] sm:$0xff] }
 0x604   :  { %v3344_v34 = vmax.f32 %v10037_v19, %v3281_v13  ;;  %v3345_v33 = vmax.f32 %v10115_v27, %v3282_v29 }
 0x605   :  { %3817 = vmatmul.bf16.vlgmr.msrb.gmra.mxu0 %v5657_v44  ;;  %3831 = vmatmul.bf16.vlgmr.msrb.gmra.mxu1 %v5661_v23 }
 0x606   :  { %v3366_v30 = vpack.c.bf16 %v3345_v33, %v3344_v34  ;;  %3950 = vmatpush.bf16.msra.mxu3 %v10233_v51  ;;  %3937 = vmatpush.bf16.msra.mxu2 %v10254_v61  ;;  %v5664_v51 = vld [vmem:[#allocation3 + $0x8] sm:$0xf]  ;;  %v6762_v61 = vld [vmem:[#allocation3 + $0xc] sm:$0xf]  ;;  %v11516_v33 = vld [vmem:[#allocation30_spill] sm:$0xff] }
 0x608   :  { %3382 = vst [vmem:[#allocation3 + $0x44] sm:$0xff] %v3366_v30  ;;  %v7300_v0 = vpop.permute.xlu1 %7299  ;;  %v11517_v30 = vld [vmem:[#allocation13_spill] sm:$0xff] }
 0x609   :  { %v7302_v40 = vunpack.i.h.bf16 %v7300_v0  ;;  %v7301_v41 = vunpack.i.l.bf16 %v7300_v0 }
 0x60a   :  { %3951 = vmatpush.bf16.msra.mxu3 %v10259_v38  ;;  %3938 = vmatpush.bf16.msra.mxu2 %v10297_v28  ;;  %v6748_v28 = vld [vmem:[%s11145_s5 + $0x118] sm:$0xff] }
 0x60b   :  { %v3269_v19 = vsel %vm772_vm13, %v11515_v16, %v7301_v41  ;;  %v3270_v27 = vsel %vm772_vm13, %v7301_v41, %v7302_v40  ;;  %v11518_v41 = vld [vmem:[#allocation12_spill] sm:$0xff] }
 0x60c   :  { %v3331_v11 = vmax.f32 %v10045_v32, %v3269_v19  ;;  %v3332_v42 = vmax.f32 %v10132_v5, %v3270_v27  ;;  %v6749_v32 = vld [vmem:[%s11145_s5 + $0x120] sm:$0xff]  ;;  %v6760_v5 = vld [vmem:[%s11145_s5 + $0x178] sm:$0xff] }
 0x60d   :  { %3868 = vmatpush.bf16.msra.mxu0 %v6749_v32  ;;  %3879 = vmatpush.bf16.msra.mxu1 %v6760_v5  ;;  %v11519_v19 = vld [vmem:[#allocation9_spill] sm:$0xff] }
 0x60e   :  { %v3359_v52 = vpack.c.bf16 %v3332_v42, %v3331_v11  ;;  %3952 = vmatpush.bf16.msra.mxu3 %v10302_v7  ;;  %3939 = vmatpush.bf16.msra.mxu2 %v10339_v58  ;;  %v6759_v7 = vld [vmem:[%s11145_s5 + $0x170] sm:$0xff] }
 0x60f   :  { %v6765_v62 = vld [vmem:[#allocation3 + $0x40] sm:$0xf0]  ;;  %v5666_v18 = vld [vmem:[#allocation3 + $0x44] sm:$0xf0] }
 0x610   :  { %3375 = vst [vmem:[#allocation3 + $0x10] sm:$0xff] %v3359_v52  ;;  %v5665_v38 = vor.u32 %v6765_v62, %v5664_v51  ;;  %v5669_v49 = vor.u32 %v6762_v61, %v5666_v18  ;;  %v6747_v58 = vld [vmem:[%s11145_s5 + $0x110] sm:$0xff] }
 0x611   :  { %3869 = vmatpush.bf16.msra.mxu0 %v6748_v28  ;;  %3880 = vmatpush.bf16.msra.mxu1 %v6759_v7  ;;  %v11520_v52 = vld [vmem:[#allocation35_spill] sm:$0xff] }
 0x612   :  { %3845 = vmatmul.bf16.vlgmr.msrb.gmra.mxu2 %v5665_v38  ;;  %3859 = vmatmul.bf16.vlgmr.msrb.gmra.mxu3 %v5669_v49  ;;  %v11521_v38 = vld [vmem:[#allocation33_spill] sm:$0xff] }
 0x613   :  { %3953 = vmatpush.bf16.msra.mxu3 %v10344_v26  ;;  %3940 = vmatpush.bf16.msra.mxu2 %v10403_v50  ;;  %v6758_v26 = vld [vmem:[%s11145_s5 + $0x168] sm:$0xff] }
 0x614   :  { %v6746_v50 = vld [vmem:[%s11145_s5 + $0x108] sm:$0xff] }
 0x615   :  { %3870 = vmatpush.bf16.msra.mxu0 %v6747_v58  ;;  %3881 = vmatpush.bf16.msra.mxu1 %v6758_v26 }
 0x617   :  { %3954 = vmatpush.bf16.msra.mxu3 %v10408_v57  ;;  %3989 = vmatpush.bf16.msrb.mxu2 %v10470_v53  ;;  %v6757_v57 = vld [vmem:[%s11145_s5 + $0x160] sm:$0xff] }
 0x618   :  { %v6745_v53 = vld [vmem:[%s11145_s5 + $0x100] sm:$0xff] }
 0x619   :  { %3871 = vmatpush.bf16.msra.mxu0 %v6746_v50  ;;  %3882 = vmatpush.bf16.msra.mxu1 %v6757_v57 }
 0x61b   :  { %3990 = vmatpush.bf16.msrb.mxu2 %v10493_v21  ;;  %4003 = vmatpush.bf16.msrb.mxu3 %v6760_v5  ;;  %v6756_v21 = vld [vmem:[%s11145_s5 + $0x158] sm:$0xff] }
 0x61d   :  { %3872 = vmatpush.bf16.msra.mxu0 %v6745_v53  ;;  %3883 = vmatpush.bf16.msra.mxu1 %v6756_v21 }
 0x61f   :  { %3991 = vmatpush.bf16.msrb.mxu2 %v10507_v25  ;;  %4004 = vmatpush.bf16.msrb.mxu3 %v6759_v7  ;;  %v6755_v25 = vld [vmem:[%s11145_s5 + $0x150] sm:$0xff] }
 0x621   :  { %3961 = vmatpush.bf16.msrb.mxu0 %v10207_v47  ;;  %3884 = vmatpush.bf16.msra.mxu1 %v6755_v25 }
 0x623   :  { %3992 = vmatpush.bf16.msrb.mxu2 %v6749_v32  ;;  %4005 = vmatpush.bf16.msrb.mxu3 %v6758_v26  ;;  %v11523_v32 = vld [vmem:[#allocation27_spill] sm:$0xff]  ;;  %v11524_v26 = vld [vmem:[#allocation10_spill] sm:$0xff] }
 0x625   :  { %3962 = vmatpush.bf16.msrb.mxu0 %v10264_v8  ;;  %3885 = vmatpush.bf16.msra.mxu1 %v6754_v15 }
 0x627   :  { %3993 = vmatpush.bf16.msrb.mxu2 %v6748_v28  ;;  %4006 = vmatpush.bf16.msrb.mxu3 %v6757_v57  ;;  %v11525_v57 = vld [vmem:[#allocation15_spill] sm:$0xff] }
 0x629   :  { %3963 = vmatpush.bf16.msrb.mxu0 %v10312_v12  ;;  %3886 = vmatpush.bf16.msra.mxu1 %v6753_v56 }
 0x62b   :  { %3994 = vmatpush.bf16.msrb.mxu2 %v6747_v58  ;;  %4007 = vmatpush.bf16.msrb.mxu3 %v6756_v21  ;;  %v5672_v21 = vld [vmem:[#allocation3 + $0x10] sm:$0xf] }
 0x62d   :  { %3964 = vmatpush.bf16.msrb.mxu0 %v10359_v35  ;;  %3975 = vmatpush.bf16.msrb.mxu1 %v11516_v33 }
 0x62f   :  { %3995 = vmatpush.bf16.msrb.mxu2 %v6746_v50  ;;  %4008 = vmatpush.bf16.msrb.mxu3 %v6755_v25 }
 0x631   :  { %3965 = vmatpush.bf16.msrb.mxu0 %v10413_v31  ;;  %3976 = vmatpush.bf16.msrb.mxu1 %v11520_v52  ;;  %v11522_v31 = vld [vmem:[#allocation26_spill] sm:$0xff] }
 0x633   :  { %3996 = vmatpush.bf16.msrb.mxu2 %v6745_v53  ;;  %4009 = vmatpush.bf16.msrb.mxu3 %v6754_v15 }
 0x635   :  { %3966 = vmatpush.bf16.msrb.mxu0 %v10438_v46  ;;  %3977 = vmatpush.bf16.msrb.mxu1 %v11521_v38 }
 0x637   :  { %4010 = vmatpush.bf16.msrb.mxu3 %v6753_v56 }
 0x639   :  { %3967 = vmatpush.bf16.msrb.mxu0 %v10459_v10  ;;  %3978 = vmatpush.bf16.msrb.mxu1 %v10364_v1 }
 0x63b   :  { %v7310_v59 = vpop.permute.xlu2 %7309 }
 0x63c   :  { %v7312_v43 = vunpack.i.h.bf16 %v7310_v59  ;;  %v7311_v4 = vunpack.i.l.bf16 %v7310_v59  ;;  %v6763_v59 = vld [vmem:[#allocation3 + $0x14] sm:$0xf] }
 0x63d   :  { %3968 = vmatpush.bf16.msrb.mxu0 %v10479_v14  ;;  %3979 = vmatpush.bf16.msrb.mxu1 %v10420_v20 }
 0x641   :  { %3980 = vmatpush.bf16.msrb.mxu1 %v10443_v48 }
 0x643   :  { %v10618_v2 = vpop.permute.xlu2 %7319  ;;  %v10620_v47 = vpop.permute.xlu0 %7314 }
 0x644   :  { %v7322_v8 = vunpack.i.h.bf16 %v10618_v2  ;;  %v7321_v13 = vunpack.i.l.bf16 %v10618_v2  ;;  %v7317_v29 = vunpack.i.h.bf16 %v10620_v47  ;;  %v7316_v12 = vunpack.i.l.bf16 %v10620_v47 }
 0x645   :  { %3981 = vmatpush.bf16.msrb.mxu1 %v10465_v63 }
 0x646   :  { %v3275_v44 = vsel %vm772_vm13, %v7311_v4, %v7321_v13  ;;  %v3276_v23 = vsel %vm772_vm13, %v7321_v13, %v7322_v8  ;;  %v3287_v34 = vsel %vm772_vm13, %v7312_v43, %v7316_v12  ;;  %v3288_v35 = vsel %vm772_vm13, %v7316_v12, %v7317_v29 }
 0x647   :  { %v3337_v0 = vmax.f32 %v11517_v30, %v3275_v44  ;;  %v3338_v40 = vmax.f32 %v10348_v54, %v3276_v23  ;;  %v3350_v16 = vmax.f32 %v11518_v41, %v3287_v34  ;;  %v3351_v27 = vmax.f32 %v11519_v19, %v3288_v35 }
 0x648   :  { %v11526_v12 = vunpack.i.l.bf16 %v10326_v3 }
 0x649   :  { %v3362_v11 = vpack.c.bf16 %v3338_v40, %v3337_v0  ;;  %v3369_v42 = vpack.c.bf16 %v3351_v27, %v3350_v16  ;;  %v11527_v0 = vld [vmem:[#allocation22_spill] sm:$0xff]  ;;  %3982 = vmatpush.bf16.msrb.mxu1 %v10484_v9 }
 0x64b   :  { %3378 = vst [vmem:[#allocation3 + $0x28] sm:$0xff] %v3362_v11  ;;  %v7325_v51 = vpop.permute.xlu0 %7324 }
 0x64c   :  { %3385 = vst [vmem:[#allocation3 + $0x5c] sm:$0xff] %v3369_v42  ;;  %v7327_v62 = vunpack.i.h.bf16 %v7325_v51  ;;  %v7326_v61 = vunpack.i.l.bf16 %v7325_v51 }
 0x64e   :  { %v3283_v54 = vsel %vm772_vm13, %v7297_v36, %v7326_v61  ;;  %v3284_v18 = vsel %vm772_vm13, %v7326_v61, %v7327_v62 }
 0x64f   :  { %v3346_v49 = vmax.f32 %v11522_v31, %v3283_v54  ;;  %v3347_v5 = vmax.f32 %v11523_v32, %v3284_v18  ;;  %v11528_v54 = vunpack.i.l.bf16 %v10472_v39 }
 0x651   :  { %v3367_v28 = vpack.c.bf16 %v3347_v5, %v3346_v49 }
 0x652   :  { %v6767_v63 = vld [vmem:[#allocation3 + $0x28] sm:$0xf] }
 0x653   :  { %3383 = vst [vmem:[#allocation3 + $0x4c] sm:$0xff] %v3367_v28 }
 0x654   :  { %v7305_v46 = vpop.permute.xlu1 %7304 }
 0x655   :  { %v7307_v17 = vunpack.i.h.bf16 %v7305_v46  ;;  %v7306_v7 = vunpack.i.l.bf16 %v7305_v46 }
 0x657   :  { %v3273_v36 = vsel %vm772_vm13, %v7306_v7, %v7307_v17  ;;  %v3274_v58 = vsel %vm772_vm13, %v7307_v17, %v7311_v4 }
 0x658   :  { %v3335_v50 = vmax.f32 %v11524_v26, %v3273_v36  ;;  %v3336_v53 = vmax.f32 %v11525_v57, %v3274_v58  ;;  %v6780_v57 = vld [vmem:[%s11146_s6 + $0x38] sm:$0xff] }
 0x65a   :  { %v3361_v10 = vpack.c.bf16 %v3336_v53, %v3335_v50  ;;  %v7335_v25 = vpop.permute.xlu2 %7334  ;;  %v6766_v1 = vld [vmem:[#allocation3 + $0x48] sm:$0xf0]  ;;  %v5674_v15 = vld [vmem:[#allocation3 + $0x4c] sm:$0xf0] }
 0x65b   :  { %v7337_v14 = vunpack.i.h.bf16 %v7335_v25  ;;  %v7336_v43 = vunpack.i.l.bf16 %v7335_v25  ;;  %v5673_v56 = vor.u32 %v6766_v1, %v5672_v21  ;;  %v5677_v4 = vor.u32 %v6763_v59, %v5674_v15  ;;  %v6796_v53 = vld [vmem:[%s11146_s6 + $0xb8] sm:$0xff]  ;;  %v6787_v21 = vld [vmem:[%s11146_s6 + $0x70] sm:$0xff] }
 0x65c   :  { %3377 = vst [vmem:[#allocation3 + $0x20] sm:$0xff] %v3361_v10  ;;  %v7330_v2 = vpop.permute.xlu1 %7329  ;;  %v6804_v10 = vld [vmem:[%s11146_s6 + $0xf8] sm:$0xff]  ;;  %v6779_v15 = vld [vmem:[%s11146_s6 + $0x30] sm:$0xff] }
 0x65d   :  { %v7332_v13 = vunpack.i.h.bf16 %v7330_v2  ;;  %v7331_v20 = vunpack.i.l.bf16 %v7330_v2  ;;  %v3325_v44 = vsel %vm772_vm13, %v7337_v14, %v11526_v12  ;;  %v3277_v23 = vsel %vm772_vm13, %v7322_v8, %v7336_v43  ;;  %3873 = vmatmul.bf16.vlgmr.msra.gmra.mxu0 %v5673_v56  ;;  %3887 = vmatmul.bf16.vlgmr.msra.gmra.mxu1 %v5677_v4  ;;  %v6786_v2 = vld [vmem:[%s11146_s6 + $0x68] sm:$0xff] }
 0x65e   :  { %v3278_v34 = vsel %vm772_vm13, %v7336_v43, %v7337_v14  ;;  %v3341_v48 = vmax.f32 %v10533_v22, %v3325_v44  ;;  %v3339_v35 = vmax.f32 %v10352_v37, %v3277_v23  ;;  %v6770_v37 = vld [vmem:[#allocation3 + $0x5c] sm:$0xf0]  ;;  %4183 = vmatpush.bf16.msra.mxu1 %v6780_v57  ;;  %v6795_v14 = vld [vmem:[%s11146_s6 + $0xb0] sm:$0xff] }
 0x65f   :  { %v3340_v33 = vmax.f32 %v10529_v45, %v3278_v34  ;;  %v3289_v30 = vsel %vm772_vm13, %v7317_v29, %v7331_v20  ;;  %v3290_v3 = vsel %vm772_vm13, %v7331_v20, %v7332_v13  ;;  %v5880_v29 = vld [vmem:[#allocation3 + $0x2c] sm:$0xf]  ;;  %v6803_v43 = vld [vmem:[%s11146_s6 + $0xf0] sm:$0xff]  ;;  %v6778_v56 = vld [vmem:[%s11146_s6 + $0x28] sm:$0xff] }
 0x660   :  { %v3352_v8 = vmax.f32 %v11527_v0, %v3289_v30  ;;  %v3364_v40 = vpack.c.bf16 %v3341_v48, %v3341_v48  ;;  %v3353_v16 = vmax.f32 %v10378_v24, %v3290_v3  ;;  %v6794_v4 = vld [vmem:[%s11146_s6 + $0xa8] sm:$0xff]  ;;  %v6785_v20 = vld [vmem:[%s11146_s6 + $0x60] sm:$0xff] }
 0x661   :  { %v3363_v41 = vpack.c.bf16 %v3340_v33, %v3339_v35  ;;  %v6777_v35 = vld [vmem:[%s11146_s6 + $0x20] sm:$0xff]  ;;  %v6826_v57 = vld [vmem:[%s11146_s6 + $0x1a8] sm:$0xff] }
 0x662   :  { %3380 = vst [vmem:[#allocation3 + $0x38] sm:$0xf] %v3364_v40  ;;  %v3370_v22 = vpack.c.bf16 %v3353_v16, %v3352_v8  ;;  %4184 = vmatpush.bf16.msra.mxu1 %v6779_v15  ;;  %v6793_v33 = vld [vmem:[%s11146_s6 + $0xa0] sm:$0xff]  ;;  %v6784_v8 = vld [vmem:[%s11146_s6 + $0x58] sm:$0xff] }
 0x663   :  { %v5872_v19 = vld [vmem:[#allocation3 + $0x24] sm:$0xf]  ;;  %3379 = vst [vmem:[#allocation3 + $0x30] sm:$0xff] %v3363_v41  ;;  %v6801_v30 = vld [vmem:[%s11146_s6 + $0xe0] sm:$0xff]  ;;  %v6776_v40 = vld [vmem:[%s11146_s6 + $0x18] sm:$0xff] }
 0x664   :  { %v7345_v45 = vpop.permute.xlu1 %7344  ;;  %v5873_v47 = vor.u32 %v6770_v37, %v5872_v19  ;;  %3386 = vst [vmem:[#allocation3 + $0x64] sm:$0xff] %v3370_v22  ;;  %v6792_v41 = vld [vmem:[%s11146_s6 + $0x98] sm:$0xff]  ;;  %v6783_v19 = vld [vmem:[%s11146_s6 + $0x50] sm:$0xff] }
 0x665   :  { %v6800_v22 = vld [vmem:[%s11146_s6 + $0xd8] sm:$0xff] }
 0x666   :  { %3941 = vmatmul.bf16.vlgmr.msra.gmra.mxu2 %v5873_v47  ;;  %4185 = vmatpush.bf16.msra.mxu1 %v6778_v56  ;;  %v6816_v15 = vld [vmem:[%s11146_s6 + $0x158] sm:$0xff] }
 0x667   :  { %4276 = vmatpush.bf16.msra.mxu2 %v6796_v53  ;;  %v6834_v53 = vld [vmem:[%s11146_s6 + $0x1e8] sm:$0xff] }
 0x669   :  { %v6769_v26 = vld [vmem:[#allocation3 + $0x38] sm:$0xf] }
 0x66a   :  { %v6768_v28 = vld [vmem:[#allocation3 + $0x30] sm:$0xf]  ;;  %v5888_v17 = vld [vmem:[#allocation3 + $0x34] sm:$0xf]  ;;  %4186 = vmatpush.bf16.msra.mxu1 %v6777_v35  ;;  %v6822_v35 = vld [vmem:[%s11146_s6 + $0x188] sm:$0xff] }
 0x66b   :  { %v5874_v27 = vld [vmem:[#allocation3 + $0x60] sm:$0xf0]  ;;  %v6771_v11 = vld [vmem:[#allocation3 + $0x64] sm:$0xf0]  ;;  %4277 = vmatpush.bf16.msra.mxu2 %v6795_v14  ;;  %v6824_v14 = vld [vmem:[%s11146_s6 + $0x198] sm:$0xff] }
 0x66c   :  { %v5877_v42 = vor.u32 %v6767_v63, %v5874_v27  ;;  %v5881_v52 = vor.u32 %v6771_v11, %v5880_v29  ;;  %v6775_v27 = vld [vmem:[%s11146_s6 + $0x10] sm:$0xff] }
 0x66d   :  { %v6791_v11 = vld [vmem:[%s11146_s6 + $0x90] sm:$0xff] }
 0x66e   :  { %3955 = vmatmul.bf16.vlgmr.msra.gmra.mxu3 %v5877_v42  ;;  %3969 = vmatmul.bf16.vlgmr.msrb.gmra.mxu0 %v5881_v52  ;;  %v6799_v42 = vld [vmem:[%s11146_s6 + $0xd0] sm:$0xff] }
 0x66f   :  { %4360 = vmatpush.bf16.msra.mxu3 %v6804_v10  ;;  %4278 = vmatpush.bf16.msra.mxu2 %v6794_v4  ;;  %v6809_v10 = vld [vmem:[%s11146_s6 + $0x120] sm:$0xff]  ;;  %v6807_v4 = vld [vmem:[%s11146_s6 + $0x110] sm:$0xff] }
 0x670   :  { %4187 = vmatpush.bf16.msra.mxu1 %v6776_v40  ;;  %v6805_v40 = vld [vmem:[%s11146_s6 + $0x100] sm:$0xff] }
 0x672   :  { %v7340_v24 = vpop.permute.xlu0 %7339 }
 0x673   :  { %v7342_v51 = vunpack.i.h.bf16 %v7340_v24  ;;  %v7341_v62 = vunpack.i.l.bf16 %v7340_v24  ;;  %4361 = vmatpush.bf16.msra.mxu3 %v6803_v43  ;;  %4279 = vmatpush.bf16.msra.mxu2 %v6793_v33  ;;  %v6782_v24 = vld [vmem:[%s11146_s6 + $0x48] sm:$0xff]  ;;  %v6832_v43 = vld [vmem:[%s11146_s6 + $0x1d8] sm:$0xff] }
 0x674   :  { %4188 = vmatpush.bf16.msra.mxu1 %v6775_v27  ;;  %v6830_v33 = vld [vmem:[%s11146_s6 + $0x1c8] sm:$0xff] }
 0x675   :  { %v3291_v61 = vsel %vm772_vm13, %v7332_v13, %v7341_v62  ;;  %v3292_v9 = vsel %vm772_vm13, %v7341_v62, %v7342_v51  ;;  %v3326_v18 = vsel %vm772_vm13, %v7342_v51, %v11528_v54  ;;  %v6802_v13 = vld [vmem:[%s11146_s6 + $0xe8] sm:$0xff]  ;;  %vm4066_vm13 = vcmask 1041409  }
 0x676   :  { %v3354_v38 = vmax.f32 %v10382_v55, %v3291_v61  ;;  %v3355_v31 = vmax.f32 %v10525_v6, %v3292_v9  ;;  %v3356_v49 = vmax.f32 %v10537_v60, %v3326_v18  ;;  %v6788_v60 = vld [vmem:[%s11146_s6 + $0x78] sm:$0xff]  ;;  %v6774_v62 = vld [vmem:[%s11146_s6 + $0x8] sm:$0xff] }
 0x677   :  { %4118 = vmatpush.bf16.msra.mxu0 %v6788_v60  ;;  %4362 = vmatpush.bf16.msra.mxu3 %v6802_v13  ;;  %v6790_v61 = vld [vmem:[%s11146_s6 + $0x88] sm:$0xff]  ;;  %v6815_v13 = vld [vmem:[%s11146_s6 + $0x150] sm:$0xff] }
 0x678   :  { %v3371_v32 = vpack.c.bf16 %v3355_v31, %v3354_v38  ;;  %v3372_v5 = vpack.c.bf16 %v3356_v49, %v3356_v49  ;;  %4280 = vmatpush.bf16.msra.mxu2 %v6792_v41  ;;  %v6798_v18 = vld [vmem:[%s11146_s6 + $0xc8] sm:$0xff]  ;;  %4189 = vmatpush.bf16.msra.mxu1 %v6774_v62  ;;  %v6781_v31 = vld [vmem:[%s11146_s6 + $0x40] sm:$0xff]  ;;  %v6812_v49 = vld [vmem:[%s11146_s6 + $0x138] sm:$0xff] }
 0x679   :  { %v6818_v60 = vld [vmem:[%s11146_s6 + $0x168] sm:$0xff]  ;;  %v6813_v41 = vld [vmem:[%s11146_s6 + $0x140] sm:$0xff] }
 0x67a   :  { %3387 = vst [vmem:[#allocation3 + $0x6c] sm:$0xff] %v3371_v32  ;;  %v6773_v32 = vld [vmem:[%s11146_s6] sm:$0xff] }
 0x67b   :  { %3388 = vst [vmem:[#allocation3 + $0x74] sm:$0xf] %v3372_v5  ;;  %4119 = vmatpush.bf16.msra.mxu0 %v6787_v21  ;;  %4363 = vmatpush.bf16.msra.mxu3 %v6801_v30  ;;  %v6789_v5 = vld [vmem:[%s11146_s6 + $0x80] sm:$0xff] }
 0x67c   :  { %4281 = vmatpush.bf16.msra.mxu2 %v6791_v11  ;;  %4190 = vmatpush.bf16.msra.mxu1 %v6773_v32  ;;  %v6817_v21 = vld [vmem:[%s11146_s6 + $0x160] sm:$0xff] }
 0x67f   :  { %4120 = vmatpush.bf16.msra.mxu0 %v6786_v2  ;;  %4364 = vmatpush.bf16.msra.mxu3 %v6800_v22  ;;  %v6829_v22 = vld [vmem:[%s11146_s6 + $0x1c0] sm:$0xff] }
 0x680   :  { %4282 = vmatpush.bf16.msra.mxu2 %v6790_v61 }
 0x681   :  { %v5882_v46 = vld [vmem:[#allocation3 + $0x68] sm:$0xf0]  ;;  %v6772_v7 = vld [vmem:[#allocation3 + $0x6c] sm:$0xf0] }
 0x682   :  { %v5885_v36 = vor.u32 %v6768_v28, %v5882_v46  ;;  %v5889_v58 = vor.u32 %v6772_v7, %v5888_v17  ;;  %v5890_v39 = vld [vmem:[#allocation3 + $0x70] sm:$0xf0]  ;;  %v3818_v55 = vpop.f32.mrf.mxu0  ;;  %v3832_v6 = vpop.f32.mrf.mxu1  ;;  %v6820_v46 = vld [vmem:[%s11146_s6 + $0x178] sm:$0xff] }
 0x683   :  { %v5893_v50 = vor.u32 %v6769_v26, %v5890_v39  ;;  %v3833_v44 = vadd.f32 %v3832_v6, %v3818_v55  ;;  %4121 = vmatpush.bf16.msra.mxu0 %v6785_v20  ;;  %4365 = vmatpush.bf16.msra.mxu3 %v6799_v42  ;;  %v6797_v28 = vld [vmem:[%s11146_s6 + $0xc0] sm:$0xff]  ;;  %v6828_v17 = vld [vmem:[%s11146_s6 + $0x1b8] sm:$0xff]  ;;  %v6827_v26 = vld [vmem:[%s11146_s6 + $0x1b0] sm:$0xff] }
 0x684   :  { %3983 = vmatmul.bf16.vlgmr.msrb.gmra.mxu1 %v5885_v36  ;;  %3997 = vmatmul.bf16.vlgmr.msrb.gmra.mxu2 %v5889_v58  ;;  %v6836_v7 = vld [vmem:[%s11146_s6 + $0x1f8] sm:$0xff]  ;;  %v6811_v36 = vld [vmem:[%s11146_s6 + $0x130] sm:$0xff]  ;;  %v6810_v6 = vld [vmem:[%s11146_s6 + $0x128] sm:$0xff] }
 0x685   :  { %4011 = vmatmul.bf16.vlgmr.msrb.gmra.mxu3 %v5893_v50  ;;  %4283 = vmatpush.bf16.msra.mxu2 %v6789_v5  ;;  %v6819_v58 = vld [vmem:[%s11146_s6 + $0x170] sm:$0xff] }
 0x686   :  { %4538 = vmatpush.bf16.msrb.mxu1 %v6820_v46  ;;  %v6835_v39 = vld [vmem:[%s11146_s6 + $0x1f0] sm:$0xff] }
 0x687   :  { %4122 = vmatpush.bf16.msra.mxu0 %v6784_v8  ;;  %4366 = vmatpush.bf16.msra.mxu3 %v6798_v18 }
 0x689   :  { %4632 = vmatpush.bf16.msrb.mxu2 %v6828_v17 }
 0x68a   :  { %v3820_v1 = vpop.f32.mrf.mxu0  ;;  %v3834_v59 = vpop.f32.mrf.mxu1  ;;  %4539 = vmatpush.bf16.msrb.mxu1 %v6819_v58 }
 0x68b   :  { %v3835_v3 = vadd.f32 %v3834_v59, %v3820_v1  ;;  %4123 = vmatpush.bf16.msra.mxu0 %v6783_v19  ;;  %4367 = vmatpush.bf16.msra.mxu3 %v6797_v28  ;;  %v6833_v1 = vld [vmem:[%s11146_s6 + $0x1e0] sm:$0xff]  ;;  %v6808_v59 = vld [vmem:[%s11146_s6 + $0x118] sm:$0xff] }
 0x68d   :  { %4633 = vmatpush.bf16.msrb.mxu2 %v6827_v26 }
 0x68e   :  { %4540 = vmatpush.bf16.msrb.mxu1 %v6818_v60 }
 0x68f   :  { %4124 = vmatpush.bf16.msra.mxu0 %v6782_v24  ;;  %4716 = vmatpush.bf16.msrb.mxu3 %v6836_v7 }
 0x691   :  { %4634 = vmatpush.bf16.msrb.mxu2 %v6826_v57 }
 0x692   :  { %4541 = vmatpush.bf16.msrb.mxu1 %v6817_v21 }
 0x693   :  { %4125 = vmatpush.bf16.msra.mxu0 %v6781_v31  ;;  %4717 = vmatpush.bf16.msrb.mxu3 %v6835_v39  ;;  %v6844_v39 = vld [vmem:[%s11146_s6 + $0x238] sm:$0xff] }
 0x695   :  { %v3846_v25 = vpop.f32.mrf.mxu2  ;;  %v3860_v12 = vpop.f32.mrf.mxu3 }
 0x696   :  { %v3847_v0 = vadd.f32 %v3846_v25, %v3833_v44  ;;  %v6825_v25 = vld [vmem:[%s11146_s6 + $0x1a0] sm:$0xff]  ;;  %4542 = vmatpush.bf16.msrb.mxu1 %v6816_v15  ;;  %v6823_v44 = vld [vmem:[%s11146_s6 + $0x190] sm:$0xff] }
 0x697   :  { %4454 = vmatpush.bf16.msrb.mxu0 %v6812_v49  ;;  %4718 = vmatpush.bf16.msrb.mxu3 %v6834_v53 }
 0x698   :  { %v3861_v37 = vadd.f32 %v3860_v12, %v3847_v0  ;;  %4635 = vmatpush.bf16.msrb.mxu2 %v6825_v25  ;;  %v6852_v25 = vld [vmem:[%s11146_s6 + $0x278] sm:$0xff] }
 0x69a   :  { %4543 = vmatpush.bf16.msrb.mxu1 %v6815_v13  ;;  %v6843_v13 = vld [vmem:[%s11146_s6 + $0x230] sm:$0xff] }
 0x69b   :  { %4455 = vmatpush.bf16.msrb.mxu0 %v6811_v36  ;;  %4719 = vmatpush.bf16.msrb.mxu3 %v6833_v1 }
 0x69c   :  { %4636 = vmatpush.bf16.msrb.mxu2 %v6824_v14 }
 0x69d   :  { %v3848_v23 = vpop.f32.mrf.mxu2  ;;  %v3862_v45 = vpop.f32.mrf.mxu3 }
 0x69e   :  { %v3849_v16 = vadd.f32 %v3848_v23, %v3835_v3  ;;  %v6831_v23 = vld [vmem:[%s11146_s6 + $0x1d0] sm:$0xff] }
 0x69f   :  { %4456 = vmatpush.bf16.msrb.mxu0 %v6810_v6  ;;  %4720 = vmatpush.bf16.msrb.mxu3 %v6832_v43 }
 0x6a0   :  { %v3863_v47 = vadd.f32 %v3862_v45, %v3849_v16  ;;  %4637 = vmatpush.bf16.msrb.mxu2 %v6823_v44  ;;  %v6821_v16 = vld [vmem:[%s11146_s6 + $0x180] sm:$0xff] }
 0x6a3   :  { %4457 = vmatpush.bf16.msrb.mxu0 %v6809_v10  ;;  %4721 = vmatpush.bf16.msrb.mxu3 %v6831_v23  ;;  %v6851_v23 = vld [vmem:[%s11146_s6 + $0x270] sm:$0xff] }
 0x6a4   :  { %4638 = vmatpush.bf16.msrb.mxu2 %v6822_v35 }
 0x6a7   :  { %4458 = vmatpush.bf16.msrb.mxu0 %v6808_v59  ;;  %4722 = vmatpush.bf16.msrb.mxu3 %v6830_v33 }
 0x6a8   :  { %4639 = vmatpush.bf16.msrb.mxu2 %v6821_v16 }
 0x6ab   :  { %4459 = vmatpush.bf16.msrb.mxu0 %v6807_v4  ;;  %4723 = vmatpush.bf16.msrb.mxu3 %v6829_v22 }
 0x6da   :  { %v3874_v34 = vpop.f32.mrf.mxu0  ;;  %v3888_v48 = vpop.f32.mrf.mxu1 }
 0x6db   :  { %v3875_v63 = vadd.f32 %v3874_v34, %v3861_v37  ;;  %v6806_v34 = vld [vmem:[%s11146_s6 + $0x108] sm:$0xff] }
 0x6dc   :  { %4460 = vmatpush.bf16.msrb.mxu0 %v6806_v34  ;;  %v6859_v34 = vld [vmem:[%s11146_s6 + $0x2b0] sm:$0xff] }
 0x6dd   :  { %v3889_v9 = vadd.f32 %v3888_v48, %v3875_v63  ;;  %v6814_v48 = vld [vmem:[%s11146_s6 + $0x148] sm:$0xff] }
 0x6de   :  { %4544 = vmatpush.bf16.msrb.mxu1 %v6814_v48  ;;  %v6867_v48 = vld [vmem:[%s11146_s6 + $0x2f0] sm:$0xff] }
 0x6e0   :  { %4461 = vmatpush.bf16.msrb.mxu0 %v6805_v40  ;;  %v6858_v40 = vld [vmem:[%s11146_s6 + $0x2a8] sm:$0xff] }
 0x6e2   :  { %v3876_v29 = vpop.f32.mrf.mxu0  ;;  %v3890_v51 = vpop.f32.mrf.mxu1  ;;  %4545 = vmatpush.bf16.msrb.mxu1 %v6813_v41  ;;  %v6866_v41 = vld [vmem:[%s11146_s6 + $0x2e8] sm:$0xff] }
 0x6e3   :  { %v3877_v52 = vadd.f32 %v3876_v29, %v3863_v47 }
 0x6e5   :  { %v3891_v54 = vadd.f32 %v3890_v51, %v3877_v52 }
 0x6e7   :  { %v6916_v38 = vpack.c.bf16 %v3891_v54, %v3889_v9 }
 0x6e9   :  { %6917 = vst [vmem:[#allocation4] sm:$0xff] %v6916_v38   ;;  %v3942_v50 = vpop.f32.mrf.mxu2 }
 0x6eb   :  { %v3970_v20 = vpop.f32.mrf.mxu0 }
 0x6f0   :  { %v4022_v61 = vld [vmem:[#allocation4] sm:$0x1]  ;;  %v4196_v9 = vld [vmem:[#allocation4] sm:$0x2]  ;;  %v4374_v1 = vld [vmem:[#allocation4] sm:$0x4] }
 0x6f1   :  { %v3956_v55 = vpop.f32.mrf.mxu3  ;;  %v3944_v2 = vpop.f32.mrf.mxu2  ;;  %v4059_v54 = vunpack.c.l.b16 %v4022_v61  ;;  %v4217_v18 = vunpack.c.l.b16 %v4196_v9  ;;  %v6840_v61 = vld [vmem:[%s11146_s6 + $0x218] sm:$0xff] }
 0x6f2   :  { %v3957_v30 = vadd.f32 %v3956_v55, %v3942_v50 }
 0x6f3   :  { %v3972_v37 = vpop.f32.mrf.mxu0  ;;  %v5910_v38 = vunpack.i.l.s16 %v4059_v54  ;;  %v5992_v32 = vunpack.i.l.s16 %v4217_v18 }
 0x6f4   :  { %v3971_v19 = vadd.f32 %v3970_v20, %v3957_v30  ;;  %v4552_v20 = vld [vmem:[#allocation4] sm:$0x8]  ;;  %v6842_v30 = vld [vmem:[%s11146_s6 + $0x228] sm:$0xff] }
 0x6f5   :  { %v4065_v17 = vrot.slane %v5910_v38, 1  ;;  %v4223_v36 = vrot.slane %v5992_v32, 2  ;;  %v4307_v58 = vrot.slane %v5992_v32, 3  ;;  %v4573_v33 = vunpack.c.l.b16 %v4552_v20  ;;  %v6856_v32 = vld [vmem:[%s11146_s6 + $0x298] sm:$0xff]  ;;  %v6853_v20 = vld [vmem:[%s11146_s6 + $0x280] sm:$0xff] }
 0x6f7   :  { %v6188_v22 = vunpack.i.l.s16 %v4573_v33  ;;  %v6900_v33 = vld [vmem:[%s11146_s6 + $0x3f8] sm:$0xff] }
 0x6f9   :  { %v3958_v56 = vpop.f32.mrf.mxu3 }
 0x6fa   :  { %v3959_v0 = vadd.f32 %v3958_v56, %v3944_v2  ;;  %v6860_v2 = vld [vmem:[%s11146_s6 + $0x2b8] sm:$0xff] }
 0x6fb   :  { %v6868_v56 = vld [vmem:[%s11146_s6 + $0x2f8] sm:$0xff] }
 0x6fc   :  { %v3973_v63 = vadd.f32 %v3972_v37, %v3959_v0 }
 0x701   :  { %v3984_v12 = vpop.f32.mrf.mxu1 }
 0x702   :  { %v3985_v47 = vadd.f32 %v3984_v12, %v3971_v19  ;;  %v4395_v12 = vunpack.c.l.b16 %v4374_v1  ;;  %v6841_v19 = vld [vmem:[%s11146_s6 + $0x220] sm:$0xff]  ;;  %v6854_v1 = vld [vmem:[%s11146_s6 + $0x288] sm:$0xff] }
 0x707   :  { %v3998_v3 = vpop.f32.mrf.mxu2 }
 0x708   :  { %v4012_v8 = vpop.f32.mrf.mxu3  ;;  %v3999_v29 = vadd.f32 %v3998_v3, %v3985_v47  ;;  %v6090_v3 = vunpack.i.l.s16 %v4395_v12 }
 0x709   :  { %v3986_v45 = vpop.f32.mrf.mxu1 }
 0x70a   :  { %v3987_v27 = vadd.f32 %v3986_v45, %v3973_v63  ;;  %v4013_v24 = vadd.f32 %v4012_v8, %v3999_v29  ;;  %v6850_v8 = vld [vmem:[%s11146_s6 + $0x268] sm:$0xff]  ;;  %v4401_v45 = vrot.slane %v6090_v3, 4  ;;  %v6849_v29 = vld [vmem:[%s11146_s6 + $0x260] sm:$0xff] }
 0x70f   :  { %v4000_v11 = vpop.f32.mrf.mxu2 }
 0x710   :  { %v4001_v42 = vadd.f32 %v4000_v11, %v3987_v27  ;;  %v4014_v52 = vpop.f32.mrf.mxu3  ;;  %v4485_v27 = vrot.slane %v6090_v3, 5  ;;  %v6857_v11 = vld [vmem:[%s11146_s6 + $0x2a0] sm:$0xff] }
 0x712   :  { %v4015_v51 = vadd.f32 %v4014_v52, %v4001_v42  ;;  %v6865_v42 = vld [vmem:[%s11146_s6 + $0x2e0] sm:$0xff] }
 0x714   :  { %v6921_v62 = vpack.c.bf16 %v4015_v51, %v4013_v24  ;;  %v4579_v24 = vrot.slane %v6188_v22, 6  ;;  %v4663_v51 = vrot.slane %v6188_v22, 7 }
 0x716   :  { %6922 = vst [vmem:[#allocation4 + $0x8] sm:$0xff] %v6921_v62  }
 0x71d   :  { %v4023_v31 = vld [vmem:[#allocation4 + $0x8] sm:$0x1]  ;;  %v4197_v49 = vld [vmem:[#allocation4 + $0x8] sm:$0x2]  ;;  %v4375_v60 = vld [vmem:[#allocation4 + $0x8] sm:$0x4] }
 0x71e   :  { %v4060_v5 = vunpack.c.l.b16 %v4023_v31  ;;  %v4218_v28 = vunpack.c.l.b16 %v4197_v49  ;;  %v4553_v59 = vld [vmem:[#allocation4 + $0x8] sm:$0x8]  ;;  %v4396_v4 = vunpack.c.l.b16 %v4375_v60  ;;  %v6848_v49 = vld [vmem:[%s11146_s6 + $0x258] sm:$0xff]  ;;  %v6863_v60 = vld [vmem:[%s11146_s6 + $0x2d0] sm:$0xff] }
 0x71f   :  { %v4574_v44 = vunpack.c.l.b16 %v4553_v59 }
 0x720   :  { %v5911_v46 = vunpack.i.l.s16 %v4060_v5  ;;  %v5993_v7 = vunpack.i.l.s16 %v4218_v28  ;;  %v6091_v35 = vunpack.i.l.s16 %v4396_v4  ;;  %v4907_v5 = vld [vmem:[#allocation4 + $0xc] sm:$0x2] }
 0x721   :  { %v6189_v0 = vunpack.i.l.s16 %v4574_v44 }
 0x722   :  { %v4067_v26 = vsel %vm4066_vm13, %v5911_v46, %v4065_v17  ;;  %v4131_v50 = vrot.slane %v5911_v46, 7  ;;  %v4224_v55 = vrot.slane %v5993_v7, 1  ;;  %v4308_v6 = vrot.slane %v5993_v7, 2  ;;  %v6864_v17 = vld [vmem:[%s11146_s6 + $0x2d8] sm:$0xff]  ;;  %v4730_v7 = vld [vmem:[#allocation4 + $0x4] sm:$0x1] }
 0x723   :  { %v4068_v57 = vpack.c.b16 %v4067_v26, %v4067_v26  ;;  %v4402_v16 = vrot.slane %v6091_v35, 3  ;;  %v4486_v37 = vrot.slane %v6091_v35, 4  ;;  %v4580_v47 = vrot.slane %v6189_v0, 5  ;;  %v4906_v26 = vld [vmem:[#allocation4 + $0x4] sm:$0x2]  ;;  %v6892_v35 = vld [vmem:[%s11146_s6 + $0x3b8] sm:$0xff] }
 0x724   :  { %v4132_v53 = vsel %vm4066_vm13, %v4131_v50, %v5910_v38  ;;  %v4225_v10 = vsel %vm4066_vm13, %v4224_v55, %v4223_v36  ;;  %v4309_v21 = vsel %vm4066_vm13, %v4308_v6, %v4307_v58  ;;  %v4664_v63 = vrot.slane %v6189_v0, 6  ;;  %v4731_v38 = vld [vmem:[#allocation4 + $0xc] sm:$0x1] }
 0x725   :  { %4126 = vmatmul.bf16.vlgmr.msra.gmra.mxu0 %v4068_v57  ;;  %v4133_v15 = vpack.c.b16 %v4132_v53, %v4132_v53  ;;  %v4226_v14 = vpack.c.b16 %v4225_v10, %v4225_v10  ;;  %v4310_v43 = vpack.c.b16 %v4309_v21, %v4309_v21  ;;  %v4403_v52 = vsel %vm4066_vm13, %v4402_v16, %v4401_v45  ;;  %v6839_v36 = vld [vmem:[%s11146_s6 + $0x210] sm:$0xff]  ;;  %v6838_v53 = vld [vmem:[%s11146_s6 + $0x208] sm:$0xff] }
 0x726   :  { %4809 = vmatpush.bf16.msra.mxu0 %v6844_v39  ;;  %v4487_v62 = vsel %vm4066_vm13, %v4486_v37, %v4485_v27  ;;  %v4581_v9 = vsel %vm4066_vm13, %v4580_v47, %v4579_v24  ;;  %v4665_v54 = vsel %vm4066_vm13, %v4664_v63, %v4663_v51  ;;  %v4404_v18 = vpack.c.b16 %v4403_v52, %v4403_v52  ;;  %v6847_v50 = vld [vmem:[%s11146_s6 + $0x250] sm:$0xff]  ;;  %v6882_v27 = vld [vmem:[%s11146_s6 + $0x368] sm:$0xff]  ;;  %v6873_v52 = vld [vmem:[%s11146_s6 + $0x320] sm:$0xff] }
 0x727   :  { %4191 = vmatmul.bf16.vlgmr.msra.gmra.mxu1 %v4133_v15  ;;  %4284 = vmatmul.bf16.vlgmr.msra.gmra.mxu2 %v4226_v14  ;;  %v4488_v31 = vpack.c.b16 %v4487_v62, %v4487_v62  ;;  %v4582_v28 = vpack.c.b16 %v4581_v9, %v4581_v9  ;;  %v4666_v46 = vpack.c.b16 %v4665_v54, %v4665_v54  ;;  %v4752_v58 = vunpack.c.l.b16 %v4731_v38  ;;  %v6855_v55 = vld [vmem:[%s11146_s6 + $0x290] sm:$0xff]  ;;  %v6862_v15 = vld [vmem:[%s11146_s6 + $0x2c8] sm:$0xff]  ;;  %v6881_v24 = vld [vmem:[%s11146_s6 + $0x360] sm:$0xff] }
 0x728   :  { %4368 = vmatmul.bf16.vlgmr.msra.gmra.mxu3 %v4310_v43  ;;  %4892 = vmatpush.bf16.msra.mxu1 %v6852_v25  ;;  %v4928_v39 = vunpack.c.l.b16 %v4907_v5  ;;  %v4751_v6 = vunpack.c.l.b16 %v4730_v7  ;;  %v4927_v57 = vunpack.c.l.b16 %v4906_v26  ;;  %v6846_v25 = vld [vmem:[%s11146_s6 + $0x248] sm:$0xff]  ;;  %v6837_v43 = vld [vmem:[%s11146_s6 + $0x200] sm:$0xff]  ;;  %v6891_v45 = vld [vmem:[%s11146_s6 + $0x3b0] sm:$0xff] }
 0x729   :  { %4986 = vmatpush.bf16.msra.mxu2 %v6860_v2  ;;  %5070 = vmatpush.bf16.msra.mxu3 %v6868_v56  ;;  %v6287_v10 = vunpack.i.l.s16 %v4752_v58  ;;  %v6876_v56 = vld [vmem:[%s11146_s6 + $0x338] sm:$0xff]  ;;  %v6899_v47 = vld [vmem:[%s11146_s6 + $0x3f0] sm:$0xff]  ;;  %v6889_v51 = vld [vmem:[%s11146_s6 + $0x3a0] sm:$0xff] }
 0x72a   :  { %4810 = vmatpush.bf16.msra.mxu0 %v6843_v13  ;;  %v6385_v21 = vunpack.i.l.s16 %v4928_v39  ;;  %v6286_v59 = vunpack.i.l.s16 %v4751_v6  ;;  %v6384_v14 = vunpack.i.l.s16 %v4927_v57  ;;  %v6845_v13 = vld [vmem:[%s11146_s6 + $0x240] sm:$0xff]  ;;  %v6872_v9 = vld [vmem:[%s11146_s6 + $0x318] sm:$0xff]  ;;  %v5263_v38 = vld [vmem:[#allocation4 + $0xc] sm:$0x8] }
 0x72b   :  { %v4757_v2 = vrot.slane %v6287_v10, 7  ;;  %v6897_v62 = vld [vmem:[%s11146_s6 + $0x3e0] sm:$0xff]  ;;  %v6880_v54 = vld [vmem:[%s11146_s6 + $0x358] sm:$0xff]  ;;  %v5262_v5 = vld [vmem:[#allocation4 + $0x4] sm:$0x8] }
 0x72c   :  { %4893 = vmatpush.bf16.msra.mxu1 %v6851_v23  ;;  %v4934_v4 = vrot.slane %v6385_v21, 1  ;;  %v4840_v12 = vrot.slane %v6286_v59, 1  ;;  %v5018_v44 = vrot.slane %v6385_v21, 2  ;;  %v6861_v23 = vld [vmem:[%s11146_s6 + $0x2c0] sm:$0xff]  ;;  %v5017_v0 = vrot.slane %v6384_v14, 3  ;;  %v6879_v7 = vld [vmem:[%s11146_s6 + $0x350] sm:$0xff] }
 0x72d   :  { %4987 = vmatpush.bf16.msra.mxu2 %v6859_v34  ;;  %5071 = vmatpush.bf16.msra.mxu3 %v6867_v48  ;;  %v6884_v34 = vld [vmem:[%s11146_s6 + $0x378] sm:$0xff]  ;;  %v4933_v48 = vrot.slane %v6384_v14, 2  ;;  %v6895_v58 = vld [vmem:[%s11146_s6 + $0x3d0] sm:$0xff]  ;;  %v5283_v39 = vunpack.c.l.b16 %v5262_v5  ;;  %v6886_v57 = vld [vmem:[%s11146_s6 + $0x388] sm:$0xff] }
 0x72e   :  { %4811 = vmatpush.bf16.msra.mxu0 %v6842_v30  ;;  %v4758_v30 = vsel %vm4066_vm13, %v4757_v2, %v6286_v59  ;;  %v4841_v3 = vsel %vm4066_vm13, %v6287_v10, %v4840_v12 }
 0x72f   :  { %v4759_v16 = vpack.c.b16 %v4758_v30, %v4758_v30  ;;  %v4842_v22 = vpack.c.b16 %v4841_v3, %v4841_v3  ;;  %v6580_v21 = vunpack.i.l.s16 %v5283_v39  ;;  %v6903_v39 = vld [vmem:[%s11148_s8 + $0x10] sm:$0xff] }
 0x730   :  { %4894 = vmatpush.bf16.msra.mxu1 %v6850_v8  ;;  %v4935_v8 = vsel %vm4066_vm13, %v4934_v4, %v4933_v48  ;;  %v6893_v4 = vld [vmem:[%s11146_s6 + $0x3c0] sm:$0xff] }
 0x731   :  { %4988 = vmatpush.bf16.msra.mxu2 %v6858_v40  ;;  %5072 = vmatpush.bf16.msra.mxu3 %v6866_v41  ;;  %v6875_v40 = vld [vmem:[%s11146_s6 + $0x330] sm:$0xff]  ;;  %v5019_v41 = vsel %vm4066_vm13, %v5018_v44, %v5017_v0  ;;  %v4936_v37 = vpack.c.b16 %v4935_v8, %v4935_v8  ;;  %v5373_v12 = vrot.slane %v6580_v21, 7 }
 0x732   :  { %4812 = vmatpush.bf16.msra.mxu0 %v6841_v19  ;;  %v6883_v19 = vld [vmem:[%s11146_s6 + $0x370] sm:$0xff]  ;;  %v5020_v63 = vpack.c.b16 %v5019_v41, %v5019_v41 }
 0x734   :  { %4895 = vmatpush.bf16.msra.mxu1 %v6849_v29  ;;  %v6874_v29 = vld [vmem:[%s11146_s6 + $0x328] sm:$0xff] }
 0x735   :  { %4989 = vmatpush.bf16.msra.mxu2 %v6857_v11  ;;  %5073 = vmatpush.bf16.msra.mxu3 %v6865_v42  ;;  %v6890_v11 = vld [vmem:[%s11146_s6 + $0x3a8] sm:$0xff] }
 0x736   :  { %4462 = vmatmul.bf16.vlgmr.msrb.gmra.mxu0 %v4404_v18  ;;  %v6898_v42 = vld [vmem:[%s11146_s6 + $0x3e8] sm:$0xff] }
 0x737   :  { %4813 = vmatpush.bf16.msra.mxu0 %v6840_v61  ;;  %4546 = vmatmul.bf16.vlgmr.msrb.gmra.mxu1 %v4488_v31  ;;  %v5085_v61 = vld [vmem:[#allocation4 + $0xc] sm:$0x4]  ;;  %v5084_v18 = vld [vmem:[#allocation4 + $0x4] sm:$0x4]  ;;  %v6888_v31 = vld [vmem:[%s11146_s6 + $0x398] sm:$0xff] }
 0x738   :  { %4640 = vmatmul.bf16.vlgmr.msrb.gmra.mxu2 %v4582_v28  ;;  %4724 = vmatmul.bf16.vlgmr.msrb.gmra.mxu3 %v4666_v46  ;;  %v6871_v28 = vld [vmem:[%s11146_s6 + $0x310] sm:$0xff]  ;;  %v5105_v46 = vunpack.c.l.b16 %v5084_v18 }
 0x739   :  { %4896 = vmatpush.bf16.msra.mxu1 %v6848_v49  ;;  %4990 = vmatpush.bf16.msra.mxu2 %v6856_v32  ;;  %v6896_v49 = vld [vmem:[%s11146_s6 + $0x3d8] sm:$0xff]  ;;  %v5106_v32 = vunpack.c.l.b16 %v5085_v61 }
 0x73a   :  { %5074 = vmatpush.bf16.msra.mxu3 %v6864_v17  ;;  %v5284_v17 = vunpack.c.l.b16 %v5263_v38 }
 0x73b   :  { %4814 = vmatpush.bf16.msra.mxu0 %v6839_v36  ;;  %v6887_v36 = vld [vmem:[%s11146_s6 + $0x390] sm:$0xff]  ;;  %v6483_v26 = vunpack.i.l.s16 %v5106_v32  ;;  %v6904_v32 = vld [vmem:[%s11148_s8 + $0x18] sm:$0xff] }
 0x73c   :  { %v6581_v6 = vunpack.i.l.s16 %v5284_v17 }
 0x73d   :  { %4897 = vmatpush.bf16.msra.mxu1 %v6847_v50  ;;  %4991 = vmatpush.bf16.msra.mxu2 %v6855_v55  ;;  %v6870_v50 = vld [vmem:[%s11146_s6 + $0x308] sm:$0xff]  ;;  %v6482_v55 = vunpack.i.l.s16 %v5105_v46  ;;  %v5112_v10 = vrot.slane %v6483_v26, 3 }
 0x73e   :  { %5075 = vmatpush.bf16.msra.mxu3 %v6863_v60  ;;  %v6878_v60 = vld [vmem:[%s11146_s6 + $0x348] sm:$0xff]  ;;  %v5374_v14 = vrot.slane %v6581_v6, 6 }
 0x73f   :  { %4815 = vmatpush.bf16.msra.mxu0 %v6838_v53  ;;  %v6894_v53 = vld [vmem:[%s11146_s6 + $0x3c8] sm:$0xff]  ;;  %v5111_v59 = vrot.slane %v6482_v55, 4  ;;  %v5195_v2 = vrot.slane %v6482_v55, 5 }
 0x740   :  { %v6902_v55 = vld [vmem:[%s11148_s8 + $0x8] sm:$0xff] }
 0x741   :  { %4898 = vmatpush.bf16.msra.mxu1 %v6846_v25  ;;  %4992 = vmatpush.bf16.msra.mxu2 %v6854_v1  ;;  %v5196_v25 = vrot.slane %v6483_v26, 4  ;;  %v6869_v1 = vld [vmem:[%s11146_s6 + $0x300] sm:$0xff] }
 0x742   :  { %5076 = vmatpush.bf16.msra.mxu3 %v6862_v15  ;;  %v5290_v15 = vrot.slane %v6581_v6, 5  ;;  %v5543_v6 = vld [vmem:[%s11150_s10 + $0x28] sm:$0x3] }
 0x743   :  { %4816 = vmatpush.bf16.msra.mxu0 %v6837_v43  ;;  %v6877_v43 = vld [vmem:[%s11146_s6 + $0x340] sm:$0xff]  ;;  %v5197_v44 = vsel %vm4066_vm13, %v5196_v25, %v5195_v2 }
 0x744   :  { %v6901_v25 = vld [vmem:[%s11148_s8] sm:$0xff] }
 0x745   :  { %4899 = vmatpush.bf16.msra.mxu1 %v6845_v13  ;;  %4993 = vmatpush.bf16.msra.mxu2 %v6853_v20  ;;  %v5113_v13 = vsel %vm4066_vm13, %v5112_v10, %v5111_v59  ;;  %v5289_v20 = vrot.slane %v6580_v21, 6  ;;  %v6912_v59 = vld [vmem:[%s11150_s10 + $0x20] sm:$0xff] }
 0x746   :  { %5077 = vmatpush.bf16.msra.mxu3 %v6861_v23  ;;  %4817 = vmatmul.bf16.vlgmr.msra.gmra.mxu0 %v4759_v16  ;;  %v5114_v48 = vpack.c.b16 %v5113_v13, %v5113_v13  ;;  %v6910_v13 = vld [vmem:[%s11150_s10 + $0x10] sm:$0xff] }
 0x747   :  { %5164 = vmatpush.bf16.msrb.mxu0 %v6876_v56  ;;  %v6885_v56 = vld [vmem:[%s11146_s6 + $0x380] sm:$0xff]  ;;  %v5291_v23 = vsel %vm4066_vm13, %v5290_v15, %v5289_v20 }
 0x748   :  { %4900 = vmatmul.bf16.vlgmr.msra.gmra.mxu1 %v4842_v22  ;;  %4994 = vmatmul.bf16.vlgmr.msra.gmra.mxu2 %v4936_v37 }
 0x749   :  { %5248 = vmatpush.bf16.msrb.mxu1 %v6884_v34  ;;  %5342 = vmatpush.bf16.msrb.mxu2 %v6892_v35  ;;  %v5375_v34 = vsel %vm4066_vm13, %v5374_v14, %v5373_v12  ;;  %v5198_v35 = vpack.c.b16 %v5197_v44, %v5197_v44 }
 0x74a   :  { %5426 = vmatpush.bf16.msrb.mxu3 %v6900_v33  ;;  %v5292_v33 = vpack.c.b16 %v5291_v23, %v5291_v23  ;;  %v5376_v30 = vpack.c.b16 %v5375_v34, %v5375_v34 }
 0x74b   :  { %5165 = vmatpush.bf16.msrb.mxu0 %v6875_v40  ;;  %5078 = vmatmul.bf16.vlgmr.msra.gmra.mxu3 %v5020_v63 }
 0x74d   :  { %5249 = vmatpush.bf16.msrb.mxu1 %v6883_v19  ;;  %5343 = vmatpush.bf16.msrb.mxu2 %v6891_v45 }
 0x74e   :  { %5427 = vmatpush.bf16.msrb.mxu3 %v6899_v47  ;;  %v5461_v47 = vld [vmem:[%s11148_s8 + $0x38] sm:$0xf] }
 0x74f   :  { %5166 = vmatpush.bf16.msrb.mxu0 %v6874_v29  ;;  %v5495_v63 = vunpack.c.l.b16 %v5461_v47 }
 0x751   :  { %5250 = vmatpush.bf16.msrb.mxu1 %v6882_v27  ;;  %5344 = vmatpush.bf16.msrb.mxu2 %v6890_v11  ;;  %v5503_v29 = vpack.c.b16 %v5495_v63, %v5495_v63 }
 0x752   :  { %5428 = vmatpush.bf16.msrb.mxu3 %v6898_v42 }
 0x753   :  { %5167 = vmatpush.bf16.msrb.mxu0 %v6873_v52  ;;  %v5516_v27 = vsel %vm11529_vm0, %v5503_v29, 0  ;;  %v6907_v52 = vld [vmem:[%s11148_s8 + $0x30] sm:$0xff] }
 0x755   :  { %5251 = vmatpush.bf16.msrb.mxu1 %v6881_v24  ;;  %5345 = vmatpush.bf16.msrb.mxu2 %v6889_v51 }
 0x756   :  { %5429 = vmatpush.bf16.msrb.mxu3 %v6897_v62  ;;  %v6906_v62 = vld [vmem:[%s11148_s8 + $0x28] sm:$0xff] }
 0x757   :  { %5168 = vmatpush.bf16.msrb.mxu0 %v6872_v9  ;;  %v6905_v9 = vld [vmem:[%s11148_s8 + $0x20] sm:$0xff] }
 0x759   :  { %5252 = vmatpush.bf16.msrb.mxu1 %v6880_v54  ;;  %5346 = vmatpush.bf16.msrb.mxu2 %v6888_v31 }
 0x75a   :  { %5430 = vmatpush.bf16.msrb.mxu3 %v6896_v49 }
 0x75b   :  { %5169 = vmatpush.bf16.msrb.mxu0 %v6871_v28 }
 0x75d   :  { %5253 = vmatpush.bf16.msrb.mxu1 %v6879_v7  ;;  %5347 = vmatpush.bf16.msrb.mxu2 %v6887_v36 }
 0x75e   :  { %5431 = vmatpush.bf16.msrb.mxu3 %v6895_v58 }
 0x75f   :  { %5170 = vmatpush.bf16.msrb.mxu0 %v6870_v50 }
 0x761   :  { %5254 = vmatpush.bf16.msrb.mxu1 %v6878_v60  ;;  %5348 = vmatpush.bf16.msrb.mxu2 %v6886_v57  ;;  %v5569_v57 = vunpack.c.l.b16 %v5543_v6 }
 0x762   :  { %5432 = vmatpush.bf16.msrb.mxu3 %v6894_v53 }
 0x763   :  { %5171 = vmatpush.bf16.msrb.mxu0 %v6869_v1  ;;  %v5575_v10 = vpack.c.b16 %v5569_v57, %v5569_v57 }
 0x765   :  { %5255 = vmatpush.bf16.msrb.mxu1 %v6877_v43  ;;  %5349 = vmatpush.bf16.msrb.mxu2 %v6885_v56  ;;  %v5586_v1 = vsel %vm1119_vm6, %v5575_v10, 0  ;;  %v6911_v43 = vld [vmem:[%s11150_s10 + $0x18] sm:$0xff]  ;;  %vm5511_vm6 = vcmask 982016  }
 0x766   :  { %5433 = vmatpush.bf16.msrb.mxu3 %v6893_v4  ;;  %5172 = vmatmul.bf16.vlgmr.msrb.gmra.mxu0 %v5114_v48 }
 0x767   :  { %5518 = vmatpush.bf16.msra.mxu0 %v5516_v27  ;;  %v7350_v27 = vld [vmem:[%s11151_s11] ss:$0 sm:$0xff] }
 0x768   :  { %5256 = vmatmul.bf16.vlgmr.msrb.gmra.mxu1 %v5198_v35  ;;  %5350 = vmatmul.bf16.vlgmr.msrb.gmra.mxu2 %v5292_v33  ;;  %v7348_v35 = vld [vmem:[%s11147_s7] ss:$0 sm:$0xff] }
 0x769   :  { %5434 = vmatmul.bf16.vlgmr.msrb.gmra.mxu3 %v5376_v30  ;;  %5590 = vmatpush.bf16.msra.mxu1 %v5586_v1 }
 0x76b   :  { %5519 = vmatpush.bf16.msra.mxu0 %v6907_v52 }
 0x76d   :  { %5591 = vmatpush.bf16.msra.mxu1 %v6912_v59 }
 0x76f   :  { %5520 = vmatpush.bf16.msra.mxu0 %v6906_v62 }
 0x771   :  { %5592 = vmatpush.bf16.msra.mxu1 %v6911_v43 }
 0x773   :  { %5521 = vmatpush.bf16.msra.mxu0 %v6905_v9 }
 0x775   :  { %5593 = vmatpush.bf16.msra.mxu1 %v6910_v13 }
 0x777   :  { %5522 = vmatpush.bf16.msra.mxu0 %v6904_v32 }
 0x77b   :  { %5523 = vmatpush.bf16.msra.mxu0 %v6903_v39 }
 0x77f   :  { %5524 = vmatpush.bf16.msra.mxu0 %v6902_v55 }
 0x783   :  { %5525 = vmatpush.bf16.msra.mxu0 %v6901_v25 }
 0x7a2   :  { %v4127_v3 = vpop.f32.mrf.mxu0 }
 0x7a4   :  { %v4192_v0 = vpop.f32.mrf.mxu1 }
 0x7a5   :  { %v4193_v54 = vadd.f32 %v4192_v0, %v4127_v3 }
 0x7aa   :  { %v4129_v8 = vpop.f32.mrf.mxu0  ;;  %v4285_v40 = vpop.f32.mrf.mxu2 }
 0x7ab   :  { %v4369_v41 = vpop.f32.mrf.mxu3  ;;  %v4289_v49 = vadd.f32 %v4285_v40, %v4193_v54 }
 0x7ac   :  { %v4194_v16 = vpop.f32.mrf.mxu1 }
 0x7ad   :  { %v4373_v5 = vadd.f32 %v4369_v41, %v4289_v49  ;;  %v6909_v16 = vld [vmem:[%s11150_s10 + $0x8] sm:$0xff] }
 0x7ae   :  { %5594 = vmatpush.bf16.msra.mxu1 %v6909_v16 }
 0x7b2   :  { %v4287_v22 = vpop.f32.mrf.mxu2 }
 0x7b3   :  { %v4371_v19 = vpop.f32.mrf.mxu3  ;;  %v4463_v37 = vpop.f32.mrf.mxu0  ;;  %v6908_v22 = vld [vmem:[%s11150_s10] sm:$0xff] }
 0x7b4   :  { %v4547_v45 = vpop.f32.mrf.mxu1  ;;  %v4467_v28 = vadd.f32 %v4463_v37, %v4373_v5  ;;  %5595 = vmatpush.bf16.msra.mxu1 %v6908_v22  ;;  %v7349_v19 = vld [vmem:[%s11149_s9] ss:$0 sm:$0xff] }
 0x7b6   :  { %v4551_v58 = vadd.f32 %v4547_v45, %v4467_v28 }
 0x7bb   :  { %v4465_v11 = vpop.f32.mrf.mxu0  ;;  %v4641_v42 = vpop.f32.mrf.mxu2 }
 0x7bc   :  { %v4725_v24 = vpop.f32.mrf.mxu3  ;;  %v4549_v51 = vpop.f32.mrf.mxu1  ;;  %v4645_v26 = vadd.f32 %v4641_v42, %v4551_v58 }
 0x7be   :  { %v4729_v53 = vadd.f32 %v4725_v24, %v4645_v26 }
 0x7c3   :  { %v4643_v61 = vpop.f32.mrf.mxu2  ;;  %v4818_v38 = vpop.f32.mrf.mxu0 }
 0x7c4   :  { %v4727_v18 = vpop.f32.mrf.mxu3  ;;  %v4822_v21 = vadd.f32 %v4818_v38, %v4729_v53 }
 0x7c5   :  { %v4901_v31 = vpop.f32.mrf.mxu1 }
 0x7c6   :  { %v4905_v15 = vadd.f32 %v4901_v31, %v4822_v21 }
 0x7cb   :  { %v4995_v46 = vpop.f32.mrf.mxu2  ;;  %v4820_v17 = vpop.f32.mrf.mxu0 }
 0x7cc   :  { %v4999_v14 = vadd.f32 %v4995_v46, %v4905_v15 }
 0x7cd   :  { %v4903_v36 = vpop.f32.mrf.mxu1 }
 0x7ce   :  { %v5079_v7 = vpop.f32.mrf.mxu3 }
 0x7cf   :  { %v5083_v56 = vadd.f32 %v5079_v7, %v4999_v14 }
 0x7d3   :  { %v4997_v50 = vpop.f32.mrf.mxu2 }
 0x7d6   :  { %v5081_v60 = vpop.f32.mrf.mxu3 }
 0x7e3   :  { %v5173_v2 = vpop.f32.mrf.mxu0 }
 0x7e4   :  { %v5177_v20 = vadd.f32 %v5173_v2, %v5083_v56 }
 0x7e5   :  { %v5257_v4 = vpop.f32.mrf.mxu1 }
 0x7e6   :  { %v5261_v12 = vadd.f32 %v5257_v4, %v5177_v20 }
 0x7eb   :  { %v5175_v44 = vpop.f32.mrf.mxu0  ;;  %v5351_v23 = vpop.f32.mrf.mxu2 }
 0x7ec   :  { %v5355_v34 = vadd.f32 %v5351_v23, %v5261_v12  ;;  %v5435_v48 = vpop.f32.mrf.mxu3 }
 0x7ed   :  { %v5259_v33 = vpop.f32.mrf.mxu1 }
 0x7ee   :  { %v5439_v30 = vadd.f32 %v5435_v48, %v5355_v34 }
 0x7f0   :  { %v5444_v3 = vadd.f32 %v7348_v35, %v5439_v30 }
 0x7f2   :  { %v5445_v0 = vmax.f32 %v5444_v3, 0.0 }
 0x7f3   :  { %v5353_v8 = vpop.f32.mrf.mxu2 }
 0x7f4   :  { %v5446_v40 = vpack.c.bf16 %v5445_v0, %v5445_v0  ;;  %v5437_v41 = vpop.f32.mrf.mxu3 }
 0x7f6   :  { %6690 = vmatmul.msk.bf16.vlgmr.msra.gmra.mxu0 %vm5511_vm6, %v5446_v40 }
 0x873   :  { %v5527_v37 = vpop.f32.mrf.mxu0 }
 0x874   :  { %v5528_v45 = vadd.f32 %v7349_v19, %v5527_v37 }
 0x876   :  { %v5531_v47 = vmax.f32 %v5528_v45, 0.0 }
 0x878   :  { %v5532_v63 = vpack.c.bf16 %v5531_v47, %v5531_v47 }
 0x87a   :  { %6711 = vmatmul.msk.bf16.vlgmr.msra.gmra.mxu1 %vm5581_vm12, %v5532_v63 }
 0x87b   :  { %v5529_v29 = vpop.f32.mrf.mxu0 }
 0x8f7   :  { %v5597_v11 = vpop.f32.mrf.mxu1 }
 0x8f8   :  { %v5598_v42 = vadd.f32 %v7350_v27, %v5597_v11 }
 0x8fa   :  { %5601 = vst [vmem:[#allocation5] sm:$0x3] %v5598_v42 }
 0x8fb   :  { %5612 = dma.vmem_to_hbm [thread:$0]  %s5608_s30, 32, %s5610_s13, [#allocation6]  }
 0x8ff   :  { %v5599_v52 = vpop.f32.mrf.mxu1 }
 0x900   :  { %7375 = dma.done.wait [#allocation6], 32  }
 0x901   :  { %7376 = vsyncadd [#allocation6], 4294967264 }
 0x902   :  { %5617 = vsyncpa [#allocation6], 1 }

</bundles_post_ra>
